<compile_context>
chip_gen: v5e
topology: v5e:2x2
jax: 0.10.0
libtpu: 0.0.40
codegen_flags: <defaults>
</compile_context>

<pallas_src>
import functools

import numpy as np
import jax
import jax.numpy as jnp
from jax.experimental import pallas as pl
from jax.experimental.pallas import tpu as pltpu

_VMEM = pl.BlockSpec(memory_space=pltpu.MemorySpace.VMEM)   # whole-array-in-VMEM
_VMEM_LIMIT = 32 * 1024 * 1024                              # explicit, safe on v5e/v6e/v7x


# --------------------------------------------------------------------------
# host-side constant builders (tiny (.., 1, M) masks; no O(M^2) matrices)
# --------------------------------------------------------------------------

def _tap_masks(n, h, w):
    """mask[k, 0, m] = 1 iff the 3x3 tap k = (dh+1)*3 + (dw+1) of flat pixel m
    stays inside its own image ('same' zero padding otherwise)."""
    m = n * h * w
    hh = (np.arange(m) // w) % h
    ww = np.arange(m) % w
    masks = np.zeros((9, 1, m), np.float32)
    for k in range(9):
        dh, dw = k // 3 - 1, k % 3 - 1
        ok = (hh + dh >= 0) & (hh + dh < h) & (ww + dw >= 0) & (ww + dw < w)
        masks[k, 0] = ok.astype(np.float32)
    return masks


def _bfly_masks(n, h, w):
    """Butterfly bit masks for the segmented (W-aligned lane groups) reduction:
    bfly[i, 0, m] = 1 iff bit 2**i of (m mod W) is set."""
    m = n * h * w
    steps = int(round(np.log2(w)))
    assert 1 << steps == w, "W must be a power of two for the butterfly reduce"
    lanes = np.arange(m)
    out = np.zeros((steps, 1, m), np.float32)
    d = 1
    for i in range(steps):
        out[i, 0] = ((lanes // d) % 2).astype(np.float32)
        d *= 2
    return out


# --------------------------------------------------------------------------
# in-kernel helpers (shared by both kernels)
# --------------------------------------------------------------------------

def _im2col9(x, masks_ref, row_w, m):
    """Stack the 9 'same'-padded 3x3 shifts of x (C, M) into (9*C, M).
    Shifts are XLU lane rotations; out-of-image lanes are zeroed on the VPU."""
    parts = []
    for k in range(9):
        dh, dw = k // 3 - 1, k % 3 - 1
        off = dh * row_w + dw
        if off == 0:
            parts.append(x)
        else:
            parts.append(pltpu.roll(x, (-off) % m, axis=1) * masks_ref[k])
    return jnp.concatenate(parts, axis=0)


def _group_rms(x, bfly_ref, n_steps, m, inv_sqrt_w):
    """sqrt(mean(x^2)) over aligned lane groups of width 2**n_steps, via a
    log2(W) roll-and-add butterfly; every lane ends up holding its group RMS."""
    ss = x * x
    d = 1
    for i in range(n_steps):
        plus = pltpu.roll(ss, (m - d) % m, axis=1)    # value at lane m + d
        minus = pltpu.roll(ss, d, axis=1)             # value at lane m - d
        b = bfly_ref[i]                               # 1.0 where the d-bit is set
        ss = ss + b * minus + (1.0 - b) * plus
        d *= 2
    return jnp.sqrt(ss) * inv_sqrt_w


# --------------------------------------------------------------------------
# kernel 1: stem (folded in_conv + PixelUnshuffle + down 1x1) + all res blocks
# --------------------------------------------------------------------------

def _stem_res_kernel(xu_ref, wstem_ref, bstem_ref, masks_ref, bfly_ref,
                     scale_ref, wres_ref, bc_ref, wp_ref, bp_ref, o_ref, *,
                     eps, row_w, half, n_bfly, inv_sqrt_w):
    m = o_ref.shape[1]

    @pl.when(pl.program_id(0) == 0)
    def _():
        # stem: in_conv(3x3) o PixelUnshuffle(2) o down(1x1), folded on the host
        # into one 3x3 conv over the unshuffled input; K = 9*cin*4 im2col matmul.
        patches = _im2col9(xu_ref[...], masks_ref, row_w, m)
        o_ref[...] = (jnp.dot(wstem_ref[...], patches,
                              preferred_element_type=jnp.float32)
                      + bstem_ref[...])

    x = o_ref[...]                                    # VMEM-resident activation
    # RMSNorm over the W axis (per (n, c, h)), roll-butterfly + EUP reciprocal.
    rms = _group_rms(x, bfly_ref, n_bfly, m, inv_sqrt_w)
    xn = scale_ref[0] * x * pl.reciprocal(rms + eps, approx=True)
    # grouped 3x3 'same' conv: one K = 9*C matmul against block-diagonal weights.
    patches = _im2col9(xn, masks_ref, row_w, m)
    conv = (jnp.dot(wres_ref[0], patches, preferred_element_type=jnp.float32)
            + bc_ref[0])
    # sin gating: lin = first half of the channels, gate = second half.
    gated = conv[:half] * jnp.sin(conv[half:])
    # zero-init pointwise 1x1 + residual.
    o_ref[...] = (jnp.dot(wp_ref[0], gated, preferred_element_type=jnp.float32)
                  + bp_ref[0] + x)


def _stem_res(xu, wstem, bstem, masks, bfly, scale, wres, bc, wp, bp, *,
              row_w, eps=1e-8):
    cin4, m = xu.shape
    hidden, kstem = wstem.shape
    layers, _, kres = wres.shape
    half = wp.shape[2]
    n_bfly = bfly.shape[0]
    kern = functools.partial(
        _stem_res_kernel, eps=eps, row_w=row_w, half=half, n_bfly=n_bfly,
        inv_sqrt_w=1.0 / float(np.sqrt(row_w)))
    # TODO(synk): at real N*H*W add a leading "parallel" batch grid axis so
    # v7x's second TensorCore gets half the lanes (the W-reduction and the 3x3
    # halo never cross batch); at this toy M=128 it would break lane density.
    return pl.pallas_call(
        kern,
        out_shape=jax.ShapeDtypeStruct((hidden, m), jnp.float32),
        grid=(layers,),
        in_specs=[
            pl.BlockSpec((cin4, m), lambda i: (0, 0)),          # unshuffled input
            pl.BlockSpec((hidden, kstem), lambda i: (0, 0)),    # folded stem weight
            pl.BlockSpec((hidden, 1), lambda i: (0, 0)),        # stem bias
            pl.BlockSpec((9, 1, m), lambda i: (0, 0, 0)),       # 3x3 edge masks
            pl.BlockSpec((n_bfly, 1, m), lambda i: (0, 0, 0)),  # butterfly masks
            pl.BlockSpec((1, hidden, 1), lambda i: (i, 0, 0)),  # per-layer norm scale
            pl.BlockSpec((1, hidden, kres), lambda i: (i, 0, 0)),  # im2col conv weight
            pl.BlockSpec((1, hidden, 1), lambda i: (i, 0, 0)),  # conv bias
            pl.BlockSpec((1, hidden, half), lambda i: (i, 0, 0)),  # pointwise weight
            pl.BlockSpec((1, hidden, 1), lambda i: (i, 0, 0)),  # pointwise bias
        ],
        out_specs=pl.BlockSpec((hidden, m), lambda i: (0, 0)),  # VMEM-resident state
        compiler_params=pltpu.CompilerParams(
            dimension_semantics=("arbitrary",),                 # layers are sequential
            vmem_limit_bytes=_VMEM_LIMIT),
    )(xu, wstem, bstem, masks, bfly, scale, wres, bc, wp, bp)


# --------------------------------------------------------------------------
# kernel 2: head = up 1x1 conv + out RMSNorm + out 3x3 conv (fine grid)
# --------------------------------------------------------------------------

def _head_kernel(ys_ref, wu_ref, bu_ref, masks_ref, bfly_ref, scale_ref,
                 wo_ref, bo_ref, o_ref, *, eps, row_w, n_bfly, inv_sqrt_w):
    m = ys_ref.shape[1]
    # up 1x1 conv on the (already pixel-shuffled) trunk output.
    u = (jnp.dot(wu_ref[...], ys_ref[...], preferred_element_type=jnp.float32)
         + bu_ref[...])
    # out RMSNorm over the fine W axis.
    rms = _group_rms(u, bfly_ref, n_bfly, m, inv_sqrt_w)
    un = scale_ref[...] * u * pl.reciprocal(rms + eps, approx=True)
    # out 3x3 'same' conv as ONE K = 9*C im2col matmul (lane-dense output).
    patches = _im2col9(un, masks_ref, row_w, m)
    o_ref[...] = (jnp.dot(wo_ref[...], patches,
                          preferred_element_type=jnp.float32) + bo_ref[...])


def _head(ys, wu, bu, masks, bfly, scale, wo, bo, *, row_w, eps=1e-8):
    m = ys.shape[1]
    out_ch = wo.shape[0]
    kern = functools.partial(
        _head_kernel, eps=eps, row_w=row_w, n_bfly=bfly.shape[0],
        inv_sqrt_w=1.0 / float(np.sqrt(row_w)))
    return pl.pallas_call(
        kern,
        out_shape=jax.ShapeDtypeStruct((out_ch, m), jnp.float32),
        in_specs=[_VMEM] * 8,
        out_specs=_VMEM,
        compiler_params=pltpu.CompilerParams(vmem_limit_bytes=_VMEM_LIMIT),
    )(ys, wu, bu, masks, bfly, scale, wo, bo)


# --------------------------------------------------------------------------
# parameters
# --------------------------------------------------------------------------

def init_params(key, in_channels, out_channels, hidden_dim, layer_count, ps):
    # NOTE: ps (pixel_suffle=4) only sizes channels (hidden // ps**2); the
    # spatial Down/UpBlock shuffle factor is 2, matching the reference module.
    hd4 = hidden_dim // ps ** 2

    def wn(k, shape, s=0.1):
        return s * jax.random.normal(k, shape, jnp.float32)

    keys = jax.random.split(key, 8 + 2 * layer_count)
    params = {
        "in_conv_w": wn(keys[0], (hd4, in_channels, 3, 3)),
        "in_conv_b": wn(keys[1], (hd4,), 0.01),
        "down_w": wn(keys[2], (hidden_dim, hd4 * 4, 1, 1)),
        "down_b": wn(keys[3], (hidden_dim,), 0.01),
        "up_w": wn(keys[4], (hd4, hidden_dim // 4, 1, 1)),
        "up_b": wn(keys[5], (hd4,), 0.01),
        # TODO(synk): reference declares RMSNorm(hidden_dim) for out_norm but
        # applies it to a tensor with hidden_dim // ps**2 channels; the scale is
        # sized to the actual channel count here.
        "out_norm_scale": jnp.ones((hd4,), jnp.float32),
        "out_conv_w": wn(keys[6], (out_channels, hd4, 3, 3)),
        "out_conv_b": wn(keys[7], (out_channels,), 0.01),
        "res_blocks": [],
    }
    for i in range(layer_count):
        k0, k1 = keys[8 + 2 * i], keys[9 + 2 * i]
        params["res_blocks"].append({
            "norm_scale": jnp.ones((hidden_dim,), jnp.float32),
            "conv_w": wn(k0, (hidden_dim, hidden_dim // 2, 3, 3)),
            "conv_b": wn(k1, (hidden_dim,), 0.01),
            # SimpleResNetBlock zero-inits the pointwise conv (weight & bias).
            "pw_w": jnp.zeros((hidden_dim, hidden_dim // 2, 1, 1), jnp.float32),
            "pw_b": jnp.zeros((hidden_dim,), jnp.float32),
        })
    return params


def preprocess_params(params, *, batch, height, width):
    """One-time host-side prep: fold adjacent linear ops, build the tiny edge /
    butterfly masks, and lay weights out for the im2col (C, 9*C) matmuls."""
    in_w, in_b = params["in_conv_w"], params["in_conv_b"]
    down_w, down_b = params["down_w"], params["down_b"]
    up_w, up_b = params["up_w"], params["up_b"]
    out_w, out_b = params["out_conv_w"], params["out_conv_b"]
    norm_scale = params["out_norm_scale"]

    hd4, cin = in_w.shape[0], in_w.shape[1]
    hidden = down_w.shape[0]
    out_ch = out_w.shape[0]
    half = hidden // 2
    h2, w2 = height // 2, width // 2
    hpad = max(8, -(-hd4 // 8) * 8)          # pad head channels to a sublane tile

    # --- stem: in_conv(3x3) o PixelUnshuffle(2) o down(1x1)
    #     == 4x4/stride-2/pad-1 conv == 3x3 conv on the unshuffled input.
    wd = down_w.reshape(hidden, hd4, 2, 2)                    # [co, c1, rh, rw]
    wcomb = jnp.zeros((hidden, cin, 4, 4), jnp.float32)
    for rh in range(2):
        for rw in range(2):
            contrib = jnp.einsum("oc,cikl->oikl", wd[:, :, rh, rw], in_w)
            wcomb = wcomb.at[:, :, rh:rh + 3, rw:rw + 3].add(contrib)
    wpad = jnp.pad(wcomb, ((0, 0), (0, 0), (1, 1), (1, 1)))
    wstem = (wpad.reshape(hidden, cin, 3, 2, 3, 2)
             .transpose(0, 2, 4, 1, 3, 5).reshape(hidden, 9 * cin * 4))
    bstem = (down_b + jnp.einsum("ochw,c->o", wd, in_b)).reshape(hidden, 1)

    # --- res blocks: per-layer weights stacked along a leading layer axis;
    #     grouped 3x3 conv folded to block-diagonal im2col (C, 9*C) layout.
    scales, wres, bcs, wps, bps = [], [], [], [], []
    for blk in params["res_blocks"]:
        wk = blk["conv_w"].transpose(2, 3, 0, 1).reshape(9, hidden, half)
        w9 = jnp.zeros((9, hidden, hidden), jnp.float32)      # block-diag (groups=2)
        w9 = w9.at[:, :half, :half].set(wk[:, :half, :])
        w9 = w9.at[:, half:, half:].set(wk[:, half:, :])
        wres.append(w9.transpose(1, 0, 2).reshape(hidden, 9 * hidden))
        scales.append(blk["norm_scale"].reshape(hidden, 1))
        bcs.append(blk["conv_b"].reshape(hidden, 1))
        wps.append(blk["pw_w"].reshape(hidden, half))
        bps.append(blk["pw_b"].reshape(hidden, 1))

    # --- head: PixelShuffle handled as a wrapper layout op; up(1x1), out
    #     RMSNorm and out_conv(3x3, im2col) run in the head kernel.
    wu = jnp.zeros((hpad, hidden // 4), jnp.float32).at[:hd4].set(
        up_w.reshape(hd4, hidden // 4))
    bu = jnp.zeros((hpad, 1), jnp.float32).at[:hd4, 0].set(up_b)
    hscale = jnp.ones((hpad, 1), jnp.float32).at[:hd4, 0].set(norm_scale)
    wout = jnp.zeros((out_ch, 9, hpad), jnp.float32).at[:, :, :hd4].set(
        out_w.transpose(0, 2, 3, 1).reshape(out_ch, 9, hd4))
    wout = wout.reshape(out_ch, 9 * hpad)

    return {
        "stem_w": wstem, "stem_b": bstem,
        "res_masks": jnp.asarray(_tap_masks(batch, h2, w2)),
        "res_bfly": jnp.asarray(_bfly_masks(batch, h2, w2)),
        "res_scale": jnp.stack(scales), "res_w": jnp.stack(wres),
        "res_bc": jnp.stack(bcs), "res_wp": jnp.stack(wps),
        "res_bp": jnp.stack(bps),
        "head_wu": wu, "head_bu": bu, "head_scale": hscale,
        "head_masks": jnp.asarray(_tap_masks(batch, height, width)),
        "head_bfly": jnp.asarray(_bfly_masks(batch, height, width)),
        "head_wo": wout, "head_bo": out_b.reshape(out_ch, 1),
    }


# --------------------------------------------------------------------------
# forward
# --------------------------------------------------------------------------

def critic_forward(prep, x):
    n, cin, h, w = x.shape
    h2, w2 = h // 2, w // 2

    # Pure layout: PixelUnshuffle(2) of the raw input into channel-major
    # (cin*4, N*H2*W2).  This is data movement only (folded conv eats the rest).
    xu = (x.reshape(n, cin, h2, 2, w2, 2).transpose(1, 3, 5, 0, 2, 4)
          .reshape(cin * 4, n * h2 * w2))

    # stem + ALL SimpleResNetBlocks in one pallas_call (activation VMEM-resident).
    # TODO(synk): torch.utils.checkpoint only affects training memory; forward
    # values are identical, so it is not modeled.
    y = _stem_res(xu, prep["stem_w"], prep["stem_b"], prep["res_masks"],
                  prep["res_bfly"], prep["res_scale"], prep["res_w"],
                  prep["res_bc"], prep["res_wp"], prep["res_bp"], row_w=w2)

    # Pure layout: PixelShuffle(2) of the trunk output to the fine grid.
    hidden = y.shape[0]
    ys = (y.reshape(hidden // 4, 2, 2, n, h2, w2).transpose(0, 3, 4, 1, 5, 2)
          .reshape(hidden // 4, n * h * w))

    # head: up 1x1 + out RMSNorm + out 3x3 conv fused.
    out = _head(ys, prep["head_wu"], prep["head_bu"], prep["head_masks"],
                prep["head_bfly"], prep["head_scale"], prep["head_wo"],
                prep["head_bo"], row_w=w)
    out_ch = out.shape[0]
    return out.reshape(out_ch, n, h, w).transpose(1, 0, 2, 3)


# --------------------------------------------------------------------------
# main
# --------------------------------------------------------------------------

if __name__ == "__main__":
    B, C_IN, H, W = 2, 4, 16, 16
    OUT_CHANNELS = 1
    HIDDEN_DIM = 32
    LAYER_COUNT = 2
    PIXEL_SHUFFLE = 4

    key = jax.random.PRNGKey(0)
    k_params, k_x = jax.random.split(key)
    params = init_params(k_params, C_IN, OUT_CHANNELS, HIDDEN_DIM,
                         LAYER_COUNT, PIXEL_SHUFFLE)
    x = jax.random.normal(k_x, (B, C_IN, H, W), jnp.float32)

    prep = preprocess_params(params, batch=B, height=H, width=W)
    out = jax.jit(critic_forward)(prep, x)
    out = jax.block_until_ready(out)

    assert out.shape == (B, OUT_CHANNELS, H, W), out.shape
    assert out.dtype == jnp.float32
    assert bool(jnp.all(jnp.isfinite(out)))
    print("KERNEL_OK")
</pallas_src>

<mosaic_0001>
module attributes {stable_mosaic.version = 11 : i64} {
  func.func @_stem_res_kernel(%arg0: i32, %arg1: memref<16x128xf32, #tpu.memory_space<vmem>>, %arg2: memref<32x144xf32, #tpu.memory_space<vmem>>, %arg3: memref<32x1xf32, #tpu.memory_space<vmem>>, %arg4: memref<9x1x128xf32, #tpu.memory_space<vmem>>, %arg5: memref<3x1x128xf32, #tpu.memory_space<vmem>>, %arg6: memref<1x32x1xf32, #tpu.memory_space<vmem>>, %arg7: memref<1x32x288xf32, #tpu.memory_space<vmem>>, %arg8: memref<1x32x1xf32, #tpu.memory_space<vmem>>, %arg9: memref<1x32x16xf32, #tpu.memory_space<vmem>>, %arg10: memref<1x32x1xf32, #tpu.memory_space<vmem>>, %arg11: memref<32x128xf32, #tpu.memory_space<vmem>>) attributes {dimension_semantics = [#tpu.dimension_semantics<arbitrary>], iteration_bounds = array<i64: 2>, scalar_prefetch = 0 : i64, scratch_operands = 0 : i64, tpu.core_type = #tpu.core_type<tc>, window_params = [{pipeline_mode = #tpu.pipeline_mode<synchronous>, transform_indices = @transform_0, window_bounds = array<i64: 16, 128>}, {pipeline_mode = #tpu.pipeline_mode<synchronous>, transform_indices = @transform_1, window_bounds = array<i64: 32, 144>}, {pipeline_mode = #tpu.pipeline_mode<synchronous>, transform_indices = @transform_2, window_bounds = array<i64: 32, 1>}, {pipeline_mode = #tpu.pipeline_mode<synchronous>, transform_indices = @transform_3, window_bounds = array<i64: 9, 1, 128>}, {pipeline_mode = #tpu.pipeline_mode<synchronous>, transform_indices = @transform_4, window_bounds = array<i64: 3, 1, 128>}, {transform_indices = @transform_5, window_bounds = array<i64: 1, 32, 1>}, {transform_indices = @transform_6, window_bounds = array<i64: 1, 32, 288>}, {transform_indices = @transform_7, window_bounds = array<i64: 1, 32, 1>}, {transform_indices = @transform_8, window_bounds = array<i64: 1, 32, 16>}, {transform_indices = @transform_9, window_bounds = array<i64: 1, 32, 1>}, {pipeline_mode = #tpu.pipeline_mode<synchronous>, transform_indices = @transform_10, window_bounds = array<i64: 32, 128>}]} {
    %c0_i32 = arith.constant 0 : i32
    %0 = arith.cmpi eq, %arg0, %c0_i32 : i32
    %1 = arith.extui %0 : i1 to i32
    %c0_i32_0 = arith.constant 0 : i32
    %2 = arith.cmpi ne, %1, %c0_i32_0 : i32
    scf.if %2 {
      %c0_53 = arith.constant 0 : index
      %c0_54 = arith.constant 0 : index
      %113 = vector.load %arg1[%c0_53, %c0_54] : memref<16x128xf32, #tpu.memory_space<vmem>>, vector<16x128xf32>
      %c9_i32_55 = arith.constant 9 : i32
      %114 = tpu.dynamic_rotate %113 by %c9_i32_55 dim 1 : vector<16x128xf32>, i32 -> vector<16x128xf32>
      %c0_56 = arith.constant 0 : index
      %c0_57 = arith.constant 0 : index
      %c0_58 = arith.constant 0 : index
      %115 = vector.load %arg4[%c0_56, %c0_57, %c0_58] : memref<9x1x128xf32, #tpu.memory_space<vmem>>, vector<1x1x128xf32>
      %116 = vector.shape_cast %115 : vector<1x1x128xf32> to vector<1x128xf32>
      %117 = vector.broadcast %116 : vector<1x128xf32> to vector<16x128xf32>
      %118 = arith.mulf %114, %117 : vector<16x128xf32>
      %c8_i32_59 = arith.constant 8 : i32
      %119 = tpu.dynamic_rotate %113 by %c8_i32_59 dim 1 : vector<16x128xf32>, i32 -> vector<16x128xf32>
      %c1_60 = arith.constant 1 : index
      %c0_61 = arith.constant 0 : index
      %c0_62 = arith.constant 0 : index
      %120 = vector.load %arg4[%c1_60, %c0_61, %c0_62] : memref<9x1x128xf32, #tpu.memory_space<vmem>>, vector<1x1x128xf32>
      %121 = vector.shape_cast %120 : vector<1x1x128xf32> to vector<1x128xf32>
      %122 = vector.broadcast %121 : vector<1x128xf32> to vector<16x128xf32>
      %123 = arith.mulf %119, %122 : vector<16x128xf32>
      %c7_i32_63 = arith.constant 7 : i32
      %124 = tpu.dynamic_rotate %113 by %c7_i32_63 dim 1 : vector<16x128xf32>, i32 -> vector<16x128xf32>
      %c2_64 = arith.constant 2 : index
      %c0_65 = arith.constant 0 : index
      %c0_66 = arith.constant 0 : index
      %125 = vector.load %arg4[%c2_64, %c0_65, %c0_66] : memref<9x1x128xf32, #tpu.memory_space<vmem>>, vector<1x1x128xf32>
      %126 = vector.shape_cast %125 : vector<1x1x128xf32> to vector<1x128xf32>
      %127 = vector.broadcast %126 : vector<1x128xf32> to vector<16x128xf32>
      %128 = arith.mulf %124, %127 : vector<16x128xf32>
      %c1_i32_67 = arith.constant 1 : i32
      %129 = tpu.dynamic_rotate %113 by %c1_i32_67 dim 1 : vector<16x128xf32>, i32 -> vector<16x128xf32>
      %c3_68 = arith.constant 3 : index
      %c0_69 = arith.constant 0 : index
      %c0_70 = arith.constant 0 : index
      %130 = vector.load %arg4[%c3_68, %c0_69, %c0_70] : memref<9x1x128xf32, #tpu.memory_space<vmem>>, vector<1x1x128xf32>
      %131 = vector.shape_cast %130 : vector<1x1x128xf32> to vector<1x128xf32>
      %132 = vector.broadcast %131 : vector<1x128xf32> to vector<16x128xf32>
      %133 = arith.mulf %129, %132 : vector<16x128xf32>
      %c127_i32_71 = arith.constant 127 : i32
      %134 = tpu.dynamic_rotate %113 by %c127_i32_71 dim 1 : vector<16x128xf32>, i32 -> vector<16x128xf32>
      %c5_72 = arith.constant 5 : index
      %c0_73 = arith.constant 0 : index
      %c0_74 = arith.constant 0 : index
      %135 = vector.load %arg4[%c5_72, %c0_73, %c0_74] : memref<9x1x128xf32, #tpu.memory_space<vmem>>, vector<1x1x128xf32>
      %136 = vector.shape_cast %135 : vector<1x1x128xf32> to vector<1x128xf32>
      %137 = vector.broadcast %136 : vector<1x128xf32> to vector<16x128xf32>
      %138 = arith.mulf %134, %137 : vector<16x128xf32>
      %c121_i32_75 = arith.constant 121 : i32
      %139 = tpu.dynamic_rotate %113 by %c121_i32_75 dim 1 : vector<16x128xf32>, i32 -> vector<16x128xf32>
      %c6_76 = arith.constant 6 : index
      %c0_77 = arith.constant 0 : index
      %c0_78 = arith.constant 0 : index
      %140 = vector.load %arg4[%c6_76, %c0_77, %c0_78] : memref<9x1x128xf32, #tpu.memory_space<vmem>>, vector<1x1x128xf32>
      %141 = vector.shape_cast %140 : vector<1x1x128xf32> to vector<1x128xf32>
      %142 = vector.broadcast %141 : vector<1x128xf32> to vector<16x128xf32>
      %143 = arith.mulf %139, %142 : vector<16x128xf32>
      %c120_i32_79 = arith.constant 120 : i32
      %144 = tpu.dynamic_rotate %113 by %c120_i32_79 dim 1 : vector<16x128xf32>, i32 -> vector<16x128xf32>
      %c7_80 = arith.constant 7 : index
      %c0_81 = arith.constant 0 : index
      %c0_82 = arith.constant 0 : index
      %145 = vector.load %arg4[%c7_80, %c0_81, %c0_82] : memref<9x1x128xf32, #tpu.memory_space<vmem>>, vector<1x1x128xf32>
      %146 = vector.shape_cast %145 : vector<1x1x128xf32> to vector<1x128xf32>
      %147 = vector.broadcast %146 : vector<1x128xf32> to vector<16x128xf32>
      %148 = arith.mulf %144, %147 : vector<16x128xf32>
      %c119_i32_83 = arith.constant 119 : i32
      %149 = tpu.dynamic_rotate %113 by %c119_i32_83 dim 1 : vector<16x128xf32>, i32 -> vector<16x128xf32>
      %c8_84 = arith.constant 8 : index
      %c0_85 = arith.constant 0 : index
      %c0_86 = arith.constant 0 : index
      %150 = vector.load %arg4[%c8_84, %c0_85, %c0_86] : memref<9x1x128xf32, #tpu.memory_space<vmem>>, vector<1x1x128xf32>
      %151 = vector.shape_cast %150 : vector<1x1x128xf32> to vector<1x128xf32>
      %152 = vector.broadcast %151 : vector<1x128xf32> to vector<16x128xf32>
      %153 = arith.mulf %149, %152 : vector<16x128xf32>
      %154 = tpu.concatenate %118, %123, %128, %133, %113, %138, %143, %148, %153 in 0 : vector<16x128xf32>, vector<16x128xf32>, vector<16x128xf32>, vector<16x128xf32>, vector<16x128xf32>, vector<16x128xf32>, vector<16x128xf32>, vector<16x128xf32>, vector<16x128xf32> -> vector<144x128xf32>
      %c0_87 = arith.constant 0 : index
      %c0_88 = arith.constant 0 : index
      %155 = vector.load %arg2[%c0_87, %c0_88] : memref<32x144xf32, #tpu.memory_space<vmem>>, vector<32x144xf32>
      %cst_89 = arith.constant dense<0.000000e+00> : vector<32x128xf32>
      %156 = tpu.matmul %155, %154, %cst_89 {dimension_numbers = #tpu.dot_dimension_numbers<[1], [0], [0], [1], [0, 0, 1, 1], [], []>} : vector<32x144xf32>, vector<144x128xf32>, vector<32x128xf32> -> vector<32x128xf32>
      %c0_90 = arith.constant 0 : index
      %c0_91 = arith.constant 0 : index
      %157 = vector.load %arg3[%c0_90, %c0_91] : memref<32x1xf32, #tpu.memory_space<vmem>>, vector<32x1xf32>
      %158 = vector.broadcast %157 : vector<32x1xf32> to vector<32x128xf32>
      %159 = arith.addf %156, %158 : vector<32x128xf32>
      %c0_92 = arith.constant 0 : index
      %c0_93 = arith.constant 0 : index
      %160 = vector.load %arg11[%c0_92, %c0_93] : memref<32x128xf32, #tpu.memory_space<vmem>>, vector<32x128xf32>
      tpu.vector_store %arg11[%c0_92, %c0_93], %159 {strides = array<i32>} : memref<32x128xf32, #tpu.memory_space<vmem>>, vector<32x128xf32>,
    } else {
    }
    %c0 = arith.constant 0 : index
    %c0_1 = arith.constant 0 : index
    %3 = vector.load %arg11[%c0, %c0_1] : memref<32x128xf32, #tpu.memory_space<vmem>>, vector<32x128xf32>
    %4 = arith.mulf %3, %3 : vector<32x128xf32>
    %c127_i32 = arith.constant 127 : i32
    %5 = tpu.dynamic_rotate %4 by %c127_i32 dim 1 : vector<32x128xf32>, i32 -> vector<32x128xf32>
    %c1_i32 = arith.constant 1 : i32
    %6 = tpu.dynamic_rotate %4 by %c1_i32 dim 1 : vector<32x128xf32>, i32 -> vector<32x128xf32>
    %c0_2 = arith.constant 0 : index
    %c0_3 = arith.constant 0 : index
    %c0_4 = arith.constant 0 : index
    %7 = vector.load %arg5[%c0_2, %c0_3, %c0_4] : memref<3x1x128xf32, #tpu.memory_space<vmem>>, vector<1x1x128xf32>
    %8 = vector.shape_cast %7 : vector<1x1x128xf32> to vector<1x128xf32>
    %9 = vector.broadcast %8 : vector<1x128xf32> to vector<32x128xf32>
    %10 = arith.mulf %9, %6 : vector<32x128xf32>
    %11 = arith.addf %4, %10 : vector<32x128xf32>
    %cst = arith.constant 1.000000e+00 : f32
    %12 = vector.broadcast %cst : f32 to vector<1x128xf32>
    %13 = arith.subf %12, %8 : vector<1x128xf32>
    %14 = vector.broadcast %13 : vector<1x128xf32> to vector<32x128xf32>
    %15 = arith.mulf %14, %5 : vector<32x128xf32>
    %16 = arith.addf %11, %15 : vector<32x128xf32>
    %c126_i32 = arith.constant 126 : i32
    %17 = tpu.dynamic_rotate %16 by %c126_i32 dim 1 : vector<32x128xf32>, i32 -> vector<32x128xf32>
    %c2_i32 = arith.constant 2 : i32
    %18 = tpu.dynamic_rotate %16 by %c2_i32 dim 1 : vector<32x128xf32>, i32 -> vector<32x128xf32>
    %c1 = arith.constant 1 : index
    %c0_5 = arith.constant 0 : index
    %c0_6 = arith.constant 0 : index
    %19 = vector.load %arg5[%c1, %c0_5, %c0_6] : memref<3x1x128xf32, #tpu.memory_space<vmem>>, vector<1x1x128xf32>
    %20 = vector.shape_cast %19 : vector<1x1x128xf32> to vector<1x128xf32>
    %21 = vector.broadcast %20 : vector<1x128xf32> to vector<32x128xf32>
    %22 = arith.mulf %21, %18 : vector<32x128xf32>
    %23 = arith.addf %16, %22 : vector<32x128xf32>
    %cst_7 = arith.constant 1.000000e+00 : f32
    %24 = vector.broadcast %cst_7 : f32 to vector<1x128xf32>
    %25 = arith.subf %24, %20 : vector<1x128xf32>
    %26 = vector.broadcast %25 : vector<1x128xf32> to vector<32x128xf32>
    %27 = arith.mulf %26, %17 : vector<32x128xf32>
    %28 = arith.addf %23, %27 : vector<32x128xf32>
    %c124_i32 = arith.constant 124 : i32
    %29 = tpu.dynamic_rotate %28 by %c124_i32 dim 1 : vector<32x128xf32>, i32 -> vector<32x128xf32>
    %c4_i32 = arith.constant 4 : i32
    %30 = tpu.dynamic_rotate %28 by %c4_i32 dim 1 : vector<32x128xf32>, i32 -> vector<32x128xf32>
    %c2 = arith.constant 2 : index
    %c0_8 = arith.constant 0 : index
    %c0_9 = arith.constant 0 : index
    %31 = vector.load %arg5[%c2, %c0_8, %c0_9] : memref<3x1x128xf32, #tpu.memory_space<vmem>>, vector<1x1x128xf32>
    %32 = vector.shape_cast %31 : vector<1x1x128xf32> to vector<1x128xf32>
    %33 = vector.broadcast %32 : vector<1x128xf32> to vector<32x128xf32>
    %34 = arith.mulf %33, %30 : vector<32x128xf32>
    %35 = arith.addf %28, %34 : vector<32x128xf32>
    %cst_10 = arith.constant 1.000000e+00 : f32
    %36 = vector.broadcast %cst_10 : f32 to vector<1x128xf32>
    %37 = arith.subf %36, %32 : vector<1x128xf32>
    %38 = vector.broadcast %37 : vector<1x128xf32> to vector<32x128xf32>
    %39 = arith.mulf %38, %29 : vector<32x128xf32>
    %40 = arith.addf %35, %39 : vector<32x128xf32>
    %41 = math.sqrt %40 : vector<32x128xf32>
    %cst_11 = arith.constant 0.353553385 : f32
    %42 = vector.broadcast %cst_11 : f32 to vector<32x128xf32>
    %43 = arith.mulf %41, %42 : vector<32x128xf32>
    %c0_12 = arith.constant 0 : index
    %c0_13 = arith.constant 0 : index
    %c0_14 = arith.constant 0 : index
    %44 = vector.load %arg6[%c0_12, %c0_13, %c0_14] : memref<1x32x1xf32, #tpu.memory_space<vmem>>, vector<1x32x1xf32>
    %45 = vector.shape_cast %44 : vector<1x32x1xf32> to vector<32x1xf32>
    %46 = vector.broadcast %45 : vector<32x1xf32> to vector<32x128xf32>
    %47 = arith.mulf %46, %3 : vector<32x128xf32>
    %cst_15 = arith.constant 9.99999993E-9 : f32
    %48 = vector.broadcast %cst_15 : f32 to vector<32x128xf32>
    %49 = arith.addf %43, %48 : vector<32x128xf32>
    %50 = tpu.reciprocal %49 {approx = true} : vector<32x128xf32> -> vector<32x128xf32>
    %51 = arith.mulf %47, %50 : vector<32x128xf32>
    %c9_i32 = arith.constant 9 : i32
    %52 = tpu.dynamic_rotate %51 by %c9_i32 dim 1 : vector<32x128xf32>, i32 -> vector<32x128xf32>
    %c0_16 = arith.constant 0 : index
    %c0_17 = arith.constant 0 : index
    %c0_18 = arith.constant 0 : index
    %53 = vector.load %arg4[%c0_16, %c0_17, %c0_18] : memref<9x1x128xf32, #tpu.memory_space<vmem>>, vector<1x1x128xf32>
    %54 = vector.shape_cast %53 : vector<1x1x128xf32> to vector<1x128xf32>
    %55 = vector.broadcast %54 : vector<1x128xf32> to vector<32x128xf32>
    %56 = arith.mulf %52, %55 : vector<32x128xf32>
    %c8_i32 = arith.constant 8 : i32
    %57 = tpu.dynamic_rotate %51 by %c8_i32 dim 1 : vector<32x128xf32>, i32 -> vector<32x128xf32>
    %c1_19 = arith.constant 1 : index
    %c0_20 = arith.constant 0 : index
    %c0_21 = arith.constant 0 : index
    %58 = vector.load %arg4[%c1_19, %c0_20, %c0_21] : memref<9x1x128xf32, #tpu.memory_space<vmem>>, vector<1x1x128xf32>
    %59 = vector.shape_cast %58 : vector<1x1x128xf32> to vector<1x128xf32>
    %60 = vector.broadcast %59 : vector<1x128xf32> to vector<32x128xf32>
    %61 = arith.mulf %57, %60 : vector<32x128xf32>
    %c7_i32 = arith.constant 7 : i32
    %62 = tpu.dynamic_rotate %51 by %c7_i32 dim 1 : vector<32x128xf32>, i32 -> vector<32x128xf32>
    %c2_22 = arith.constant 2 : index
    %c0_23 = arith.constant 0 : index
    %c0_24 = arith.constant 0 : index
    %63 = vector.load %arg4[%c2_22, %c0_23, %c0_24] : memref<9x1x128xf32, #tpu.memory_space<vmem>>, vector<1x1x128xf32>
    %64 = vector.shape_cast %63 : vector<1x1x128xf32> to vector<1x128xf32>
    %65 = vector.broadcast %64 : vector<1x128xf32> to vector<32x128xf32>
    %66 = arith.mulf %62, %65 : vector<32x128xf32>
    %c1_i32_25 = arith.constant 1 : i32
    %67 = tpu.dynamic_rotate %51 by %c1_i32_25 dim 1 : vector<32x128xf32>, i32 -> vector<32x128xf32>
    %c3 = arith.constant 3 : index
    %c0_26 = arith.constant 0 : index
    %c0_27 = arith.constant 0 : index
    %68 = vector.load %arg4[%c3, %c0_26, %c0_27] : memref<9x1x128xf32, #tpu.memory_space<vmem>>, vector<1x1x128xf32>
    %69 = vector.shape_cast %68 : vector<1x1x128xf32> to vector<1x128xf32>
    %70 = vector.broadcast %69 : vector<1x128xf32> to vector<32x128xf32>
    %71 = arith.mulf %67, %70 : vector<32x128xf32>
    %c127_i32_28 = arith.constant 127 : i32
    %72 = tpu.dynamic_rotate %51 by %c127_i32_28 dim 1 : vector<32x128xf32>, i32 -> vector<32x128xf32>
    %c5 = arith.constant 5 : index
    %c0_29 = arith.constant 0 : index
    %c0_30 = arith.constant 0 : index
    %73 = vector.load %arg4[%c5, %c0_29, %c0_30] : memref<9x1x128xf32, #tpu.memory_space<vmem>>, vector<1x1x128xf32>
    %74 = vector.shape_cast %73 : vector<1x1x128xf32> to vector<1x128xf32>
    %75 = vector.broadcast %74 : vector<1x128xf32> to vector<32x128xf32>
    %76 = arith.mulf %72, %75 : vector<32x128xf32>
    %c121_i32 = arith.constant 121 : i32
    %77 = tpu.dynamic_rotate %51 by %c121_i32 dim 1 : vector<32x128xf32>, i32 -> vector<32x128xf32>
    %c6 = arith.constant 6 : index
    %c0_31 = arith.constant 0 : index
    %c0_32 = arith.constant 0 : index
    %78 = vector.load %arg4[%c6, %c0_31, %c0_32] : memref<9x1x128xf32, #tpu.memory_space<vmem>>, vector<1x1x128xf32>
    %79 = vector.shape_cast %78 : vector<1x1x128xf32> to vector<1x128xf32>
    %80 = vector.broadcast %79 : vector<1x128xf32> to vector<32x128xf32>
    %81 = arith.mulf %77, %80 : vector<32x128xf32>
    %c120_i32 = arith.constant 120 : i32
    %82 = tpu.dynamic_rotate %51 by %c120_i32 dim 1 : vector<32x128xf32>, i32 -> vector<32x128xf32>
    %c7 = arith.constant 7 : index
    %c0_33 = arith.constant 0 : index
    %c0_34 = arith.constant 0 : index
    %83 = vector.load %arg4[%c7, %c0_33, %c0_34] : memref<9x1x128xf32, #tpu.memory_space<vmem>>, vector<1x1x128xf32>
    %84 = vector.shape_cast %83 : vector<1x1x128xf32> to vector<1x128xf32>
    %85 = vector.broadcast %84 : vector<1x128xf32> to vector<32x128xf32>
    %86 = arith.mulf %82, %85 : vector<32x128xf32>
    %c119_i32 = arith.constant 119 : i32
    %87 = tpu.dynamic_rotate %51 by %c119_i32 dim 1 : vector<32x128xf32>, i32 -> vector<32x128xf32>
    %c8 = arith.constant 8 : index
    %c0_35 = arith.constant 0 : index
    %c0_36 = arith.constant 0 : index
    %88 = vector.load %arg4[%c8, %c0_35, %c0_36] : memref<9x1x128xf32, #tpu.memory_space<vmem>>, vector<1x1x128xf32>
    %89 = vector.shape_cast %88 : vector<1x1x128xf32> to vector<1x128xf32>
    %90 = vector.broadcast %89 : vector<1x128xf32> to vector<32x128xf32>
    %91 = arith.mulf %87, %90 : vector<32x128xf32>
    %92 = tpu.concatenate %56, %61, %66, %71, %51, %76, %81, %86, %91 in 0 : vector<32x128xf32>, vector<32x128xf32>, vector<32x128xf32>, vector<32x128xf32>, vector<32x128xf32>, vector<32x128xf32>, vector<32x128xf32>, vector<32x128xf32>, vector<32x128xf32> -> vector<288x128xf32>
    %c0_37 = arith.constant 0 : index
    %c0_38 = arith.constant 0 : index
    %c0_39 = arith.constant 0 : index
    %93 = vector.load %arg7[%c0_37, %c0_38, %c0_39] : memref<1x32x288xf32, #tpu.memory_space<vmem>>, vector<1x32x288xf32>
    %94 = vector.shape_cast %93 : vector<1x32x288xf32> to vector<32x288xf32>
    %cst_40 = arith.constant dense<0.000000e+00> : vector<32x128xf32>
    %95 = tpu.matmul %94, %92, %cst_40 {dimension_numbers = #tpu.dot_dimension_numbers<[1], [0], [0], [1], [0, 0, 1, 1], [], []>} : vector<32x288xf32>, vector<288x128xf32>, vector<32x128xf32> -> vector<32x128xf32>
    %c0_41 = arith.constant 0 : index
    %c0_42 = arith.constant 0 : index
    %c0_43 = arith.constant 0 : index
    %96 = vector.load %arg8[%c0_41, %c0_42, %c0_43] : memref<1x32x1xf32, #tpu.memory_space<vmem>>, vector<1x32x1xf32>
    %97 = vector.shape_cast %96 : vector<1x32x1xf32> to vector<32x1xf32>
    %98 = vector.broadcast %97 : vector<32x1xf32> to vector<32x128xf32>
    %99 = arith.addf %95, %98 : vector<32x128xf32>
    %100 = vector.extract_strided_slice %99 {offsets = [0, 0], sizes = [16, 128], strides = [1, 1]} : vector<32x128xf32> to vector<16x128xf32>
    %101 = vector.extract_strided_slice %99 {offsets = [16, 0], sizes = [16, 128], strides = [1, 1]} : vector<32x128xf32> to vector<16x128xf32>
    %102 = math.sin %101 : vector<16x128xf32>
    %103 = arith.mulf %100, %102 : vector<16x128xf32>
    %c0_44 = arith.constant 0 : index
    %c0_45 = arith.constant 0 : index
    %c0_46 = arith.constant 0 : index
    %104 = vector.load %arg9[%c0_44, %c0_45, %c0_46] : memref<1x32x16xf32, #tpu.memory_space<vmem>>, vector<1x32x16xf32>
    %105 = vector.shape_cast %104 : vector<1x32x16xf32> to vector<32x16xf32>
    %cst_47 = arith.constant dense<0.000000e+00> : vector<32x128xf32>
    %106 = tpu.matmul %105, %103, %cst_47 {dimension_numbers = #tpu.dot_dimension_numbers<[1], [0], [0], [1], [0, 0, 1, 1], [], []>} : vector<32x16xf32>, vector<16x128xf32>, vector<32x128xf32> -> vector<32x128xf32>
    %c0_48 = arith.constant 0 : index
    %c0_49 = arith.constant 0 : index
    %c0_50 = arith.constant 0 : index
    %107 = vector.load %arg10[%c0_48, %c0_49, %c0_50] : memref<1x32x1xf32, #tpu.memory_space<vmem>>, vector<1x32x1xf32>
    %108 = vector.shape_cast %107 : vector<1x32x1xf32> to vector<32x1xf32>
    %109 = vector.broadcast %108 : vector<32x1xf32> to vector<32x128xf32>
    %110 = arith.addf %106, %109 : vector<32x128xf32>
    %111 = arith.addf %110, %3 : vector<32x128xf32>
    %c0_51 = arith.constant 0 : index
    %c0_52 = arith.constant 0 : index
    %112 = vector.load %arg11[%c0_51, %c0_52] : memref<32x128xf32, #tpu.memory_space<vmem>>, vector<32x128xf32>
    tpu.vector_store %arg11[%c0_51, %c0_52], %111 {strides = array<i32>} : memref<32x128xf32, #tpu.memory_space<vmem>>, vector<32x128xf32>,
    return
  }
  func.func @transform_0(%arg0: i32) -> (i32, i32) {
    %c0_i32 = arith.constant 0 : i32
    %c0_i32_0 = arith.constant 0 : i32
    %c0_i32_1 = arith.constant 0 : i32
    return %c0_i32, %c0_i32_0 : i32, i32
  }
  func.func @transform_1(%arg0: i32) -> (i32, i32) {
    %c0_i32 = arith.constant 0 : i32
    %c0_i32_0 = arith.constant 0 : i32
    %c0_i32_1 = arith.constant 0 : i32
    return %c0_i32, %c0_i32_0 : i32, i32
  }
  func.func @transform_2(%arg0: i32) -> (i32, i32) {
    %c0_i32 = arith.constant 0 : i32
    %c0_i32_0 = arith.constant 0 : i32
    %c0_i32_1 = arith.constant 0 : i32
    return %c0_i32, %c0_i32_0 : i32, i32
  }
  func.func @transform_3(%arg0: i32) -> (i32, i32, i32) {
    %c0_i32 = arith.constant 0 : i32
    %c0_i32_0 = arith.constant 0 : i32
    %c0_i32_1 = arith.constant 0 : i32
    %c0_i32_2 = arith.constant 0 : i32
    return %c0_i32, %c0_i32_0, %c0_i32_1 : i32, i32, i32
  }
  func.func @transform_4(%arg0: i32) -> (i32, i32, i32) {
    %c0_i32 = arith.constant 0 : i32
    %c0_i32_0 = arith.constant 0 : i32
    %c0_i32_1 = arith.constant 0 : i32
    %c0_i32_2 = arith.constant 0 : i32
    return %c0_i32, %c0_i32_0, %c0_i32_1 : i32, i32, i32
  }
  func.func @transform_5(%arg0: i32) -> (i32, i32, i32) {
    %c0_i32 = arith.constant 0 : i32
    %c0_i32_0 = arith.constant 0 : i32
    %c0_i32_1 = arith.constant 0 : i32
    return %arg0, %c0_i32, %c0_i32_0 : i32, i32, i32
  }
  func.func @transform_6(%arg0: i32) -> (i32, i32, i32) {
    %c0_i32 = arith.constant 0 : i32
    %c0_i32_0 = arith.constant 0 : i32
    %c0_i32_1 = arith.constant 0 : i32
    return %arg0, %c0_i32, %c0_i32_0 : i32, i32, i32
  }
  func.func @transform_7(%arg0: i32) -> (i32, i32, i32) {
    %c0_i32 = arith.constant 0 : i32
    %c0_i32_0 = arith.constant 0 : i32
    %c0_i32_1 = arith.constant 0 : i32
    return %arg0, %c0_i32, %c0_i32_0 : i32, i32, i32
  }
  func.func @transform_8(%arg0: i32) -> (i32, i32, i32) {
    %c0_i32 = arith.constant 0 : i32
    %c0_i32_0 = arith.constant 0 : i32
    %c0_i32_1 = arith.constant 0 : i32
    return %arg0, %c0_i32, %c0_i32_0 : i32, i32, i32
  }
  func.func @transform_9(%arg0: i32) -> (i32, i32, i32) {
    %c0_i32 = arith.constant 0 : i32
    %c0_i32_0 = arith.constant 0 : i32
    %c0_i32_1 = arith.constant 0 : i32
    return %arg0, %c0_i32, %c0_i32_0 : i32, i32, i32
  }
  func.func @transform_10(%arg0: i32) -> (i32, i32) {
    %c0_i32 = arith.constant 0 : i32
    %c0_i32_0 = arith.constant 0 : i32
    %c0_i32_1 = arith.constant 0 : i32
    return %c0_i32, %c0_i32_0 : i32, i32
  }
}

module attributes {stable_mosaic.version = 11 : i64} {
  func.func @_head_kernel(%arg0: memref<8x512xf32, #tpu.memory_space<vmem>>, %arg1: memref<8x8xf32, #tpu.memory_space<vmem>>, %arg2: memref<8x1xf32, #tpu.memory_space<vmem>>, %arg3: memref<9x1x512xf32, #tpu.memory_space<vmem>>, %arg4: memref<4x1x512xf32, #tpu.memory_space<vmem>>, %arg5: memref<8x1xf32, #tpu.memory_space<vmem>>, %arg6: memref<1x72xf32, #tpu.memory_space<vmem>>, %arg7: memref<1x1xf32, #tpu.memory_space<vmem>>, %arg8: memref<1x512xf32, #tpu.memory_space<vmem>>) attributes {dimension_semantics = [], scalar_prefetch = 0 : i64, scratch_operands = 0 : i64, tpu.core_type = #tpu.core_type<tc>} {
    %c0 = arith.constant 0 : index
    %c0_0 = arith.constant 0 : index
    %0 = vector.load %arg1[%c0, %c0_0] : memref<8x8xf32, #tpu.memory_space<vmem>>, vector<8x8xf32>
    %c0_1 = arith.constant 0 : index
    %c0_2 = arith.constant 0 : index
    %1 = vector.load %arg0[%c0_1, %c0_2] : memref<8x512xf32, #tpu.memory_space<vmem>>, vector<8x512xf32>
    %cst = arith.constant dense<0.000000e+00> : vector<8x512xf32>
    %2 = tpu.matmul %0, %1, %cst {dimension_numbers = #tpu.dot_dimension_numbers<[1], [0], [0], [1], [0, 0, 1, 1], [], []>} : vector<8x8xf32>, vector<8x512xf32>, vector<8x512xf32> -> vector<8x512xf32>
    %c0_3 = arith.constant 0 : index
    %c0_4 = arith.constant 0 : index
    %3 = vector.load %arg2[%c0_3, %c0_4] : memref<8x1xf32, #tpu.memory_space<vmem>>, vector<8x1xf32>
    %4 = vector.broadcast %3 : vector<8x1xf32> to vector<8x512xf32>
    %5 = arith.addf %2, %4 : vector<8x512xf32>
    %6 = arith.mulf %5, %5 : vector<8x512xf32>
    %c511_i32 = arith.constant 511 : i32
    %7 = tpu.dynamic_rotate %6 by %c511_i32 dim 1 : vector<8x512xf32>, i32 -> vector<8x512xf32>
    %c1_i32 = arith.constant 1 : i32
    %8 = tpu.dynamic_rotate %6 by %c1_i32 dim 1 : vector<8x512xf32>, i32 -> vector<8x512xf32>
    %c0_5 = arith.constant 0 : index
    %c0_6 = arith.constant 0 : index
    %c0_7 = arith.constant 0 : index
    %9 = vector.load %arg4[%c0_5, %c0_6, %c0_7] : memref<4x1x512xf32, #tpu.memory_space<vmem>>, vector<1x1x512xf32>
    %10 = vector.shape_cast %9 : vector<1x1x512xf32> to vector<1x512xf32>
    %11 = vector.broadcast %10 : vector<1x512xf32> to vector<8x512xf32>
    %12 = arith.mulf %11, %8 : vector<8x512xf32>
    %13 = arith.addf %6, %12 : vector<8x512xf32>
    %cst_8 = arith.constant 1.000000e+00 : f32
    %14 = vector.broadcast %cst_8 : f32 to vector<1x512xf32>
    %15 = arith.subf %14, %10 : vector<1x512xf32>
    %16 = vector.broadcast %15 : vector<1x512xf32> to vector<8x512xf32>
    %17 = arith.mulf %16, %7 : vector<8x512xf32>
    %18 = arith.addf %13, %17 : vector<8x512xf32>
    %c510_i32 = arith.constant 510 : i32
    %19 = tpu.dynamic_rotate %18 by %c510_i32 dim 1 : vector<8x512xf32>, i32 -> vector<8x512xf32>
    %c2_i32 = arith.constant 2 : i32
    %20 = tpu.dynamic_rotate %18 by %c2_i32 dim 1 : vector<8x512xf32>, i32 -> vector<8x512xf32>
    %c1 = arith.constant 1 : index
    %c0_9 = arith.constant 0 : index
    %c0_10 = arith.constant 0 : index
    %21 = vector.load %arg4[%c1, %c0_9, %c0_10] : memref<4x1x512xf32, #tpu.memory_space<vmem>>, vector<1x1x512xf32>
    %22 = vector.shape_cast %21 : vector<1x1x512xf32> to vector<1x512xf32>
    %23 = vector.broadcast %22 : vector<1x512xf32> to vector<8x512xf32>
    %24 = arith.mulf %23, %20 : vector<8x512xf32>
    %25 = arith.addf %18, %24 : vector<8x512xf32>
    %cst_11 = arith.constant 1.000000e+00 : f32
    %26 = vector.broadcast %cst_11 : f32 to vector<1x512xf32>
    %27 = arith.subf %26, %22 : vector<1x512xf32>
    %28 = vector.broadcast %27 : vector<1x512xf32> to vector<8x512xf32>
    %29 = arith.mulf %28, %19 : vector<8x512xf32>
    %30 = arith.addf %25, %29 : vector<8x512xf32>
    %c508_i32 = arith.constant 508 : i32
    %31 = tpu.dynamic_rotate %30 by %c508_i32 dim 1 : vector<8x512xf32>, i32 -> vector<8x512xf32>
    %c4_i32 = arith.constant 4 : i32
    %32 = tpu.dynamic_rotate %30 by %c4_i32 dim 1 : vector<8x512xf32>, i32 -> vector<8x512xf32>
    %c2 = arith.constant 2 : index
    %c0_12 = arith.constant 0 : index
    %c0_13 = arith.constant 0 : index
    %33 = vector.load %arg4[%c2, %c0_12, %c0_13] : memref<4x1x512xf32, #tpu.memory_space<vmem>>, vector<1x1x512xf32>
    %34 = vector.shape_cast %33 : vector<1x1x512xf32> to vector<1x512xf32>
    %35 = vector.broadcast %34 : vector<1x512xf32> to vector<8x512xf32>
    %36 = arith.mulf %35, %32 : vector<8x512xf32>
    %37 = arith.addf %30, %36 : vector<8x512xf32>
    %cst_14 = arith.constant 1.000000e+00 : f32
    %38 = vector.broadcast %cst_14 : f32 to vector<1x512xf32>
    %39 = arith.subf %38, %34 : vector<1x512xf32>
    %40 = vector.broadcast %39 : vector<1x512xf32> to vector<8x512xf32>
    %41 = arith.mulf %40, %31 : vector<8x512xf32>
    %42 = arith.addf %37, %41 : vector<8x512xf32>
    %c504_i32 = arith.constant 504 : i32
    %43 = tpu.dynamic_rotate %42 by %c504_i32 dim 1 : vector<8x512xf32>, i32 -> vector<8x512xf32>
    %c8_i32 = arith.constant 8 : i32
    %44 = tpu.dynamic_rotate %42 by %c8_i32 dim 1 : vector<8x512xf32>, i32 -> vector<8x512xf32>
    %c3 = arith.constant 3 : index
    %c0_15 = arith.constant 0 : index
    %c0_16 = arith.constant 0 : index
    %45 = vector.load %arg4[%c3, %c0_15, %c0_16] : memref<4x1x512xf32, #tpu.memory_space<vmem>>, vector<1x1x512xf32>
    %46 = vector.shape_cast %45 : vector<1x1x512xf32> to vector<1x512xf32>
    %47 = vector.broadcast %46 : vector<1x512xf32> to vector<8x512xf32>
    %48 = arith.mulf %47, %44 : vector<8x512xf32>
    %49 = arith.addf %42, %48 : vector<8x512xf32>
    %cst_17 = arith.constant 1.000000e+00 : f32
    %50 = vector.broadcast %cst_17 : f32 to vector<1x512xf32>
    %51 = arith.subf %50, %46 : vector<1x512xf32>
    %52 = vector.broadcast %51 : vector<1x512xf32> to vector<8x512xf32>
    %53 = arith.mulf %52, %43 : vector<8x512xf32>
    %54 = arith.addf %49, %53 : vector<8x512xf32>
    %55 = math.sqrt %54 : vector<8x512xf32>
    %cst_18 = arith.constant 2.500000e-01 : f32
    %56 = vector.broadcast %cst_18 : f32 to vector<8x512xf32>
    %57 = arith.mulf %55, %56 : vector<8x512xf32>
    %c0_19 = arith.constant 0 : index
    %c0_20 = arith.constant 0 : index
    %58 = vector.load %arg5[%c0_19, %c0_20] : memref<8x1xf32, #tpu.memory_space<vmem>>, vector<8x1xf32>
    %59 = vector.broadcast %58 : vector<8x1xf32> to vector<8x512xf32>
    %60 = arith.mulf %59, %5 : vector<8x512xf32>
    %cst_21 = arith.constant 9.99999993E-9 : f32
    %61 = vector.broadcast %cst_21 : f32 to vector<8x512xf32>
    %62 = arith.addf %57, %61 : vector<8x512xf32>
    %63 = tpu.reciprocal %62 {approx = true} : vector<8x512xf32> -> vector<8x512xf32>
    %64 = arith.mulf %60, %63 : vector<8x512xf32>
    %c17_i32 = arith.constant 17 : i32
    %65 = tpu.dynamic_rotate %64 by %c17_i32 dim 1 : vector<8x512xf32>, i32 -> vector<8x512xf32>
    %c0_22 = arith.constant 0 : index
    %c0_23 = arith.constant 0 : index
    %c0_24 = arith.constant 0 : index
    %66 = vector.load %arg3[%c0_22, %c0_23, %c0_24] : memref<9x1x512xf32, #tpu.memory_space<vmem>>, vector<1x1x512xf32>
    %67 = vector.shape_cast %66 : vector<1x1x512xf32> to vector<1x512xf32>
    %68 = vector.broadcast %67 : vector<1x512xf32> to vector<8x512xf32>
    %69 = arith.mulf %65, %68 : vector<8x512xf32>
    %c16_i32 = arith.constant 16 : i32
    %70 = tpu.dynamic_rotate %64 by %c16_i32 dim 1 : vector<8x512xf32>, i32 -> vector<8x512xf32>
    %c1_25 = arith.constant 1 : index
    %c0_26 = arith.constant 0 : index
    %c0_27 = arith.constant 0 : index
    %71 = vector.load %arg3[%c1_25, %c0_26, %c0_27] : memref<9x1x512xf32, #tpu.memory_space<vmem>>, vector<1x1x512xf32>
    %72 = vector.shape_cast %71 : vector<1x1x512xf32> to vector<1x512xf32>
    %73 = vector.broadcast %72 : vector<1x512xf32> to vector<8x512xf32>
    %74 = arith.mulf %70, %73 : vector<8x512xf32>
    %c15_i32 = arith.constant 15 : i32
    %75 = tpu.dynamic_rotate %64 by %c15_i32 dim 1 : vector<8x512xf32>, i32 -> vector<8x512xf32>
    %c2_28 = arith.constant 2 : index
    %c0_29 = arith.constant 0 : index
    %c0_30 = arith.constant 0 : index
    %76 = vector.load %arg3[%c2_28, %c0_29, %c0_30] : memref<9x1x512xf32, #tpu.memory_space<vmem>>, vector<1x1x512xf32>
    %77 = vector.shape_cast %76 : vector<1x1x512xf32> to vector<1x512xf32>
    %78 = vector.broadcast %77 : vector<1x512xf32> to vector<8x512xf32>
    %79 = arith.mulf %75, %78 : vector<8x512xf32>
    %c1_i32_31 = arith.constant 1 : i32
    %80 = tpu.dynamic_rotate %64 by %c1_i32_31 dim 1 : vector<8x512xf32>, i32 -> vector<8x512xf32>
    %c3_32 = arith.constant 3 : index
    %c0_33 = arith.constant 0 : index
    %c0_34 = arith.constant 0 : index
    %81 = vector.load %arg3[%c3_32, %c0_33, %c0_34] : memref<9x1x512xf32, #tpu.memory_space<vmem>>, vector<1x1x512xf32>
    %82 = vector.shape_cast %81 : vector<1x1x512xf32> to vector<1x512xf32>
    %83 = vector.broadcast %82 : vector<1x512xf32> to vector<8x512xf32>
    %84 = arith.mulf %80, %83 : vector<8x512xf32>
    %c511_i32_35 = arith.constant 511 : i32
    %85 = tpu.dynamic_rotate %64 by %c511_i32_35 dim 1 : vector<8x512xf32>, i32 -> vector<8x512xf32>
    %c5 = arith.constant 5 : index
    %c0_36 = arith.constant 0 : index
    %c0_37 = arith.constant 0 : index
    %86 = vector.load %arg3[%c5, %c0_36, %c0_37] : memref<9x1x512xf32, #tpu.memory_space<vmem>>, vector<1x1x512xf32>
    %87 = vector.shape_cast %86 : vector<1x1x512xf32> to vector<1x512xf32>
    %88 = vector.broadcast %87 : vector<1x512xf32> to vector<8x512xf32>
    %89 = arith.mulf %85, %88 : vector<8x512xf32>
    %c497_i32 = arith.constant 497 : i32
    %90 = tpu.dynamic_rotate %64 by %c497_i32 dim 1 : vector<8x512xf32>, i32 -> vector<8x512xf32>
    %c6 = arith.constant 6 : index
    %c0_38 = arith.constant 0 : index
    %c0_39 = arith.constant 0 : index
    %91 = vector.load %arg3[%c6, %c0_38, %c0_39] : memref<9x1x512xf32, #tpu.memory_space<vmem>>, vector<1x1x512xf32>
    %92 = vector.shape_cast %91 : vector<1x1x512xf32> to vector<1x512xf32>
    %93 = vector.broadcast %92 : vector<1x512xf32> to vector<8x512xf32>
    %94 = arith.mulf %90, %93 : vector<8x512xf32>
    %c496_i32 = arith.constant 496 : i32
    %95 = tpu.dynamic_rotate %64 by %c496_i32 dim 1 : vector<8x512xf32>, i32 -> vector<8x512xf32>
    %c7 = arith.constant 7 : index
    %c0_40 = arith.constant 0 : index
    %c0_41 = arith.constant 0 : index
    %96 = vector.load %arg3[%c7, %c0_40, %c0_41] : memref<9x1x512xf32, #tpu.memory_space<vmem>>, vector<1x1x512xf32>
    %97 = vector.shape_cast %96 : vector<1x1x512xf32> to vector<1x512xf32>
    %98 = vector.broadcast %97 : vector<1x512xf32> to vector<8x512xf32>
    %99 = arith.mulf %95, %98 : vector<8x512xf32>
    %c495_i32 = arith.constant 495 : i32
    %100 = tpu.dynamic_rotate %64 by %c495_i32 dim 1 : vector<8x512xf32>, i32 -> vector<8x512xf32>
    %c8 = arith.constant 8 : index
    %c0_42 = arith.constant 0 : index
    %c0_43 = arith.constant 0 : index
    %101 = vector.load %arg3[%c8, %c0_42, %c0_43] : memref<9x1x512xf32, #tpu.memory_space<vmem>>, vector<1x1x512xf32>
    %102 = vector.shape_cast %101 : vector<1x1x512xf32> to vector<1x512xf32>
    %103 = vector.broadcast %102 : vector<1x512xf32> to vector<8x512xf32>
    %104 = arith.mulf %100, %103 : vector<8x512xf32>
    %105 = tpu.concatenate %69, %74, %79, %84, %64, %89, %94, %99, %104 in 0 : vector<8x512xf32>, vector<8x512xf32>, vector<8x512xf32>, vector<8x512xf32>, vector<8x512xf32>, vector<8x512xf32>, vector<8x512xf32>, vector<8x512xf32>, vector<8x512xf32> -> vector<72x512xf32>
    %c0_44 = arith.constant 0 : index
    %c0_45 = arith.constant 0 : index
    %106 = vector.load %arg6[%c0_44, %c0_45] : memref<1x72xf32, #tpu.memory_space<vmem>>, vector<1x72xf32>
    %cst_46 = arith.constant dense<0.000000e+00> : vector<1x512xf32>
    %107 = tpu.matmul %106, %105, %cst_46 {dimension_numbers = #tpu.dot_dimension_numbers<[1], [0], [0], [1], [0, 0, 1, 1], [], []>} : vector<1x72xf32>, vector<72x512xf32>, vector<1x512xf32> -> vector<1x512xf32>
    %c0_47 = arith.constant 0 : index
    %c0_48 = arith.constant 0 : index
    %108 = vector.load %arg7[%c0_47, %c0_48] : memref<1x1xf32, #tpu.memory_space<vmem>>, vector<1x1xf32>
    %109 = vector.broadcast %108 : vector<1x1xf32> to vector<1x512xf32>
    %110 = arith.addf %107, %109 : vector<1x512xf32>
    %c0_49 = arith.constant 0 : index
    %c0_50 = arith.constant 0 : index
    %111 = vector.load %arg8[%c0_49, %c0_50] : memref<1x512xf32, #tpu.memory_space<vmem>>, vector<1x512xf32>
    tpu.vector_store %arg8[%c0_49, %c0_50], %110 {strides = array<i32>} : memref<1x512xf32, #tpu.memory_space<vmem>>, vector<1x512xf32>,
    return
  }
}

</mosaic_0001>

<bundles_post_ra>
// kernel: critic_forward.3
= control target key start
LH: loop header
LB: loop body
LE: loop exit
PB: predicated region body
PF: predicated region fallthrough
CT: control target
= control target key end

     0   :  { %vm42_vm0 = vcmask 64512   ;;  %v843_v3 = vmov 0   ;;  %v138_v21 = vlaneseq  ;;  %s846_s18 = smov 2   ;;  %s847_s19 = smov 126   ;;  %s1273_s0 = inlined_call_operand.vmem [shape: f32[8,512], index: 0, kind: input, shape index: {}]   ;;  %s1274_s1 = inlined_call_operand.vmem [shape: f32[8,8], index: 1, kind: input, shape index: {}]   ;;  %s1275_s2 = inlined_call_operand.vmem [shape: f32[8,1], index: 2, kind: input, shape index: {}]   ;;  %s1276_s4 = inlined_call_operand.vmem [shape: f32[4,1,512], index: 4, kind: input, shape index: {}]   ;;  %s1277_s5 = inlined_call_operand.vmem [shape: f32[8,1], index: 5, kind: input, shape index: {}]   ;;  %s1278_s7 = inlined_call_operand.<no memory space> [shape: f32[1,1], index: 7, kind: input, shape index: {}]   ;;  %s1279_s3 = inlined_call_operand.vmem [shape: f32[9,1,512], index: 3, kind: input, shape index: {}]   ;;  %s1280_s6 = inlined_call_operand.vmem [shape: f32[1,72], index: 6, kind: input, shape index: {}]   ;;  %s1281_s8 = inlined_call_operand.vmem [shape: f32[1,512], index: 8, kind: output, shape index: {}]  }
   0x1   :  { %v32_v0 = vld [vmem:[%s1273_s0] sm:$0xff]  ;;  %v33_v1 = vld [vmem:[%s1273_s0 + $0x8] sm:$0xff]  ;;  %v34_v2 = vld [vmem:[%s1273_s0 + $0x10] sm:$0xff]  ;;  %826 = vset.pattern.permute.xlu0 %v843_v3  ;;  %s848_s22 = smov 4   ;;  %s849_s23 = smov 124  }
   0x2   :  { %61 = vmatpush.msra.mxu0 %v32_v0  ;;  %81 = vmatpush.msra.mxu1 %v33_v1  ;;  %v35_v4 = vld [vmem:[%s1273_s0 + $0x18] sm:$0xff]  ;;  %v31_v5 = vld [vmem:[%s1274_s1] sm:$0xff]  ;;  %s844_s0 = smov 1   ;;  %s845_s1 = smov 127   ;;  %v946_v22 = vand.u32 127, %v138_v21 }
   0x3   :  { %101 = vmatpush.msra.mxu2 %v34_v2  ;;  %121 = vmatpush.msra.mxu3 %v35_v4  ;;  %v36_v6 = vld [vmem:[%s1275_s2] sm:$0xff]  ;;  %s850_s26 = smov 8   ;;  %s851_s27 = smov 120  }
   0x4   :  { %793 = vmatmul.msk.f32.vlgmr.msra.gmra.mxu0 %vm42_vm0, %v31_v5  ;;  %794 = vmatmul.msk.f32.vlgmr.msra.gmra.mxu1 %vm42_vm0, %v31_v5  ;;  %vm153_vm1 = vcmp.lt.s32.totalorder %v946_v22, 1  ;;  %v158_v25 = vld [vmem:[%s1276_s4] sm:$0xf]  ;;  %vm140_vm2 = vcmp.lt.s32.totalorder %v946_v22, 127  ;;  %v797_v2 = vld [vmem:[%s1276_s4 + $0x4] sm:$0xf] }
   0x5   :  { %795 = vmatmul.msk.f32.vlgmr.msra.gmra.mxu2 %vm42_vm0, %v31_v5  ;;  %796 = vmatmul.msk.f32.vlgmr.msra.gmra.mxu3 %vm42_vm0, %v31_v5  ;;  %v160_v27 = vperm.slane %v158_v25, 0  ;;  %v176_v29 = vsub.f32 1.0, %v158_v25  ;;  %v163_v33 = vperm.slane %v158_v25, 3  ;;  %v161_v35 = vperm.slane %v158_v25, 1  ;;  %s854_s10 = smov 113   ;;  %s855_s13 = smov 15  }
   0x6   :  { %39 = vperm.xlu0 %826, %v36_v6   ;;  %v162_v36 = vperm.slane %v158_v25, 2  ;;  %vm215_vm3 = vcmp.lt.s32.totalorder %v946_v22, 2  ;;  %v223_v5 = vperm.slane %v797_v2, 0  ;;  %v239_v6 = vsub.f32 1.0, %v797_v2  ;;  %s856_s14 = smov 16  }
   0x7   :  { %v178_v31 = vperm.slane %v176_v29, 0  ;;  %v179_v48 = vperm.slane %v176_v29, 1  ;;  %v180_v49 = vperm.slane %v176_v29, 2  ;;  %v181_v50 = vperm.slane %v176_v29, 3 }
   0x8   :  { %vm202_vm4 = vcmp.lt.s32.totalorder %v946_v22, 126  ;;  %vm278_vm5 = vcmp.lt.s32.totalorder %v946_v22, 4  ;;  %vm265_vm6 = vcmp.lt.s32.totalorder %v946_v22, 124  ;;  %vm328_vm7 = vcmp.lt.s32.totalorder %v946_v22, 120 }
   0x9   :  { %vm341_vm8 = vcmp.lt.s32.totalorder %v946_v22, 8 }
  0x78   :  { %v40_v7 = vpop.permute.xlu0 %39 }
  0x81   :  { %v63_v8 = vpop.f32.mrf.mxu0  ;;  %v83_v9 = vpop.f32.mrf.mxu1 }
  0x82   :  { %v921_v10 = vadd.f32 %v63_v8, %v40_v7  ;;  %v923_v11 = vadd.f32 %v83_v9, %v40_v7  ;;  %v224_v8 = vperm.slane %v797_v2, 1 }
  0x84   :  { %v126_v12 = vmul.f32 %v921_v10, %v921_v10  ;;  %v127_v13 = vmul.f32 %v923_v11, %v923_v11 }
  0x86   :  { %147 = vrot.lane.b32.xlu1 %v127_v13, %s844_s0  ;;  %130 = vrot.lane.b32.xlu2 %v126_v12, %s845_s1 }
  0x87   :  { %145 = vrot.lane.b32.xlu0 %v126_v12, %s844_s0 }
  0x88   :  { %v103_v14 = vpop.f32.mrf.mxu2  ;;  %v123_v15 = vpop.f32.mrf.mxu3 }
  0x89   :  { %v932_v16 = vadd.f32 %v103_v14, %v40_v7  ;;  %v934_v17 = vadd.f32 %v123_v15, %v40_v7  ;;  %v242_v15 = vperm.slane %v239_v6, 1 }
  0x8b   :  { %v128_v18 = vmul.f32 %v932_v16, %v932_v16  ;;  %v129_v19 = vmul.f32 %v934_v17, %v934_v17 }
  0x8e   :  { %149 = vrot.lane.b32.xlu1 %v128_v18, %s844_s0  ;;  %151 = vrot.lane.b32.xlu2 %v129_v19, %s844_s0 }
  0x8f   :  { %132 = vrot.lane.b32.xlu0 %v127_v13, %s845_s1 }
  0x96   :  { %134 = vrot.lane.b32.xlu1 %v128_v18, %s845_s1  ;;  %136 = vrot.lane.b32.xlu2 %v129_v19, %s845_s1 }
  0xe0   :  { %v131_v20 = vpop.permute.xlu2 %130 }
  0xe8   :  { %v152_v26 = vpop.permute.xlu2 %151 }
  0xf0   :  { %v137_v43 = vpop.permute.xlu2 %136 }
  0xf1   :  { %v144_v51 = vsel %vm140_vm2, %v137_v43, %v131_v20 }
  0xf2   :  { %v189_v60 = vmul.f32 %v181_v50, %v144_v51  ;;  %v798_v50 = vld [vmem:[%s1276_s4 + $0x8] sm:$0xf] }
  0xf8   :  { %v148_v23 = vpop.permute.xlu1 %147 }
  0xf9   :  { %v146_v24 = vpop.permute.xlu0 %145 }
  0xfa   :  { %v157_v28 = vsel %vm153_vm1, %v152_v26, %v146_v24  ;;  %v156_v39 = vsel %vm153_vm1, %v146_v24, %v148_v23 }
  0xfb   :  { %v168_v30 = vmul.f32 %v160_v27, %v157_v28  ;;  %v169_v46 = vmul.f32 %v161_v35, %v156_v39 }
  0xfd   :  { %v172_v40 = vadd.f32 %v168_v30, %v126_v12  ;;  %v173_v56 = vadd.f32 %v169_v46, %v127_v13  ;;  %v241_v13 = vperm.slane %v239_v6, 0 }
 0x100   :  { %v150_v32 = vpop.permute.xlu1 %149 }
 0x101   :  { %v133_v34 = vpop.permute.xlu0 %132  ;;  %v154_v37 = vsel %vm153_vm1, %v150_v32, %v152_v26  ;;  %v155_v41 = vsel %vm153_vm1, %v148_v23, %v150_v32  ;;  %v225_v26 = vperm.slane %v797_v2, 2 }
 0x102   :  { %v143_v38 = vsel %vm140_vm2, %v131_v20, %v133_v34  ;;  %v171_v44 = vmul.f32 %v163_v33, %v154_v37  ;;  %v170_v47 = vmul.f32 %v162_v36, %v155_v41  ;;  %v226_v20 = vperm.slane %v797_v2, 3 }
 0x103   :  { %v186_v42 = vmul.f32 %v178_v31, %v143_v38  ;;  %v243_v37 = vperm.slane %v239_v6, 2  ;;  %v244_v38 = vperm.slane %v239_v6, 3  ;;  %v289_v6 = vperm.slane %v798_v50, 3 }
 0x104   :  { %v175_v53 = vadd.f32 %v171_v44, %v129_v19  ;;  %v174_v57 = vadd.f32 %v170_v47, %v128_v18 }
 0x105   :  { %v190_v45 = vadd.f32 %v186_v42, %v172_v40 }
 0x106   :  { %v193_v63 = vadd.f32 %v189_v60, %v175_v53  ;;  %v286_v53 = vperm.slane %v798_v50, 0 }
 0x107   :  { %207 = vrot.lane.b32.xlu0 %v190_v45, %s846_s18 }
 0x108   :  { %v135_v52 = vpop.permute.xlu1 %134 }
 0x109   :  { %v141_v54 = vsel %vm140_vm2, %v135_v52, %v137_v43  ;;  %v142_v55 = vsel %vm140_vm2, %v133_v34, %v135_v52 }
 0x10a   :  { %v187_v58 = vmul.f32 %v179_v48, %v142_v55  ;;  %v188_v59 = vmul.f32 %v180_v49, %v141_v54 }
 0x10c   :  { %v192_v61 = vadd.f32 %v188_v59, %v174_v57  ;;  %v191_v62 = vadd.f32 %v187_v58, %v173_v56  ;;  %v287_v56 = vperm.slane %v798_v50, 1  ;;  %v302_v57 = vsub.f32 1.0, %v798_v50 }
 0x10d   :  { %v288_v59 = vperm.slane %v798_v50, 2 }
 0x10e   :  { %211 = vrot.lane.b32.xlu2 %v192_v61, %s846_s18  ;;  %209 = vrot.lane.b32.xlu1 %v191_v62, %s846_s18  ;;  %v306_v2 = vperm.slane %v302_v57, 2 }
 0x10f   :  { %213 = vrot.lane.b32.xlu0 %v193_v63, %s846_s18 }
 0x116   :  { %196 = vrot.lane.b32.xlu2 %v191_v62, %s847_s19  ;;  %194 = vrot.lane.b32.xlu1 %v190_v45, %s847_s19 }
 0x117   :  { %198 = vrot.lane.b32.xlu0 %v192_v61, %s847_s19 }
 0x11e   :  { %200 = vrot.lane.b32.xlu1 %v193_v63, %s847_s19 }
 0x168   :  { %v212_v1 = vpop.permute.xlu2 %211 }
 0x170   :  { %v197_v18 = vpop.permute.xlu2 %196 }
 0x179   :  { %v208_v0 = vpop.permute.xlu0 %207 }
 0x180   :  { %v210_v3 = vpop.permute.xlu1 %209 }
 0x181   :  { %v214_v4 = vpop.permute.xlu0 %213  ;;  %v218_v9 = vsel %vm215_vm3, %v208_v0, %v210_v3  ;;  %v217_v30 = vsel %vm215_vm3, %v210_v3, %v212_v1 }
 0x182   :  { %v219_v7 = vsel %vm215_vm3, %v214_v4, %v208_v0  ;;  %v232_v14 = vmul.f32 %v224_v8, %v218_v9  ;;  %v216_v29 = vsel %vm215_vm3, %v212_v1, %v214_v4  ;;  %v233_v36 = vmul.f32 %v225_v26, %v217_v30 }
 0x183   :  { %v231_v12 = vmul.f32 %v223_v5, %v219_v7  ;;  %v234_v35 = vmul.f32 %v226_v20, %v216_v29  ;;  %v305_v0 = vperm.slane %v302_v57, 1  ;;  %vm658_vm3 = vcmp.lt.s32.totalorder %v946_v22, 111 }
 0x184   :  { %v236_v31 = vadd.f32 %v232_v14, %v191_v62  ;;  %v237_v43 = vadd.f32 %v233_v36, %v192_v61 }
 0x185   :  { %v235_v25 = vadd.f32 %v231_v12, %v190_v45  ;;  %v238_v42 = vadd.f32 %v234_v35, %v193_v63  ;;  %v304_v63 = vperm.slane %v302_v57, 0  ;;  %v799_v35 = vld [vmem:[%s1276_s4 + $0xc] sm:$0xf]  ;;  %s852_s4 = smov 111  }
 0x188   :  { %v195_v19 = vpop.permute.xlu1 %194 }
 0x189   :  { %v199_v23 = vpop.permute.xlu0 %198  ;;  %v205_v24 = vsel %vm202_vm4, %v195_v19, %v197_v18 }
 0x18a   :  { %v204_v27 = vsel %vm202_vm4, %v197_v18, %v199_v23  ;;  %v249_v28 = vmul.f32 %v241_v13, %v205_v24 }
 0x18b   :  { %v250_v32 = vmul.f32 %v242_v15, %v204_v27 }
 0x18c   :  { %v253_v33 = vadd.f32 %v249_v28, %v235_v25 }
 0x18d   :  { %v254_v34 = vadd.f32 %v250_v32, %v236_v31  ;;  %v435_v32 = vld [vmem:[%s1277_s5] sm:$0xff]  ;;  %s853_s5 = smov 112  }
 0x18e   :  { %270 = vrot.lane.b32.xlu2 %v253_v33, %s848_s22 }
 0x18f   :  { %272 = vrot.lane.b32.xlu0 %v254_v34, %s848_s22 }
 0x190   :  { %v201_v39 = vpop.permute.xlu1 %200 }
 0x191   :  { %v203_v40 = vsel %vm202_vm4, %v199_v23, %v201_v39  ;;  %v206_v41 = vsel %vm202_vm4, %v201_v39, %v195_v19  ;;  %v307_v23 = vperm.slane %v302_v57, 3  ;;  %vm630_vm4 = vcmp.lt.s32.totalorder %v946_v22, 112 }
 0x192   :  { %v251_v44 = vmul.f32 %v243_v37, %v203_v40  ;;  %v252_v45 = vmul.f32 %v244_v38, %v206_v41  ;;  %v365_v38 = vsub.f32 1.0, %v799_v35  ;;  %v349_v40 = vperm.slane %v799_v35, 0 }
 0x193   :  { %v352_v41 = vperm.slane %v799_v35, 3 }
 0x194   :  { %v256_v46 = vadd.f32 %v252_v45, %v238_v42  ;;  %v255_v47 = vadd.f32 %v251_v44, %v237_v43  ;;  %v370_v42 = vperm.slane %v365_v38, 3  ;;  %v367_v45 = vperm.slane %v365_v38, 0 }
 0x196   :  { %276 = vrot.lane.b32.xlu2 %v256_v46, %s848_s22  ;;  %274 = vrot.lane.b32.xlu1 %v255_v47, %s848_s22 }
 0x197   :  { %257 = vrot.lane.b32.xlu0 %v253_v33, %s849_s23 }
 0x19e   :  { %261 = vrot.lane.b32.xlu2 %v255_v47, %s849_s23  ;;  %259 = vrot.lane.b32.xlu1 %v254_v34, %s849_s23 }
 0x19f   :  { %263 = vrot.lane.b32.xlu0 %v256_v46, %s849_s23 }
 0x1e8   :  { %v271_v48 = vpop.permute.xlu2 %270 }
 0x1f0   :  { %v277_v51 = vpop.permute.xlu2 %276 }
 0x1f1   :  { %v282_v55 = vsel %vm278_vm5, %v277_v51, %v271_v48 }
 0x1f2   :  { %v294_v61 = vmul.f32 %v286_v53, %v282_v55  ;;  %v350_v55 = vperm.slane %v799_v35, 1 }
 0x1f4   :  { %v298_v5 = vadd.f32 %v294_v61, %v253_v33 }
 0x1f8   :  { %v262_v3 = vpop.permute.xlu2 %261 }
 0x201   :  { %v273_v49 = vpop.permute.xlu0 %272 }
 0x202   :  { %v281_v58 = vsel %vm278_vm5, %v271_v48, %v273_v49 }
 0x203   :  { %v295_v62 = vmul.f32 %v287_v56, %v281_v58 }
 0x205   :  { %v299_v12 = vadd.f32 %v295_v62, %v254_v34 }
 0x208   :  { %v275_v52 = vpop.permute.xlu1 %274 }
 0x209   :  { %v258_v54 = vpop.permute.xlu0 %257  ;;  %v280_v60 = vsel %vm278_vm5, %v273_v49, %v275_v52  ;;  %v279_v18 = vsel %vm278_vm5, %v275_v52, %v277_v51  ;;  %v351_v49 = vperm.slane %v799_v35, 2  ;;  %vm602_vm5 = vcmp.lt.s32.totalorder %v946_v22, 113 }
 0x20a   :  { %v296_v1 = vmul.f32 %v288_v59, %v280_v60  ;;  %v297_v28 = vmul.f32 %v289_v6, %v279_v18  ;;  %v368_v60 = vperm.slane %v365_v38, 1 }
 0x20c   :  { %v300_v19 = vadd.f32 %v296_v1, %v255_v47  ;;  %v301_v30 = vadd.f32 %v297_v28, %v256_v46 }
 0x210   :  { %v260_v4 = vpop.permute.xlu1 %259 }
 0x211   :  { %v264_v7 = vpop.permute.xlu0 %263  ;;  %v267_v8 = vsel %vm265_vm6, %v260_v4, %v262_v3  ;;  %v268_v9 = vsel %vm265_vm6, %v258_v54, %v260_v4 }
 0x212   :  { %v266_v13 = vsel %vm265_vm6, %v262_v3, %v264_v7  ;;  %v312_v14 = vmul.f32 %v304_v63, %v268_v9  ;;  %v313_v15 = vmul.f32 %v305_v0, %v267_v8  ;;  %v269_v26 = vsel %vm265_vm6, %v264_v7, %v258_v54 }
 0x213   :  { %v314_v20 = vmul.f32 %v306_v2, %v266_v13  ;;  %v315_v29 = vmul.f32 %v307_v23, %v269_v26  ;;  %v369_v0 = vperm.slane %v365_v38, 2  ;;  %vm520_vm6 = vcmp.lt.s32.totalorder %v946_v22, 15 }
 0x214   :  { %v316_v24 = vadd.f32 %v312_v14, %v298_v5  ;;  %v1009_v25 = vadd.f32 %v313_v15, %v299_v12 }
 0x215   :  { %v318_v27 = vadd.f32 %v314_v20, %v300_v19  ;;  %v319_v31 = vadd.f32 %v315_v29, %v301_v30 }
 0x216   :  { %333 = vrot.lane.b32.xlu1 %v316_v24, %s850_s26  ;;  %335 = vrot.lane.b32.xlu2 %v1009_v25, %s850_s26 }
 0x217   :  { %337 = vrot.lane.b32.xlu0 %v318_v27, %s850_s26 }
 0x21e   :  { %339 = vrot.lane.b32.xlu1 %v319_v31, %s850_s26  ;;  %320 = vrot.lane.b32.xlu2 %v316_v24, %s851_s27 }
 0x21f   :  { %322 = vrot.lane.b32.xlu0 %v1009_v25, %s851_s27 }
 0x226   :  { %324 = vrot.lane.b32.xlu1 %v318_v27, %s851_s27  ;;  %326 = vrot.lane.b32.xlu2 %v319_v31, %s851_s27 }
 0x227   :  { %438 = vperm.xlu0 %826, %v435_v32  }
 0x270   :  { %v336_v33 = vpop.permute.xlu2 %335 }
 0x278   :  { %v321_v34 = vpop.permute.xlu2 %320 }
 0x280   :  { %v327_v39 = vpop.permute.xlu2 %326 }
 0x281   :  { %v332_v43 = vsel %vm328_vm7, %v327_v39, %v321_v34 }
 0x282   :  { %v378_v53 = vmul.f32 %v370_v42, %v332_v43 }
 0x288   :  { %v334_v36 = vpop.permute.xlu1 %333 }
 0x289   :  { %v338_v37 = vpop.permute.xlu0 %337  ;;  %v344_v56 = vsel %vm341_vm8, %v334_v36, %v336_v33 }
 0x28a   :  { %v343_v54 = vsel %vm341_vm8, %v336_v33, %v338_v37  ;;  %v358_v1 = vmul.f32 %v350_v55, %v344_v56 }
 0x28b   :  { %v359_v61 = vmul.f32 %v351_v49, %v343_v54 }
 0x28c   :  { %v362_v8 = vadd.f32 %v358_v1, %v1009_v25 }
 0x28d   :  { %v363_v5 = vadd.f32 %v359_v61, %v318_v27 }
 0x290   :  { %v340_v44 = vpop.permute.xlu1 %339 }
 0x291   :  { %v342_v46 = vsel %vm341_vm8, %v338_v37, %v340_v44  ;;  %v345_v47 = vsel %vm341_vm8, %v340_v44, %v334_v36  ;;  %v323_v48 = vpop.permute.xlu0 %322  ;;  %vm779_vm8 = vcmask 1042434  }
 0x292   :  { %v357_v50 = vmul.f32 %v349_v40, %v345_v47  ;;  %v360_v51 = vmul.f32 %v352_v41, %v342_v46  ;;  %v331_v52 = vsel %vm328_vm7, %v321_v34, %v323_v48 }
 0x293   :  { %v375_v59 = vmul.f32 %v367_v45, %v331_v52 }
 0x294   :  { %v361_v57 = vadd.f32 %v357_v50, %v316_v24  ;;  %v364_v58 = vadd.f32 %v360_v51, %v319_v31 }
 0x296   :  { %v382_v62 = vadd.f32 %v378_v53, %v364_v58  ;;  %v379_v63 = vadd.f32 %v375_v59, %v361_v57 }
 0x298   :  { %827 = vrsqrt.f32 %v382_v62  ;;  %v325_v2 = vpop.permute.xlu1 %324  ;;  %vm390_vm9 = vcmp.eq.f32.partialorder %v379_v63, inf  ;;  %vm392_vm10 = vcmp.eq.f32.partialorder %v379_v63, 0.0  ;;  %v393_v37 = vand.u32 2147483648, %v379_v63 }
 0x299   :  { %829 = vrsqrt.f32 %v379_v63  ;;  %v329_v3 = vsel %vm328_vm7, %v325_v2, %v327_v39  ;;  %v330_v4 = vsel %vm328_vm7, %v323_v48, %v325_v2  ;;  %vm426_vm11 = vcmp.eq.f32.partialorder %v382_v62, inf  ;;  %v439_v55 = vpop.permute.xlu0 %438 }
 0x29a   :  { %v376_v6 = vmul.f32 %v368_v60, %v330_v4  ;;  %v377_v7 = vmul.f32 %v369_v0, %v329_v3  ;;  %v429_v38 = vand.u32 2147483648, %v382_v62  ;;  %vm428_vm12 = vcmp.eq.f32.partialorder %v382_v62, 0.0 }
 0x29b   :  { %v441_v59 = vmul.f32 %v439_v55, %v921_v10  ;;  %v444_v61 = vmul.f32 %v439_v55, %v934_v17  ;;  %v443_v2 = vmul.f32 %v439_v55, %v932_v16  ;;  %vm492_vm7 = vcmp.lt.s32.totalorder %v946_v22, 16 }
 0x29c   :  { %v381_v9 = vadd.f32 %v377_v7, %v363_v5  ;;  %v1032_v12 = vadd.f32 %v376_v6, %v362_v8 }
 0x29e   :  { %v828_v13 = vpop.eup %827  ;;  %831 = vrsqrt.f32 %v381_v9  ;;  %vm414_vm13 = vcmp.eq.f32.partialorder %v381_v9, inf  ;;  %v417_v51 = vand.u32 2147483648, %v381_v9  ;;  %vm416_vm14 = vcmp.eq.f32.partialorder %v381_v9, 0.0 }
 0x29f   :  { %v830_v14 = vpop.eup %829  ;;  %v420_v18 = vmul.f32 %v828_v13, %v382_v62  ;;  %833 = vrsqrt.f32 %v1032_v12  ;;  %vm402_vm15 = vcmp.eq.f32.partialorder %v1032_v12, inf  ;;  %v405_v5 = vand.u32 2147483648, %v1032_v12 }
 0x2a0   :  { %v384_v15 = vmul.f32 %v830_v14, %v379_v63  ;;  %vm404_vm0 = vcmp.eq.f32.partialorder %v1032_v12, 0.0 }
 0x2a1   :  { %v421_v20 = vmul.f32 %v828_v13, %v420_v18  ;;  %v1105_v18 = vld [vmem:[%s1279_s3 + $0x20] sm:$0xf] }
 0x2a2   :  { %v385_v19 = vmul.f32 %v830_v14, %v384_v15 }
 0x2a3   :  { %v422_v24 = vmul.f32 0.5, %v421_v20  ;;  %v668_v20 = vperm.slane %v1105_v18, 2 }
 0x2a4   :  { %v386_v23 = vmul.f32 0.5, %v385_v19  ;;  %v832_v26 = vpop.eup %831 }
 0x2a5   :  { %v408_v27 = vmul.f32 %v832_v26, %v381_v9  ;;  %v423_v29 = vsub.f32 1.5, %v422_v24  ;;  %v834_v30 = vpop.eup %833 }
 0x2a6   :  { %v387_v28 = vsub.f32 1.5, %v386_v23  ;;  %v396_v33 = vmul.f32 %v834_v30, %v1032_v12  ;;  %v669_v23 = vperm.slane %v1105_v18, 3 }
 0x2a7   :  { %v409_v31 = vmul.f32 %v832_v26, %v408_v27  ;;  %v424_v32 = vmul.f32 %v828_v13, %v423_v29 }
 0x2a8   :  { %v388_v25 = vmul.f32 %v830_v14, %v387_v28  ;;  %v397_v44 = vmul.f32 %v834_v30, %v396_v33 }
 0x2a9   :  { %v410_v35 = vmul.f32 0.5, %v409_v31  ;;  %v425_v36 = vmul.f32 %v424_v32, %v382_v62 }
 0x2aa   :  { %v389_v34 = vmul.f32 %v388_v25, %v379_v63  ;;  %v398_v52 = vmul.f32 0.5, %v397_v44  ;;  %v805_v25 = vld [vmem:[%s1279_s3 + $0x1c] sm:$0xf] }
 0x2ab   :  { %v411_v40 = vsub.f32 1.5, %v410_v35  ;;  %v427_v41 = vsel %vm426_vm11, %v382_v62, %v425_v36  ;;  %v640_v32 = vperm.slane %v805_v25, 2  ;;  %v641_v33 = vperm.slane %v805_v25, 3 }
 0x2ac   :  { %v391_v39 = vsel %vm390_vm9, %v379_v63, %v389_v34  ;;  %v430_v43 = vsel %vm428_vm12, %v429_v38, %v427_v41  ;;  %v399_v57 = vsub.f32 1.5, %v398_v52  ;;  %vm777_vm9 = vcmask 1040384  }
 0x2ad   :  { %v394_v42 = vsel %vm392_vm10, %v393_v37, %v391_v39  ;;  %v412_v45 = vmul.f32 %v832_v26, %v411_v40  ;;  %v434_v47 = vmul.f32 0.25, %v430_v43  ;;  %v1130_v40 = vld [vmem:[%s1279_s3 + $0x18] sm:$0xf]  ;;  %vm781_vm10 = vcmask 1041408  }
 0x2ae   :  { %v431_v46 = vmul.f32 0.25, %v394_v42  ;;  %v400_v0 = vmul.f32 %v834_v30, %v399_v57  ;;  %v612_v42 = vperm.slane %v1130_v40, 2  ;;  %v613_v43 = vperm.slane %v1130_v40, 3 }
 0x2af   :  { %v413_v48 = vmul.f32 %v412_v45, %v381_v9  ;;  %v448_v50 = vadd.f32 1e-08, %v434_v47  ;;  %vm786_vm11 = vcmp.lt.s32.totalorder %v138_v21, 512 }
 0x2b0   :  { %v445_v49 = vadd.f32 1e-08, %v431_v46  ;;  %v401_v3 = vmul.f32 %v400_v0, %v1032_v12 }
 0x2b1   :  { %v415_v53 = vsel %vm414_vm13, %v381_v9, %v413_v48  ;;  %v442_v9 = vmul.f32 %v439_v55, %v923_v11  ;;  %v13_v11 = vstv %s1278_s7  ;;  %s857_s7 = smov 17  }
 0x2b2   :  { %835 = vrcp.f32 %v445_v49  ;;  %v418_v54 = vsel %vm416_vm14, %v417_v51, %v415_v53  ;;  %v403_v4 = vsel %vm402_vm15, %v1032_v12, %v401_v3  ;;  %14 = vst [vmem:[#allocation2] sm:$0x1] %v13_v11 }
 0x2b3   :  { %837 = vrcp.f32 %v448_v50  ;;  %v433_v56 = vmul.f32 0.25, %v418_v54  ;;  %v406_v16 = vsel %vm404_vm0, %v405_v5, %v403_v4  ;;  %v1143_v50 = vld [vmem:[%s1279_s3 + $0x14] sm:$0xf] }
 0x2b4   :  { %v432_v6 = vmul.f32 0.25, %v406_v16  ;;  %v584_v52 = vperm.slane %v1143_v50, 2  ;;  %v585_v53 = vperm.slane %v1143_v50, 3 }
 0x2b5   :  { %v447_v58 = vadd.f32 1e-08, %v433_v56 }
 0x2b6   :  { %v446_v7 = vadd.f32 1e-08, %v432_v6 }
 0x2b7   :  { %839 = vrcp.f32 %v447_v58 }
 0x2b8   :  { %v836_v60 = vpop.eup %835  ;;  %841 = vrcp.f32 %v446_v7 }
 0x2b9   :  { %v838_v62 = vpop.eup %837  ;;  %v1038_v63 = vmul.f32 %v836_v60, %v441_v59  ;;  %v679_v13 = vld [vmem:[#allocation2] sm:$0x1] }
 0x2ba   :  { %v1040_v1 = vmul.f32 %v838_v62, %v444_v61  ;;  %v666_v61 = vperm.slane %v1105_v18, 0  ;;  %v667_v62 = vperm.slane %v1105_v18, 1  ;;  %v611_v18 = vperm.slane %v1130_v40, 1 }
 0x2bb   :  { %650 = vrot.lane.b32.xlu1 %v1038_v63, %s852_s4 }
 0x2bc   :  { %656 = vrot.lane.b32.xlu0 %v1040_v1, %s852_s4 }
 0x2bd   :  { %v840_v10 = vpop.eup %839 }
 0x2be   :  { %v1048_v17 = vmul.f32 %v840_v10, %v443_v2  ;;  %v842_v8 = vpop.eup %841  ;;  %v638_v2 = vperm.slane %v805_v25, 0  ;;  %v639_v10 = vperm.slane %v805_v25, 1 }
 0x2bf   :  { %v1067_v12 = vmul.f32 %v842_v8, %v442_v9 }
 0x2c0   :  { %654 = vrot.lane.b32.xlu2 %v1048_v17, %s852_s4 }
 0x2c3   :  { %622 = vrot.lane.b32.xlu1 %v1038_v63, %s853_s5 }
 0x2c4   :  { %628 = vrot.lane.b32.xlu0 %v1040_v1, %s853_s5 }
 0x2c8   :  { %626 = vrot.lane.b32.xlu2 %v1048_v17, %s853_s5 }
 0x2cb   :  { %594 = vrot.lane.b32.xlu1 %v1038_v63, %s854_s10 }
 0x2cc   :  { %600 = vrot.lane.b32.xlu0 %v1040_v1, %s854_s10 }
 0x2d0   :  { %598 = vrot.lane.b32.xlu2 %v1048_v17, %s854_s10 }
 0x2d3   :  { %567 = vrot.lane.b32.xlu1 %v1038_v63, %s845_s1 }
 0x2d4   :  { %573 = vrot.lane.b32.xlu0 %v1040_v1, %s845_s1 }
 0x2d8   :  { %571 = vrot.lane.b32.xlu2 %v1048_v17, %s845_s1 }
 0x2db   :  { %652 = vrot.lane.b32.xlu1 %v1067_v12, %s852_s4 }
 0x2dc   :  { %542 = vrot.lane.b32.xlu0 %v1067_v12, %s844_s0 }
 0x2e0   :  { %624 = vrot.lane.b32.xlu2 %v1067_v12, %s853_s5 }
 0x2e3   :  { %544 = vrot.lane.b32.xlu1 %v1048_v17, %s844_s0 }
 0x2e4   :  { %596 = vrot.lane.b32.xlu0 %v1067_v12, %s854_s10 }
 0x2e8   :  { %546 = vrot.lane.b32.xlu2 %v1040_v1, %s844_s0 }
 0x2eb   :  { %514 = vrot.lane.b32.xlu1 %v1067_v12, %s855_s13 }
 0x2ec   :  { %518 = vrot.lane.b32.xlu0 %v1040_v1, %s855_s13 }
 0x2f0   :  { %516 = vrot.lane.b32.xlu2 %v1048_v17, %s855_s13 }
 0x2f3   :  { %569 = vrot.lane.b32.xlu1 %v1067_v12, %s845_s1 }
 0x2f4   :  { %488 = vrot.lane.b32.xlu0 %v1048_v17, %s856_s14 }
 0x2f8   :  { %486 = vrot.lane.b32.xlu2 %v1067_v12, %s856_s14 }
 0x2fb   :  { %490 = vrot.lane.b32.xlu1 %v1040_v1, %s856_s14 }
 0x2fc   :  { %461 = vrot.lane.b32.xlu0 %v1048_v17, %s857_s7 }
 0x300   :  { %459 = vrot.lane.b32.xlu2 %v1067_v12, %s857_s7 }
 0x303   :  { %463 = vrot.lane.b32.xlu1 %v1040_v1, %s857_s7 }
 0x304   :  { %512 = vrot.lane.b32.xlu0 %v1038_v63, %s855_s13 }
 0x308   :  { %540 = vrot.lane.b32.xlu2 %v1038_v63, %s844_s0 }
 0x30b   :  { %484 = vrot.lane.b32.xlu1 %v1038_v63, %s856_s14 }
 0x30c   :  { %682 = vperm.xlu0 %826, %v679_v13  }
 0x310   :  { %457 = vrot.lane.b32.xlu2 %v1038_v63, %s857_s7 }
 0x31a   :  { %v1100_v14 = vpop.permute.xlu2 %654 }
 0x322   :  { %v627_v15 = vpop.permute.xlu2 %626 }
 0x32a   :  { %v1107_v19 = vpop.permute.xlu2 %598 }
 0x32d   :  { %v651_v24 = vpop.permute.xlu1 %650 }
 0x32e   :  { %v657_v26 = vpop.permute.xlu0 %656 }
 0x32f   :  { %v659_v27 = vsel %vm658_vm3, %v1100_v14, %v657_v26  ;;  %v662_v28 = vsel %vm658_vm3, %v657_v26, %v651_v24 }
 0x330   :  { %v676_v29 = vmul.f32 %v668_v20, %v659_v27  ;;  %v677_v30 = vmul.f32 %v669_v23, %v662_v28 }
 0x332   :  { %737 = vmatpush.msrb.mxu2 %v676_v29  ;;  %757 = vmatpush.msrb.mxu3 %v677_v30  ;;  %v1120_v31 = vpop.permute.xlu2 %571 }
 0x335   :  { %v623_v34 = vpop.permute.xlu1 %622 }
 0x336   :  { %v629_v35 = vpop.permute.xlu0 %628 }
 0x337   :  { %v631_v36 = vsel %vm630_vm4, %v627_v15, %v629_v35  ;;  %v634_v37 = vsel %vm630_vm4, %v629_v35, %v623_v34 }
 0x338   :  { %v648_v38 = vmul.f32 %v640_v32, %v631_v36  ;;  %v649_v39 = vmul.f32 %v641_v33, %v634_v37  ;;  %v1194_v33 = vld [vmem:[%s1279_s3 + $0x8] sm:$0xf] }
 0x339   :  { %v531_v35 = vperm.slane %v1194_v33, 3 }
 0x33a   :  { %738 = vmatpush.msrb.mxu2 %v648_v38  ;;  %758 = vmatpush.msrb.mxu3 %v649_v39  ;;  %v625_v41 = vpop.permute.xlu2 %624 }
 0x33b   :  { %v632_v3 = vsel %vm630_vm4, %v625_v41, %v627_v15  ;;  %v633_v4 = vsel %vm630_vm4, %v623_v34, %v625_v41  ;;  %v610_v15 = vperm.slane %v1130_v40, 0 }
 0x33c   :  { %v646_v8 = vmul.f32 %v638_v2, %v633_v4  ;;  %v647_v9 = vmul.f32 %v639_v10, %v632_v3  ;;  %v678_v4 = vld [vmem:[%s1280_s6] sm:$0x1] }
 0x33d   :  { %v595_v44 = vpop.permute.xlu1 %594 }
 0x33e   :  { %v601_v45 = vpop.permute.xlu0 %600 }
 0x33f   :  { %v603_v46 = vsel %vm602_vm5, %v1107_v19, %v601_v45  ;;  %v606_v47 = vsel %vm602_vm5, %v601_v45, %v595_v44 }
 0x340   :  { %v620_v48 = vmul.f32 %v612_v42, %v603_v46  ;;  %v621_v49 = vmul.f32 %v613_v43, %v606_v47  ;;  %v1208_v42 = vld [vmem:[%s1279_s3 + $0x4] sm:$0xf]  ;;  %v582_v43 = vperm.slane %v1143_v50, 0 }
 0x341   :  { %v502_v45 = vperm.slane %v1208_v42, 2 }
 0x342   :  { %739 = vmatpush.msrb.mxu2 %v620_v48  ;;  %759 = vmatpush.msrb.mxu3 %v621_v49  ;;  %v1145_v51 = vpop.permute.xlu2 %546 }
 0x345   :  { %v1149_v54 = vpop.permute.xlu1 %567 }
 0x346   :  { %v574_v55 = vpop.permute.xlu0 %573 }
 0x347   :  { %v575_v56 = vsel %vm140_vm2, %v1120_v31, %v574_v55  ;;  %v578_v57 = vsel %vm140_vm2, %v574_v55, %v1149_v54 }
 0x348   :  { %v592_v58 = vmul.f32 %v584_v52, %v575_v56  ;;  %v593_v59 = vmul.f32 %v585_v53, %v578_v57 }
 0x34a   :  { %740 = vmatpush.msrb.mxu2 %v592_v58  ;;  %760 = vmatpush.msrb.mxu3 %v593_v59  ;;  %v517_v60 = vpop.permute.xlu2 %516 }
 0x34c   :  { %741 = vmatpush.msrb.mxu2 %v1048_v17  ;;  %761 = vmatpush.msrb.mxu3 %v1040_v1  ;;  %v1173_v1 = vld [vmem:[%s1279_s3 + $0xc] sm:$0xf] }
 0x34d   :  { %v653_v0 = vpop.permute.xlu1 %652  ;;  %v557_v13 = vperm.slane %v1173_v1, 2  ;;  %v555_v53 = vperm.slane %v1173_v1, 0  ;;  %v556_v57 = vperm.slane %v1173_v1, 1 }
 0x34e   :  { %v660_v5 = vsel %vm658_vm3, %v653_v0, %v1100_v14  ;;  %v661_v16 = vsel %vm658_vm3, %v651_v24, %v653_v0  ;;  %v543_v6 = vpop.permute.xlu0 %542  ;;  %v558_v14 = vperm.slane %v1173_v1, 3 }
 0x34f   :  { %v674_v17 = vmul.f32 %v666_v61, %v661_v16  ;;  %v675_v7 = vmul.f32 %v667_v62, %v660_v5  ;;  %v470_v61 = vld [vmem:[%s1279_s3] sm:$0xf]  ;;  %v503_v62 = vperm.slane %v1208_v42, 3  ;;  %v528_v16 = vperm.slane %v1194_v33, 0 }
 0x350   :  { %v474_v0 = vperm.slane %v470_v61, 2  ;;  %v475_v5 = vperm.slane %v470_v61, 3 }
 0x351   :  { %697 = vmatpush.msrb.mxu0 %v674_v17  ;;  %717 = vmatpush.msrb.mxu1 %v675_v7 }
 0x352   :  { %v1175_v11 = vpop.permute.xlu2 %486 }
 0x353   :  { %698 = vmatpush.msrb.mxu0 %v646_v8  ;;  %718 = vmatpush.msrb.mxu1 %v647_v9 }
 0x355   :  { %v545_v20 = vpop.permute.xlu1 %544 }
 0x356   :  { %v597_v23 = vpop.permute.xlu0 %596  ;;  %v548_v24 = vsel %vm153_vm1, %v545_v20, %v1145_v51  ;;  %v549_v26 = vsel %vm153_vm1, %v543_v6, %v545_v20  ;;  %v500_v20 = vperm.slane %v1208_v42, 0 }
 0x357   :  { %v604_v27 = vsel %vm602_vm5, %v597_v23, %v1107_v19  ;;  %v605_v28 = vsel %vm602_vm5, %v595_v44, %v597_v23  ;;  %v565_v29 = vmul.f32 %v557_v13, %v549_v26  ;;  %v566_v30 = vmul.f32 %v558_v14, %v548_v24 }
 0x358   :  { %v618_v25 = vmul.f32 %v610_v15, %v605_v28  ;;  %v619_v32 = vmul.f32 %v611_v18, %v604_v27  ;;  %v530_v19 = vperm.slane %v1194_v33, 2  ;;  %v583_v44 = vperm.slane %v1143_v50, 1 }
 0x359   :  { %742 = vmatpush.msrb.mxu2 %v565_v29  ;;  %762 = vmatpush.msrb.mxu3 %v566_v30  ;;  %v501_v23 = vperm.slane %v1208_v42, 1  ;;  %v472_v26 = vperm.slane %v470_v61, 0  ;;  %v473_v27 = vperm.slane %v470_v61, 1 }
 0x35a   :  { %699 = vmatpush.msrb.mxu0 %v618_v25  ;;  %719 = vmatpush.msrb.mxu1 %v619_v32  ;;  %v1196_v34 = vpop.permute.xlu2 %459 }
 0x35d   :  { %v515_v36 = vpop.permute.xlu1 %514 }
 0x35e   :  { %v519_v37 = vpop.permute.xlu0 %518  ;;  %v522_v38 = vsel %vm520_vm6, %v515_v36, %v517_v60 }
 0x35f   :  { %v521_v39 = vsel %vm520_vm6, %v517_v60, %v519_v37  ;;  %v538_v40 = vmul.f32 %v530_v19, %v522_v38 }
 0x360   :  { %v539_v41 = vmul.f32 %v531_v35, %v521_v39 }
 0x361   :  { %743 = vmatpush.msrb.mxu2 %v538_v40 }
 0x362   :  { %763 = vmatpush.msrb.mxu3 %v539_v41  ;;  %v541_v46 = vpop.permute.xlu2 %540 }
 0x363   :  { %v550_v58 = vsel %vm153_vm1, %v541_v46, %v543_v6  ;;  %v529_v6 = vperm.slane %v1194_v33, 1 }
 0x364   :  { %v564_v60 = vmul.f32 %v556_v57, %v550_v58 }
 0x365   :  { %v570_v47 = vpop.permute.xlu1 %569 }
 0x366   :  { %v489_v48 = vpop.permute.xlu0 %488  ;;  %v576_v49 = vsel %vm140_vm2, %v570_v47, %v1120_v31  ;;  %v577_v52 = vsel %vm140_vm2, %v1149_v54, %v570_v47  ;;  %v551_v31 = vsel %vm153_vm1, %v1145_v51, %v541_v46  ;;  %vm465_vm1 = vcmp.lt.s32.totalorder %v946_v22, 17 }
 0x367   :  { %v494_v50 = vsel %vm492_vm7, %v1175_v11, %v489_v48  ;;  %v590_v55 = vmul.f32 %v582_v43, %v577_v52  ;;  %v591_v56 = vmul.f32 %v583_v44, %v576_v49  ;;  %v563_v54 = vmul.f32 %v555_v53, %v551_v31 }
 0x368   :  { %v510_v59 = vmul.f32 %v502_v45, %v494_v50  ;;  %vm686_vm2 = vcmask 588800  }
 0x369   :  { %700 = vmatpush.msrb.mxu0 %v590_v55  ;;  %720 = vmatpush.msrb.mxu1 %v591_v56 }
 0x36a   :  { %744 = vmatpush.msrb.mxu2 %v510_v59  ;;  %v458_v18 = vpop.permute.xlu2 %457 }
 0x36b   :  { %701 = vmatpush.msrb.mxu0 %v1038_v63  ;;  %721 = vmatpush.msrb.mxu1 %v1067_v12  ;;  %v468_v28 = vsel %vm465_vm1, %v458_v18, %v1196_v34 }
 0x36c   :  { %v481_v35 = vmul.f32 %v473_v27, %v468_v28 }
 0x36d   :  { %v491_v2 = vpop.permute.xlu1 %490  ;;  %702 = vmatpush.msrb.mxu0 %v563_v54  ;;  %722 = vmatpush.msrb.mxu1 %v564_v60 }
 0x36e   :  { %v462_v51 = vpop.permute.xlu0 %461  ;;  %v493_v63 = vsel %vm492_vm7, %v489_v48, %v491_v2 }
 0x36f   :  { %v467_v12 = vsel %vm465_vm1, %v1196_v34, %v462_v51  ;;  %v511_v10 = vmul.f32 %v503_v62, %v493_v63 }
 0x370   :  { %v482_v3 = vmul.f32 %v474_v0, %v467_v12 }
 0x371   :  { %764 = vmatpush.msrb.mxu3 %v511_v10 }
 0x372   :  { %745 = vmatpush.msrb.mxu2 %v482_v3 }
 0x373   :  { %809 = vmatmul.msk.f32.vlgmr.msrb.gmra.mxu2 %vm686_vm2, %v678_v4 }
 0x375   :  { %v464_v17 = vpop.permute.xlu1 %463 }
 0x376   :  { %v513_v7 = vpop.permute.xlu0 %512  ;;  %v466_v1 = vsel %vm465_vm1, %v462_v51, %v464_v17  ;;  %v469_v29 = vsel %vm465_vm1, %v464_v17, %v458_v18 }
 0x377   :  { %v523_v8 = vsel %vm520_vm6, %v513_v7, %v515_v36  ;;  %v524_v9 = vsel %vm520_vm6, %v519_v37, %v513_v7  ;;  %v483_v13 = vmul.f32 %v475_v5, %v466_v1  ;;  %v480_v19 = vmul.f32 %v472_v26, %v469_v29 }
 0x378   :  { %v536_v14 = vmul.f32 %v528_v16, %v524_v9  ;;  %v537_v15 = vmul.f32 %v529_v6, %v523_v8 }
 0x379   :  { %765 = vmatpush.msrb.mxu3 %v483_v13 }
 0x37a   :  { %703 = vmatpush.msrb.mxu0 %v536_v14  ;;  %723 = vmatpush.msrb.mxu1 %v537_v15 }
 0x37b   :  { %810 = vmatmul.msk.f32.vlgmr.msrb.gmra.mxu3 %vm686_vm2, %v678_v4 }
 0x37d   :  { %v485_v24 = vpop.permute.xlu1 %484 }
 0x37e   :  { %v495_v30 = vsel %vm492_vm7, %v485_v24, %v1175_v11  ;;  %v496_v25 = vsel %vm492_vm7, %v491_v2, %v485_v24  ;;  %v683_v34 = vpop.permute.xlu0 %682 }
 0x37f   :  { %v508_v32 = vmul.f32 %v500_v20, %v496_v25  ;;  %v509_v33 = vmul.f32 %v501_v23, %v495_v30  ;;  %v685_v36 = vperm.slane %v683_v34, 0 }
 0x381   :  { %704 = vmatpush.msrb.mxu0 %v508_v32  ;;  %724 = vmatpush.msrb.mxu1 %v509_v33 }
 0x383   :  { %705 = vmatpush.msrb.mxu0 %v480_v19  ;;  %725 = vmatpush.msrb.mxu1 %v481_v35 }
 0x384   :  { %807 = vmatmul.msk.f32.vlgmr.msrb.gmra.mxu0 %vm686_vm2, %v678_v4  ;;  %808 = vmatmul.msk.f32.vlgmr.msrb.gmra.mxu1 %vm686_vm2, %v678_v4 }
 0x3f6   :  { %v747_v37 = vpop.f32.mrf.mxu2 }
 0x3f7   :  { %v748_v39 = vadd.f32 %v747_v37, %v685_v36 }
 0x3f9   :  { %v775_v43 = vrot.slane %v748_v39, 6 }
 0x3fe   :  { %v767_v38 = vpop.f32.mrf.mxu3 }
 0x3ff   :  { %v768_v11 = vadd.f32 %v767_v38, %v685_v36 }
 0x401   :  { %v707_v22 = vpop.f32.mrf.mxu0  ;;  %v727_v40 = vpop.f32.mrf.mxu1  ;;  %v776_v41 = vrot.slane %v768_v11, 5 }
 0x402   :  { %v728_v42 = vadd.f32 %v727_v40, %v685_v36  ;;  %v708_v44 = vadd.f32 %v707_v22, %v685_v36 }
 0x403   :  { %v780_v46 = vsel %vm779_vm8, %v775_v43, %v776_v41 }
 0x404   :  { %v774_v45 = vrot.slane %v728_v42, 7 }
 0x406   :  { %v778_v47 = vsel %vm777_vm9, %v708_v44, %v774_v45 }
 0x407   :  { %v782_v48 = vsel %vm781_vm10, %v778_v47, %v780_v46 }
 0x408   :  { %788 = vst.msk [vmem:[%s1281_s8] sm:$0xf] %vm786_vm11, %v782_v48 }

// kernel: critic_forward.2
= control target key start
LH: loop header
LB: loop body
LE: loop exit
PB: predicated region body
PF: predicated region fallthrough
CT: control target
= control target key end

     0   :  { %s1843_s13 = smov 0   ;;  %s2361_s0 = inlined_call_operand.vmem [shape: f32[16,128], index: 0, kind: input, shape index: {}]   ;;  %s2362_s1 = inlined_call_operand.vmem [shape: f32[32,144], index: 1, kind: input, shape index: {}]   ;;  %s2363_s2 = inlined_call_operand.vmem [shape: f32[32,1], index: 2, kind: input, shape index: {}]   ;;  %s2364_s3 = inlined_call_operand.vmem [shape: f32[9,1,128], index: 3, kind: input, shape index: {}]   ;;  %s2365_s4 = inlined_call_operand.vmem [shape: f32[3,1,128], index: 4, kind: input, shape index: {}]   ;;  %s2366_s5 = inlined_call_operand.vmem [shape: f32[2,32,1], index: 5, kind: input, shape index: {}]   ;;  %s2367_s6 = inlined_call_operand.vmem [shape: f32[2,32,288], index: 6, kind: input, shape index: {}]   ;;  %s2368_s7 = inlined_call_operand.vmem [shape: f32[2,32,1], index: 7, kind: input, shape index: {}]   ;;  %s2369_s8 = inlined_call_operand.vmem [shape: f32[2,32,16], index: 8, kind: input, shape index: {}]   ;;  %s2370_s9 = inlined_call_operand.vmem [shape: f32[2,32,1], index: 9, kind: input, shape index: {}]   ;;  %s2371_s10 = inlined_call_operand.vmem [shape: f32[32,128], index: 10, kind: output, shape index: {}]  }
   0x1 LB: > { %s1584_s14 = sadd.s32 4294967295, %s1758_s13   ;;  %p1587_p0 = scmp.ge.s32.totalorder %s1758_s13, 1  ;;  %s1758_s13 = sphi %s1843_s13, %s20_s13  }
   0x2   : > { %p347_p1 = scmp.lt.s32.totalorder %s1758_s13, 3 }
   0x4   : > { %p348_p2 = pnand %p1587_p0, %p347_p1 }
   0x5   : > { %p400_p3 = scmp.lt.s32.totalorder (!%p348_p2), %s1584_s14, 1  ;;  %p1597_p4 = scmp.ne.s32.totalorder (!%p348_p2), %s1584_s14, 0 }
   0x6   : > { %351 = sbr.rel (%p348_p2) target bundleno = 1363 (0x553), region = 60 }
   0xb   : > { %s401_s15 = scalar_select %p400_p3, %s1584_s14, 1 }
   0xc   : > { %428 = sbr.rel (%p1597_p4) target bundleno = 322 (0x142), region = 64  ;;  %s1760_s19 = smov (!%p1597_p4), 120  }
   0xd   : > { %s1634_s16 = sshll.u32 %s401_s15, 5  ;;  %s1670_s17 = smul.u32 96, %s401_s15 }
   0xe   : > { %s1854_s20 = scalar_lea.vmem %s2366_s5, %s1634_s16  ;;  %s1859_s23 = scalar_lea.vmem %s2368_s7, %s1634_s16 }
   0xf   : > { %s1864_s26 = scalar_lea.vmem %s2367_s6, %s1670_s17  ;;  %s1869_s29 = scalar_lea.vmem %s2369_s8, %s1634_s16 }
  0x10   : > { %s1874_s12 = scalar_lea.vmem %s2370_s9, %s1634_s16  ;;  %s1761_s17 = smov (!%p1597_p4), 121  }
  0x11   : > { %v1879_v0 = vld [vmem:[%s2361_s0 + $0x8] sm:$0xff]  ;;  %s1762_s21 = smov 127   ;;  %v1887_v1 = vld [vmem:[%s2361_s0] sm:$0xff]  ;;  %s1763_s14 = smov 1   ;;  %v1768_v16 = vmov 0   ;;  %v528_v29 = vld [vmem:[%s2363_s2 + $0x10] sm:$0xff] }
  0x12   : > { %498 = vrot.lane.b32.xlu0 %v1879_v0, %s1760_s19  ;;  %487 = vrot.lane.b32.xlu1 %v1879_v0, %s1761_s17  ;;  %s1764_s16 = smov 7   ;;  %s1765_s25 = smov 119   ;;  %v1710_v3 = vld [vmem:[%s2364_s3 + $0x7] ss:$0 sm:$0xff]  ;;  %v1711_v8 = vld [vmem:[%s2364_s3 + $0x6] ss:$0 sm:$0xff] }
  0x13   : > { %476 = vrot.lane.b32.xlu2 %v1879_v0, %s1762_s21  ;;  %s1766_s27 = smov 8   ;;  %s1767_s28 = smov 9   ;;  %v1712_v13 = vld [vmem:[%s2364_s3 + $0x5] ss:$0 sm:$0xff]  ;;  %1707 = vset.pattern.permute.xlu1 %v1768_v16  ;;  %v1713_v21 = vld [vmem:[%s2364_s3 + $0x3] ss:$0 sm:$0xff] }
  0x14   : > { %1709 = vset.pattern.permute.xlu0 %v1768_v16  ;;  %1708 = vset.pattern.permute.xlu2 %v1768_v16  ;;  %v1715_v22 = vld [vmem:[%s2364_s3 + $0x8] ss:$0 sm:$0xff]  ;;  %v526_v24 = vld [vmem:[%s2363_s2] sm:$0xff]  ;;  %vm550_vm0 = vcmask 130048   ;;  %v529_v37 = vld [vmem:[%s2363_s2 + $0x18] sm:$0xff] }
  0x15   : > { %v1714_v26 = vld [vmem:[%s2364_s3 + $0x2] ss:$0 sm:$0xff]  ;;  %v1716_v35 = vld [vmem:[%s2364_s3 + $0x1] ss:$0 sm:$0xff]  ;;  %v519_v36 = vld [vmem:[%s2362_s1 + $0x8] sm:$0xff] }
  0x16   : > { %v527_v38 = vld [vmem:[%s2363_s2 + $0x8] sm:$0xff]  ;;  %v1717_v39 = vld [vmem:[%s2364_s3] ss:$0 sm:$0xff]  ;;  %v521_v46 = vld [vmem:[%s2362_s1 + $0x18] sm:$0xff] }
  0x17   : > { %v518_v49 = vld [vmem:[%s2362_s1] sm:$0xff]  ;;  %v520_v50 = vld [vmem:[%s2362_s1 + $0x10] sm:$0xff]  ;;  %v523_v52 = vld [vmem:[%s2362_s1 + $0x28] sm:$0xff] }
  0x18   : > { %v522_v51 = vld [vmem:[%s2362_s1 + $0x20] sm:$0xff]  ;;  %v524_v53 = vld [vmem:[%s2362_s1 + $0x30] sm:$0xff]  ;;  %v525_v54 = vld [vmem:[%s2362_s1 + $0x38] sm:$0xff] }
  0x1a   : > { %496 = vrot.lane.b32.xlu0 %v1887_v1, %s1760_s19  ;;  %485 = vrot.lane.b32.xlu1 %v1887_v1, %s1761_s17 }
  0x1b   : > { %474 = vrot.lane.b32.xlu2 %v1887_v1, %s1762_s21 }
  0x22   : > { %465 = vrot.lane.b32.xlu0 %v1879_v0, %s1763_s14  ;;  %463 = vrot.lane.b32.xlu1 %v1887_v1, %s1763_s14 }
  0x23   : > { %454 = vrot.lane.b32.xlu2 %v1879_v0, %s1764_s16 }
  0x2a   : > { %509 = vrot.lane.b32.xlu0 %v1879_v0, %s1765_s25  ;;  %452 = vrot.lane.b32.xlu1 %v1887_v1, %s1764_s16 }
  0x2b   : > { %507 = vrot.lane.b32.xlu2 %v1887_v1, %s1765_s25 }
  0x32   : > { %443 = vrot.lane.b32.xlu0 %v1879_v0, %s1766_s27  ;;  %441 = vrot.lane.b32.xlu1 %v1887_v1, %s1766_s27 }
  0x33   : > { %433 = vrot.lane.b32.xlu2 %v1879_v0, %s1767_s28 }
  0x3a   : > { %431 = vrot.lane.b32.xlu0 %v1887_v1, %s1767_s28  ;;  %532 = vperm.xlu1 %1707, %v526_v24  }
  0x3b   : > { %537 = vperm.xlu2 %1708, %v527_v38  }
  0x42   : > { %542 = vperm.xlu0 %1709, %v528_v29   ;;  %547 = vperm.xlu1 %1707, %v529_v37  }
  0x6d   : > { %v477_v2 = vpop.permute.xlu2 %476 }
  0x6e   : > { %v484_v17 = vmul.f32 %v1712_v13, %v477_v2 }
  0x75   : > { %v475_v7 = vpop.permute.xlu2 %474 }
  0x76   : > { %v483_v20 = vmul.f32 %v1712_v13, %v475_v7 }
  0x7d   : > { %v455_v15 = vpop.permute.xlu2 %454 }
  0x7e   : > { %v462_v33 = vmul.f32 %v1714_v26, %v455_v15 }
  0x84   : > { %v499_v4 = vpop.permute.xlu0 %498  ;;  %v488_v5 = vpop.permute.xlu1 %487 }
  0x85   : > { %v506_v6 = vmul.f32 %v1710_v3, %v499_v4  ;;  %v495_v12 = vmul.f32 %v1711_v8, %v488_v5  ;;  %v508_v23 = vpop.permute.xlu2 %507 }
  0x86   : > { %v516_v32 = vmul.f32 %v1715_v22, %v508_v23 }
  0x87   : > { %563 = vmatpush.msra.mxu0 %v506_v6  ;;  %1638 = vmatpush.msra.mxu2 %v506_v6 }
  0x88   : > { %1639 = vmatpush.msra.mxu3 %v506_v6 }
  0x8c   : > { %v497_v9 = vpop.permute.xlu0 %496  ;;  %v486_v10 = vpop.permute.xlu1 %485 }
  0x8d   : > { %v505_v11 = vmul.f32 %v1710_v3, %v497_v9  ;;  %v494_v14 = vmul.f32 %v1711_v8, %v486_v10  ;;  %v434_v40 = vpop.permute.xlu2 %433 }
  0x8e   : > { %v440_v45 = vmul.f32 %v1717_v39, %v434_v40 }
  0x8f   : > { %564 = vmatpush.msra.mxu0 %v505_v11  ;;  %1640 = vmatpush.msra.mxu2 %v505_v11 }
  0x90   : > { %1641 = vmatpush.msra.mxu3 %v505_v11 }
  0x91   : > { %565 = vmatpush.msra.mxu0 %v495_v12  ;;  %1642 = vmatpush.msra.mxu2 %v495_v12 }
  0x92   : > { %1643 = vmatpush.msra.mxu3 %v495_v12 }
  0x93   : > { %566 = vmatpush.msra.mxu0 %v494_v14  ;;  %1644 = vmatpush.msra.mxu2 %v494_v14 }
  0x94   : > { %1645 = vmatpush.msra.mxu3 %v494_v14  ;;  %v466_v18 = vpop.permute.xlu0 %465  ;;  %v464_v19 = vpop.permute.xlu1 %463 }
  0x95   : > { %567 = vmatpush.msra.mxu0 %v484_v17  ;;  %1646 = vmatpush.msra.mxu2 %v484_v17  ;;  %v473_v25 = vmul.f32 %v1713_v21, %v466_v18  ;;  %v472_v30 = vmul.f32 %v1713_v21, %v464_v19  ;;  %v538_v61 = vpop.permute.xlu2 %537 }
  0x96   : > { %1647 = vmatpush.msra.mxu3 %v484_v17 }
  0x97   : > { %568 = vmatpush.msra.mxu0 %v483_v20  ;;  %1648 = vmatpush.msra.mxu2 %v483_v20 }
  0x98   : > { %1649 = vmatpush.msra.mxu3 %v483_v20 }
  0x99   : > { %569 = vmatpush.msra.mxu0 %v1879_v0  ;;  %1650 = vmatpush.msra.mxu2 %v1879_v0 }
  0x9a   : > { %1651 = vmatpush.msra.mxu3 %v1879_v0 }
  0x9b   : > { %570 = vmatpush.msra.mxu0 %v1887_v1  ;;  %1652 = vmatpush.msra.mxu2 %v1887_v1 }
  0x9c   : > { %1653 = vmatpush.msra.mxu3 %v1887_v1  ;;  %v510_v27 = vpop.permute.xlu0 %509  ;;  %v453_v28 = vpop.permute.xlu1 %452 }
  0x9d   : > { %571 = vmatpush.msra.mxu0 %v473_v25  ;;  %1654 = vmatpush.msra.mxu2 %v473_v25  ;;  %v517_v31 = vmul.f32 %v1715_v22, %v510_v27  ;;  %v461_v34 = vmul.f32 %v1714_v26, %v453_v28 }
  0x9e   : > { %1655 = vmatpush.msra.mxu3 %v473_v25 }
  0x9f   : > { %572 = vmatpush.msra.mxu0 %v472_v30  ;;  %1656 = vmatpush.msra.mxu2 %v472_v30 }
  0xa0   : > { %1657 = vmatpush.msra.mxu3 %v472_v30  ;;  %606 = vmatpush.msra.mxu1 %v517_v31 }
  0xa1   : > { %573 = vmatpush.msra.mxu0 %v462_v33  ;;  %1658 = vmatpush.msra.mxu2 %v462_v33 }
  0xa2   : > { %1659 = vmatpush.msra.mxu3 %v462_v33  ;;  %607 = vmatpush.msra.mxu1 %v516_v32 }
  0xa3   : > { %574 = vmatpush.msra.mxu0 %v461_v34  ;;  %1660 = vmatpush.msra.mxu2 %v461_v34 }
  0xa4   : > { %1661 = vmatpush.msra.mxu3 %v461_v34  ;;  %v444_v41 = vpop.permute.xlu0 %443  ;;  %v442_v42 = vpop.permute.xlu1 %441  ;;  %1605 = vmatmul.msk.f32.vlgmr.msra.gmra.mxu1 %vm550_vm0, %v519_v36 }
  0xa5   : > { %v451_v43 = vmul.f32 %v1716_v35, %v444_v41  ;;  %v450_v44 = vmul.f32 %v1716_v35, %v442_v42 }
  0xa7   : > { %575 = vmatpush.msra.mxu0 %v451_v43  ;;  %1662 = vmatpush.msra.mxu2 %v451_v43 }
  0xa8   : > { %1663 = vmatpush.msra.mxu3 %v451_v43 }
  0xa9   : > { %576 = vmatpush.msra.mxu0 %v450_v44  ;;  %1664 = vmatpush.msra.mxu2 %v450_v44 }
  0xaa   : > { %1665 = vmatpush.msra.mxu3 %v450_v44 }
  0xab   : > { %577 = vmatpush.msra.mxu0 %v440_v45  ;;  %1666 = vmatpush.msra.mxu2 %v440_v45 }
  0xac   : > { %v432_v47 = vpop.permute.xlu0 %431  ;;  %1667 = vmatpush.msra.mxu3 %v440_v45  ;;  %1606 = vmatmul.msk.f32.gmra.mxu1 %vm550_vm0, %v521_v46  ;;  %v533_v57 = vpop.permute.xlu1 %532 }
  0xad   : > { %v439_v48 = vmul.f32 %v1717_v39, %v432_v47 }
  0xaf   : > { %578 = vmatpush.msra.mxu0 %v439_v48  ;;  %1668 = vmatpush.msra.mxu2 %v439_v48 }
  0xb0   : > { %1669 = vmatpush.msra.mxu3 %v439_v48  ;;  %579 = vmatmul.f32.vlgmr.msra.gmra.mxu0 %v518_v49 }
  0xb1   : > { %582 = vmatmul.f32.vlgmr.msra.gmra.mxu2 %v520_v50  ;;  %585 = vmatmul.f32.vlgmr.msra.gmra.mxu3 %v522_v51 }
  0xb4   : > { %1607 = vmatmul.msk.f32.gmra.mxu1 %vm550_vm0, %v523_v52  ;;  %v543_v62 = vpop.permute.xlu0 %542  ;;  %v548_v6 = vpop.permute.xlu1 %547 }
  0xb9   : > { %588 = vmatmul.f32.gmra.mxu3 %v524_v53 }
  0xbc   : > { %1608 = vmatmul.msk.f32.gmra.mxu1 %vm550_vm0, %v525_v54 }
 0x121   : > { %v609_v55 = vpop.f32.mrf.mxu1 }
 0x129   : > { %v612_v56 = vpop.f32.mrf.mxu1 }
 0x12d   : > { %v580_v58 = vpop.f32.mrf.mxu0 }
 0x12e   : > { %v581_v59 = vadd.f32 %v580_v58, %v533_v57 }
 0x130   : > { %v610_v60 = vadd.f32 %v609_v55, %v581_v59 }
 0x131   : > { %v615_v63 = vpop.f32.mrf.mxu1 }
 0x132   : > { %621 = vst [vmem:[%s2371_s10] sm:$0xff] %v610_v60 }
 0x134   : > { %v583_v0 = vpop.f32.mrf.mxu2  ;;  %v586_v1 = vpop.f32.mrf.mxu3 }
 0x135   : > { %v584_v2 = vadd.f32 %v583_v0, %v538_v61  ;;  %v587_v3 = vadd.f32 %v586_v1, %v543_v62 }
 0x137   : > { %v613_v4 = vadd.f32 %v612_v56, %v584_v2  ;;  %v616_v5 = vadd.f32 %v615_v63, %v587_v3 }
 0x139   : > { %622 = vst [vmem:[%s2371_s10 + $0x8] sm:$0xff] %v613_v4  ;;  %v618_v8 = vpop.f32.mrf.mxu1 }
 0x13a   : > { %623 = vst [vmem:[%s2371_s10 + $0x10] sm:$0xff] %v616_v5 }
 0x13c   : > { %v589_v7 = vpop.f32.mrf.mxu3 }
 0x13d   : > { %v590_v9 = vadd.f32 %v589_v7, %v548_v6 }
 0x13f   : > { %v619_v10 = vadd.f32 %v618_v8, %v590_v9 }
 0x141   : > { %624 = vst [vmem:[%s2371_s10 + $0x18] sm:$0xff] %v619_v10 }
 0x142 PF: > { %v1992_v12 = vld [vmem:[%s2371_s10 + $0x10] sm:$0xff]  ;;  %v2001_v15 = vld [vmem:[%s2371_s10 + $0x8] sm:$0xff]  ;;  %s1769_s27 = smov 1   ;;  %s1770_s28 = smov 127   ;;  %v2013_v17 = vld [vmem:[%s2371_s10] sm:$0xff]  ;;  %v1773_v49 = vmov 0  }
 0x143   : > { %v631_v14 = vmul.f32 %v1992_v12, %v1992_v12  ;;  %v630_v16 = vmul.f32 %v2001_v15, %v2001_v15  ;;  %v629_v18 = vmul.f32 %v2013_v17, %v2013_v17  ;;  %v649_v19 = vld [vmem:[%s2365_s4] sm:$0x1]  ;;  %s1771_s21 = smov 2   ;;  %s1772_s22 = smov 126   ;;  %v1609_v48 = vld [vmem:[%s2365_s4 + $0x1] sm:$0x1]  ;;  %1719 = vset.pattern.permute.xlu1 %v1773_v49  ;;  %1718 = vset.pattern.permute.xlu0 %v1773_v49 }
 0x144   : > { %v1721_v22 = vld [vmem:[%s2365_s4] ss:$0 sm:$0xff]  ;;  %v661_v23 = vsub.f32 1.0, %v649_v19  ;;  %v1722_v50 = vld [vmem:[%s2365_s4 + $0x1] ss:$0 sm:$0xff]  ;;  %1720 = vset.pattern.permute.xlu2 %v1773_v49  ;;  %v702_v51 = vsub.f32 1.0, %v1609_v48 }
 0x145   : > { %645 = vrot.lane.b32.xlu1 %v631_v14, %s1769_s27  ;;  %643 = vrot.lane.b32.xlu2 %v630_v16, %s1769_s27  ;;  %s1774_s30 = smov 124   ;;  %s1775_s11 = smov 4   ;;  %v807_v19 = vld [vmem:[%s1854_s20] sm:$0xff]  ;;  %vm1018_vm9 = vcmask 261120  }
 0x146   : > { %v663_v27 = vperm.slane %v661_v23, 0  ;;  %v704_v53 = vperm.slane %v702_v51, 0  ;;  %s1780_s24 = smov 119   ;;  %s1781_s14 = smov 9  }
 0x148   : > { %v1987_v11 = vld [vmem:[%s2371_s10 + $0x18] sm:$0xff] }
 0x149   : > { %v632_v13 = vmul.f32 %v1987_v11, %v1987_v11 }
 0x14b   : > { %647 = vrot.lane.b32.xlu0 %v632_v13, %s1769_s27 }
 0x14d   : > { %637 = vrot.lane.b32.xlu1 %v631_v14, %s1770_s28  ;;  %635 = vrot.lane.b32.xlu2 %v630_v16, %s1770_s28 }
 0x153   : > { %639 = vrot.lane.b32.xlu0 %v632_v13, %s1770_s28 }
 0x155   : > { %633 = vrot.lane.b32.xlu1 %v629_v18, %s1770_s28 }
 0x15b   : > { %641 = vrot.lane.b32.xlu0 %v629_v18, %s1769_s27 }
 0x19f   : > { %v644_v24 = vpop.permute.xlu2 %643 }
 0x1a0   : > { %v654_v34 = vmul.f32 %v1721_v22, %v644_v24  ;;  %v1723_v24 = vld [vmem:[%s2365_s4 + $0x2] ss:$0 sm:$0xff] }
 0x1a2   : > { %v658_v38 = vadd.f32 %v654_v34, %v630_v16  ;;  %v809_v16 = vld [vmem:[%s1854_s20 + $0x10] sm:$0xff] }
 0x1a7   : > { %v636_v37 = vpop.permute.xlu2 %635 }
 0x1a8   : > { %v666_v39 = vmul.f32 %v663_v27, %v636_v37 }
 0x1aa   : > { %v670_v43 = vadd.f32 %v666_v39, %v658_v38 }
 0x1b7   : > { %v646_v21 = vpop.permute.xlu1 %645 }
 0x1b8   : > { %v655_v26 = vmul.f32 %v1721_v22, %v646_v21 }
 0x1ba   : > { %v659_v31 = vadd.f32 %v655_v26, %v631_v14  ;;  %v810_v14 = vld [vmem:[%s1854_s20 + $0x18] sm:$0xff] }
 0x1bd   : > { %v648_v20 = vpop.permute.xlu0 %647 }
 0x1be   : > { %v656_v25 = vmul.f32 %v1721_v22, %v648_v20  ;;  %v1610_v20 = vld [vmem:[%s2365_s4 + $0x2] sm:$0x1] }
 0x1bf   : > { %v638_v29 = vpop.permute.xlu1 %637  ;;  %v743_v21 = vsub.f32 1.0, %v1610_v20 }
 0x1c0   : > { %v660_v30 = vadd.f32 %v656_v25, %v632_v13  ;;  %v667_v33 = vmul.f32 %v663_v27, %v638_v29 }
 0x1c1   : > { %v745_v23 = vperm.slane %v743_v21, 0 }
 0x1c2   : > { %v671_v36 = vadd.f32 %v667_v33, %v659_v31 }
 0x1c4   : > { %685 = vrot.lane.b32.xlu1 %v671_v36, %s1771_s21 }
 0x1c5   : > { %v640_v28 = vpop.permute.xlu0 %639 }
 0x1c6   : > { %v668_v32 = vmul.f32 %v663_v27, %v640_v28 }
 0x1c7   : > { %v634_v42 = vpop.permute.xlu1 %633 }
 0x1c8   : > { %v672_v35 = vadd.f32 %v668_v32, %v660_v30  ;;  %v665_v45 = vmul.f32 %v663_v27, %v634_v42 }
 0x1ca   : > { %687 = vrot.lane.b32.xlu2 %v672_v35, %s1771_s21  ;;  %679 = vrot.lane.b32.xlu0 %v672_v35, %s1772_s22 }
 0x1cc   : > { %675 = vrot.lane.b32.xlu1 %v670_v43, %s1772_s22 }
 0x1cd   : > { %v642_v40 = vpop.permute.xlu0 %641 }
 0x1ce   : > { %v653_v41 = vmul.f32 %v1721_v22, %v642_v40 }
 0x1d0   : > { %v657_v44 = vadd.f32 %v653_v41, %v629_v18  ;;  %v808_v18 = vld [vmem:[%s1854_s20 + $0x8] sm:$0xff]  ;;  %s1776_s20 = smov 120  }
 0x1d2   : > { %677 = vrot.lane.b32.xlu2 %v671_v36, %s1772_s22  ;;  %683 = vrot.lane.b32.xlu0 %v670_v43, %s1771_s21  ;;  %v669_v46 = vadd.f32 %v665_v45, %v657_v44 }
 0x1da   : > { %681 = vrot.lane.b32.xlu2 %v669_v46, %s1771_s21  ;;  %673 = vrot.lane.b32.xlu0 %v669_v46, %s1772_s22  ;;  %s1777_s21 = smov 7   ;;  %s1778_s22 = smov 121  }
 0x224   : > { %v688_v47 = vpop.permute.xlu2 %687 }
 0x225   : > { %v697_v52 = vmul.f32 %v1722_v50, %v688_v47 }
 0x227   : > { %v701_v58 = vadd.f32 %v697_v52, %v672_v35 }
 0x22c   : > { %v678_v54 = vpop.permute.xlu2 %677 }
 0x22d   : > { %v708_v60 = vmul.f32 %v704_v53, %v678_v54 }
 0x234   : > { %v682_v3 = vpop.permute.xlu2 %681 }
 0x235   : > { %v694_v6 = vmul.f32 %v1722_v50, %v682_v3 }
 0x236   : > { %v686_v55 = vpop.permute.xlu1 %685 }
 0x237   : > { %v696_v56 = vmul.f32 %v1722_v50, %v686_v55  ;;  %v698_v9 = vadd.f32 %v694_v6, %v669_v46 }
 0x239   : > { %v700_v61 = vadd.f32 %v696_v56, %v671_v36 }
 0x23b   : > { %v712_v63 = vadd.f32 %v708_v60, %v700_v61 }
 0x23c   : > { %v680_v57 = vpop.permute.xlu0 %679 }
 0x23d   : > { %v709_v59 = vmul.f32 %v704_v53, %v680_v57  ;;  %726 = vrot.lane.b32.xlu0 %v712_v63, %s1775_s11 }
 0x23e   : > { %v676_v0 = vpop.permute.xlu1 %675 }
 0x23f   : > { %v713_v62 = vadd.f32 %v709_v59, %v701_v58  ;;  %v707_v4 = vmul.f32 %v704_v53, %v676_v0 }
 0x241   : > { %720 = vrot.lane.b32.xlu2 %v713_v62, %s1774_s30  ;;  %728 = vrot.lane.b32.xlu1 %v713_v62, %s1775_s11 }
 0x244   : > { %v684_v1 = vpop.permute.xlu0 %683 }
 0x245   : > { %v695_v2 = vmul.f32 %v1722_v50, %v684_v1 }
 0x247   : > { %v699_v5 = vadd.f32 %v695_v2, %v670_v43 }
 0x249   : > { %718 = vrot.lane.b32.xlu1 %v712_v63, %s1774_s30  ;;  %v711_v7 = vadd.f32 %v707_v4, %v699_v5 }
 0x24b   : > { %716 = vrot.lane.b32.xlu0 %v711_v7, %s1774_s30  ;;  %724 = vrot.lane.b32.xlu2 %v711_v7, %s1775_s11 }
 0x24c   : > { %v674_v8 = vpop.permute.xlu0 %673 }
 0x24d   : > { %v706_v10 = vmul.f32 %v704_v53, %v674_v8 }
 0x24f   : > { %v710_v13 = vadd.f32 %v706_v10, %v698_v9 }
 0x251   : > { %722 = vrot.lane.b32.xlu1 %v710_v13, %s1775_s11 }
 0x253   : > { %714 = vrot.lane.b32.xlu2 %v710_v13, %s1774_s30  ;;  %828 = vperm.xlu0 %1718, %v810_v14  }
 0x259   : > { %823 = vperm.xlu1 %1719, %v809_v16  }
 0x25b   : > { %818 = vperm.xlu2 %1720, %v808_v18  }
 0x261   : > { %813 = vperm.xlu1 %1719, %v807_v19  }
 0x29b   : > { %v721_v22 = vpop.permute.xlu2 %720 }
 0x29c   : > { %v750_v28 = vmul.f32 %v745_v23, %v721_v22 }
 0x2a5   : > { %v725_v30 = vpop.permute.xlu2 %724 }
 0x2a6   : > { %v736_v33 = vmul.f32 %v1723_v24, %v725_v30 }
 0x2a8   : > { %v740_v38 = vadd.f32 %v736_v33, %v711_v7 }
 0x2ad   : > { %v715_v44 = vpop.permute.xlu2 %714 }
 0x2ae   : > { %v747_v51 = vmul.f32 %v745_v23, %v715_v44 }
 0x2af   : > { %v727_v27 = vpop.permute.xlu0 %726 }
 0x2b0   : > { %v737_v32 = vmul.f32 %v1723_v24, %v727_v27 }
 0x2b2   : > { %v741_v35 = vadd.f32 %v737_v32, %v712_v63 }
 0x2b3   : > { %v729_v25 = vpop.permute.xlu1 %728 }
 0x2b4   : > { %v738_v26 = vmul.f32 %v1723_v24, %v729_v25 }
 0x2b6   : > { %v742_v29 = vadd.f32 %v738_v26, %v713_v62 }
 0x2b8   : > { %v754_v31 = vadd.f32 %v750_v28, %v742_v29 }
 0x2ba   : > { %1732 = vrsqrt.f32 %v754_v31  ;;  %vm798_vm1 = vcmp.eq.f32.partialorder %v754_v31, inf  ;;  %v801_v63 = vand.u32 2147483648, %v754_v31  ;;  %vm800_vm2 = vcmp.eq.f32.partialorder %v754_v31, 0.0 }
 0x2bb   : > { %v719_v34 = vpop.permute.xlu1 %718 }
 0x2bc   : > { %v749_v36 = vmul.f32 %v745_v23, %v719_v34 }
 0x2bd   : > { %v717_v37 = vpop.permute.xlu0 %716 }
 0x2be   : > { %v753_v39 = vadd.f32 %v749_v36, %v741_v35  ;;  %v748_v40 = vmul.f32 %v745_v23, %v717_v37  ;;  %v819_v37 = vpop.permute.xlu2 %818 }
 0x2c0   : > { %v1733_v41 = vpop.eup %1732  ;;  %1734 = vrsqrt.f32 %v753_v39  ;;  %v752_v42 = vadd.f32 %v748_v40, %v740_v38  ;;  %vm786_vm3 = vcmp.eq.f32.partialorder %v753_v39, inf  ;;  %vm788_vm4 = vcmp.eq.f32.partialorder %v753_v39, 0.0 }
 0x2c1   : > { %v792_v43 = vmul.f32 %v1733_v41, %v754_v31  ;;  %v789_v14 = vand.u32 2147483648, %v753_v39 }
 0x2c2   : > { %1736 = vrsqrt.f32 %v752_v42  ;;  %vm774_vm5 = vcmp.eq.f32.partialorder %v752_v42, inf  ;;  %v777_v22 = vand.u32 2147483648, %v752_v42  ;;  %vm776_vm6 = vcmp.eq.f32.partialorder %v752_v42, 0.0 }
 0x2c3   : > { %v723_v45 = vpop.permute.xlu1 %722  ;;  %v793_v46 = vmul.f32 %v1733_v41, %v792_v43 }
 0x2c4   : > { %v735_v47 = vmul.f32 %v1723_v24, %v723_v45 }
 0x2c5   : > { %v794_v48 = vmul.f32 0.5, %v793_v46  ;;  %v829_v18 = vpop.permute.xlu0 %828 }
 0x2c6   : > { %v1735_v50 = vpop.eup %1734  ;;  %v739_v52 = vadd.f32 %v735_v47, %v710_v13  ;;  %v834_v26 = vmul.f32 %v829_v18, %v1987_v11 }
 0x2c7   : > { %v780_v53 = vmul.f32 %v1735_v50, %v753_v39  ;;  %v795_v54 = vsub.f32 1.5, %v794_v48 }
 0x2c8   : > { %v1737_v55 = vpop.eup %1736  ;;  %v751_v56 = vadd.f32 %v747_v51, %v739_v52  ;;  %v996_v51 = vld [vmem:[%s1859_s23 + $0x10] sm:$0xff]  ;;  %v1724_v52 = vld [vmem:[%s2364_s3 + $0x3] ss:$0 sm:$0xff] }
 0x2c9   : > { %v781_v57 = vmul.f32 %v1735_v50, %v780_v53  ;;  %v796_v58 = vmul.f32 %v1733_v41, %v795_v54  ;;  %v768_v59 = vmul.f32 %v1737_v55, %v752_v42  ;;  %v832_v41 = vmul.f32 %v819_v37, %v2001_v15 }
 0x2ca   : > { %1738 = vrsqrt.f32 %v751_v56  ;;  %vm762_vm7 = vcmp.eq.f32.partialorder %v751_v56, inf  ;;  %v765_v11 = vand.u32 2147483648, %v751_v56  ;;  %vm764_vm8 = vcmp.eq.f32.partialorder %v751_v56, 0.0 }
 0x2cb   : > { %v782_v60 = vmul.f32 0.5, %v781_v57  ;;  %v797_v61 = vmul.f32 %v796_v58, %v754_v31  ;;  %v769_v62 = vmul.f32 %v1737_v55, %v768_v59  ;;  %v824_v35 = vpop.permute.xlu1 %823  ;;  %v1434_v57 = vld [vmem:[%s1874_s12] sm:$0xff]  ;;  %v1435_v59 = vld [vmem:[%s1874_s12 + $0x8] sm:$0xff] }
 0x2cc   : > { %v833_v38 = vmul.f32 %v824_v35, %v1992_v12 }
 0x2cd   : > { %v783_v0 = vsub.f32 1.5, %v782_v60  ;;  %v799_v1 = vsel %vm798_vm1, %v754_v31, %v797_v61  ;;  %v770_v2 = vmul.f32 0.5, %v769_v62  ;;  %v1436_v60 = vld [vmem:[%s1874_s12 + $0x10] sm:$0xff]  ;;  %v1437_v61 = vld [vmem:[%s1874_s12 + $0x18] sm:$0xff] }
 0x2ce   : > { %v802_v3 = vsel %vm800_vm2, %v801_v63, %v799_v1  ;;  %v1725_v63 = vld [vmem:[%s2364_s3 + $0x7] ss:$0 sm:$0xff] }
 0x2cf   : > { %v784_v4 = vmul.f32 %v1735_v50, %v783_v0  ;;  %v806_v5 = vmul.f32 0.35355338, %v802_v3  ;;  %v771_v6 = vsub.f32 1.5, %v770_v2 }
 0x2d0   : > { %v1739_v7 = vpop.eup %1738 }
 0x2d1   : > { %v785_v8 = vmul.f32 %v784_v4, %v753_v39  ;;  %v838_v9 = vadd.f32 1e-08, %v806_v5  ;;  %v756_v10 = vmul.f32 %v1739_v7, %v751_v56  ;;  %v772_v13 = vmul.f32 %v1737_v55, %v771_v6  ;;  %v995_v55 = vld [vmem:[%s1859_s23 + $0x8] sm:$0xff] }
 0x2d3   : > { %v787_v16 = vsel %vm786_vm3, %v753_v39, %v785_v8  ;;  %1740 = vrcp.f32 %v838_v9  ;;  %v757_v19 = vmul.f32 %v1739_v7, %v756_v10  ;;  %v773_v20 = vmul.f32 %v772_v13, %v752_v42  ;;  %v814_v47 = vpop.permute.xlu1 %813 }
 0x2d4   : > { %v790_v21 = vsel %vm788_vm4, %v789_v14, %v787_v16  ;;  %v831_v48 = vmul.f32 %v814_v47, %v2013_v17  ;;  %v997_v17 = vld [vmem:[%s1859_s23 + $0x18] sm:$0xff]  ;;  %v1726_v16 = vld [vmem:[%s2364_s3 + $0x2] ss:$0 sm:$0xff] }
 0x2d5   : > { %v805_v23 = vmul.f32 0.35355338, %v790_v21  ;;  %v758_v24 = vmul.f32 0.5, %v757_v19  ;;  %v775_v25 = vsel %vm774_vm5, %v752_v42, %v773_v20 }
 0x2d6   : > { %v778_v27 = vsel %vm776_vm6, %v777_v22, %v775_v25 }
 0x2d7   : > { %v837_v28 = vadd.f32 1e-08, %v805_v23  ;;  %v759_v29 = vsub.f32 1.5, %v758_v24  ;;  %v804_v30 = vmul.f32 0.35355338, %v778_v27 }
 0x2d8   : > { %v1727_v24 = vld [vmem:[%s2364_s3 + $0x6] ss:$0 sm:$0xff] }
 0x2d9   : > { %v1741_v31 = vpop.eup %1740  ;;  %1742 = vrcp.f32 %v837_v28  ;;  %v760_v32 = vmul.f32 %v1739_v7, %v759_v29  ;;  %v836_v33 = vadd.f32 1e-08, %v804_v30  ;;  %v1728_v30 = vld [vmem:[%s2364_s3 + $0x1] ss:$0 sm:$0xff] }
 0x2da   : > { %v2046_v34 = vmul.f32 %v1741_v31, %v834_v26 }
 0x2db   : > { %v761_v36 = vmul.f32 %v760_v32, %v751_v56  ;;  %1744 = vrcp.f32 %v836_v33 }
 0x2dc   : > { %954 = vrot.lane.b32.xlu1 %v2046_v34, %s1776_s20  ;;  %903 = vrot.lane.b32.xlu2 %v2046_v34, %s1769_s27 }
 0x2dd   : > { %v763_v39 = vsel %vm762_vm7, %v751_v56, %v761_v36  ;;  %v994_v56 = vld [vmem:[%s1859_s23] sm:$0xff] }
 0x2de   : > { %v766_v40 = vsel %vm764_vm8, %v765_v11, %v763_v39 }
 0x2df   : > { %v1743_v42 = vpop.eup %1742  ;;  %v803_v43 = vmul.f32 0.35355338, %v766_v40 }
 0x2e0   : > { %v2053_v44 = vmul.f32 %v1743_v42, %v833_v38  ;;  %v1729_v38 = vld [vmem:[%s2364_s3 + $0x5] ss:$0 sm:$0xff] }
 0x2e1   : > { %v1745_v45 = vpop.eup %1744  ;;  %v835_v46 = vadd.f32 1e-08, %v803_v43 }
 0x2e2   : > { %v2055_v12 = vmul.f32 %v1745_v45, %v832_v41  ;;  %901 = vrot.lane.b32.xlu0 %v2053_v44, %s1769_s27 }
 0x2e3   : > { %1746 = vrcp.f32 %v835_v46  ;;  %v1730_v46 = vld [vmem:[%s2364_s3] ss:$0 sm:$0xff] }
 0x2e4   : > { %899 = vrot.lane.b32.xlu2 %v2055_v12, %s1769_s27 }
 0x2e9   : > { %v1747_v50 = vpop.eup %1746 }
 0x2ea   : > { %v2062_v15 = vmul.f32 %v1747_v50, %v831_v48  ;;  %952 = vrot.lane.b32.xlu0 %v2053_v44, %s1776_s20 }
 0x2ec   : > { %897 = vrot.lane.b32.xlu1 %v2062_v15, %s1769_s27  ;;  %950 = vrot.lane.b32.xlu2 %v2055_v12, %s1776_s20  ;;  %s1779_s27 = smov 8  }
 0x2f2   : > { %886 = vrot.lane.b32.xlu0 %v2046_v34, %s1777_s21 }
 0x2f4   : > { %948 = vrot.lane.b32.xlu1 %v2062_v15, %s1776_s20  ;;  %884 = vrot.lane.b32.xlu2 %v2053_v44, %s1777_s21 }
 0x2fa   : > { %937 = vrot.lane.b32.xlu0 %v2046_v34, %s1778_s22 }
 0x2fc   : > { %882 = vrot.lane.b32.xlu1 %v2055_v12, %s1777_s21  ;;  %935 = vrot.lane.b32.xlu2 %v2053_v44, %s1778_s22 }
 0x302   : > { %880 = vrot.lane.b32.xlu0 %v2062_v15, %s1777_s21 }
 0x304   : > { %933 = vrot.lane.b32.xlu1 %v2055_v12, %s1778_s22  ;;  %869 = vrot.lane.b32.xlu2 %v2046_v34, %s1779_s27 }
 0x30a   : > { %931 = vrot.lane.b32.xlu0 %v2062_v15, %s1778_s22 }
 0x30c   : > { %867 = vrot.lane.b32.xlu1 %v2053_v44, %s1779_s27  ;;  %920 = vrot.lane.b32.xlu2 %v2046_v34, %s1770_s28 }
 0x312   : > { %865 = vrot.lane.b32.xlu0 %v2055_v12, %s1779_s27 }
 0x314   : > { %918 = vrot.lane.b32.xlu1 %v2053_v44, %s1770_s28  ;;  %863 = vrot.lane.b32.xlu2 %v2062_v15, %s1779_s27 }
 0x31a   : > { %916 = vrot.lane.b32.xlu0 %v2055_v12, %s1770_s28 }
 0x31c   : > { %971 = vrot.lane.b32.xlu1 %v2046_v34, %s1780_s24  ;;  %853 = vrot.lane.b32.xlu2 %v2046_v34, %s1781_s14 }
 0x322   : > { %914 = vrot.lane.b32.xlu0 %v2062_v15, %s1770_s28 }
 0x324   : > { %969 = vrot.lane.b32.xlu1 %v2053_v44, %s1780_s24  ;;  %851 = vrot.lane.b32.xlu2 %v2053_v44, %s1781_s14 }
 0x32a   : > { %967 = vrot.lane.b32.xlu0 %v2055_v12, %s1780_s24 }
 0x32c   : > { %849 = vrot.lane.b32.xlu1 %v2055_v12, %s1781_s14  ;;  %965 = vrot.lane.b32.xlu2 %v2062_v15, %s1780_s24 }
 0x332   : > { %847 = vrot.lane.b32.xlu0 %v2062_v15, %s1781_s14 }
 0x334   : > { %1015 = vperm.xlu1 %1719, %v997_v17   ;;  %1010 = vperm.xlu2 %1720, %v996_v51  }
 0x336   : > { %v904_v53 = vpop.permute.xlu2 %903 }
 0x337   : > { %v913_v54 = vmul.f32 %v1724_v52, %v904_v53 }
 0x339   : > { %1031 = vmatpush.msra.mxu0 %v913_v54 }
 0x33a   : > { %1005 = vperm.xlu0 %1718, %v995_v55   ;;  %v1731_v55 = vld [vmem:[%s2364_s3 + $0x8] ss:$0 sm:$0xff] }
 0x33c   : > { %1000 = vperm.xlu1 %1719, %v994_v56   ;;  %1440 = vperm.xlu2 %1720, %v1434_v57  }
 0x33e   : > { %v900_v58 = vpop.permute.xlu2 %899 }
 0x33f   : > { %v911_v6 = vmul.f32 %v1724_v52, %v900_v58 }
 0x342   : > { %1445 = vperm.xlu0 %1718, %v1435_v59  }
 0x344   : > { %1450 = vperm.xlu1 %1719, %v1436_v60   ;;  %1455 = vperm.xlu2 %1720, %v1437_v61  }
 0x346   : > { %v951_v62 = vpop.permute.xlu2 %950 }
 0x347   : > { %v962_v10 = vmul.f32 %v1725_v63, %v951_v62 }
 0x34e   : > { %v955_v0 = vpop.permute.xlu1 %954  ;;  %v885_v1 = vpop.permute.xlu2 %884 }
 0x34f   : > { %v964_v2 = vmul.f32 %v1725_v63, %v955_v0  ;;  %v895_v21 = vmul.f32 %v1726_v16, %v885_v1 }
 0x351   : > { %1060 = vmatpush.msra.mxu1 %v964_v2  ;;  %v983_v2 = vld [vmem:[%s1864_s26 + $0x8] sm:$0xff] }
 0x354   : > { %v902_v3 = vpop.permute.xlu0 %901 }
 0x355   : > { %v912_v4 = vmul.f32 %v1724_v52, %v902_v3 }
 0x356   : > { %v936_v5 = vpop.permute.xlu2 %935 }
 0x357   : > { %1032 = vmatpush.msra.mxu0 %v912_v4  ;;  %v946_v28 = vmul.f32 %v1727_v24, %v936_v5 }
 0x359   : > { %1033 = vmatpush.msra.mxu0 %v911_v6  ;;  %v982_v6 = vld [vmem:[%s1864_s26] sm:$0xff] }
 0x35c   : > { %v953_v7 = vpop.permute.xlu0 %952 }
 0x35d   : > { %v963_v8 = vmul.f32 %v1725_v63, %v953_v7  ;;  %v986_v7 = vld [vmem:[%s1864_s26 + $0x20] sm:$0xff] }
 0x35e   : > { %v898_v9 = vpop.permute.xlu1 %897  ;;  %v870_v14 = vpop.permute.xlu2 %869 }
 0x35f   : > { %v910_v13 = vmul.f32 %v1724_v52, %v898_v9  ;;  %1061 = vmatpush.msra.mxu1 %v963_v8  ;;  %v879_v36 = vmul.f32 %v1728_v30, %v870_v14  ;;  %v985_v8 = vld [vmem:[%s1864_s26 + $0x18] sm:$0xff]  ;;  %v992_v14 = vld [vmem:[%s1864_s26 + $0x50] sm:$0xff] }
 0x360   : > { %v989_v9 = vld [vmem:[%s1864_s26 + $0x38] sm:$0xff] }
 0x361   : > { %1034 = vmatpush.msra.mxu0 %v910_v13  ;;  %1062 = vmatpush.msra.mxu1 %v962_v10  ;;  %v990_v10 = vld [vmem:[%s1864_s26 + $0x40] sm:$0xff]  ;;  %v988_v13 = vld [vmem:[%s1864_s26 + $0x30] sm:$0xff] }
 0x364   : > { %v887_v18 = vpop.permute.xlu0 %886 }
 0x365   : > { %v896_v19 = vmul.f32 %v1726_v16, %v887_v18  ;;  %v991_v18 = vld [vmem:[%s1864_s26 + $0x48] sm:$0xff] }
 0x366   : > { %v949_v20 = vpop.permute.xlu1 %948  ;;  %v921_v23 = vpop.permute.xlu2 %920 }
 0x367   : > { %v961_v22 = vmul.f32 %v1725_v63, %v949_v20  ;;  %1035 = vmatpush.msra.mxu0 %v896_v19  ;;  %v930_v42 = vmul.f32 %v1729_v38, %v921_v23 }
 0x369   : > { %1036 = vmatpush.msra.mxu0 %v895_v21  ;;  %1063 = vmatpush.msra.mxu1 %v961_v22 }
 0x36c   : > { %v938_v25 = vpop.permute.xlu0 %937 }
 0x36d   : > { %v947_v26 = vmul.f32 %v1727_v24, %v938_v25 }
 0x36e   : > { %v883_v27 = vpop.permute.xlu1 %882  ;;  %v864_v31 = vpop.permute.xlu2 %863 }
 0x36f   : > { %v894_v29 = vmul.f32 %v1726_v16, %v883_v27  ;;  %1064 = vmatpush.msra.mxu1 %v947_v26  ;;  %v876_v50 = vmul.f32 %v1728_v30, %v864_v31 }
 0x371   : > { %1037 = vmatpush.msra.mxu0 %v894_v29  ;;  %1065 = vmatpush.msra.mxu1 %v946_v28 }
 0x374   : > { %v881_v32 = vpop.permute.xlu0 %880 }
 0x375   : > { %v893_v33 = vmul.f32 %v1726_v16, %v881_v32  ;;  %v993_v16 = vld [vmem:[%s1864_s26 + $0x58] sm:$0xff] }
 0x376   : > { %v934_v35 = vpop.permute.xlu1 %933  ;;  %v854_v40 = vpop.permute.xlu2 %853 }
 0x377   : > { %v945_v37 = vmul.f32 %v1727_v24, %v934_v35  ;;  %1038 = vmatpush.msra.mxu0 %v893_v33  ;;  %v862_v52 = vmul.f32 %v1730_v46, %v854_v40 }
 0x379   : > { %1039 = vmatpush.msra.mxu0 %v879_v36  ;;  %1066 = vmatpush.msra.mxu1 %v945_v37 }
 0x37c   : > { %v932_v11 = vpop.permute.xlu0 %931 }
 0x37d   : > { %v944_v39 = vmul.f32 %v1727_v24, %v932_v11 }
 0x37e   : > { %v868_v41 = vpop.permute.xlu1 %867  ;;  %v852_v51 = vpop.permute.xlu2 %851 }
 0x37f   : > { %v878_v43 = vmul.f32 %v1728_v30, %v868_v41  ;;  %1067 = vmatpush.msra.mxu1 %v944_v39  ;;  %v861_v53 = vmul.f32 %v1730_v46, %v852_v51 }
 0x381   : > { %1040 = vmatpush.msra.mxu0 %v878_v43  ;;  %1068 = vmatpush.msra.mxu1 %v930_v42 }
 0x384   : > { %v866_v45 = vpop.permute.xlu0 %865 }
 0x385   : > { %v877_v47 = vmul.f32 %v1728_v30, %v866_v45 }
 0x386   : > { %v919_v48 = vpop.permute.xlu1 %918  ;;  %v966_v63 = vpop.permute.xlu2 %965 }
 0x387   : > { %v929_v17 = vmul.f32 %v1729_v38, %v919_v48  ;;  %1041 = vmatpush.msra.mxu0 %v877_v47  ;;  %v978_v4 = vmul.f32 %v1731_v55, %v966_v63 }
 0x389   : > { %1042 = vmatpush.msra.mxu0 %v876_v50  ;;  %1069 = vmatpush.msra.mxu1 %v929_v17 }
 0x38b   : > { %1043 = vmatpush.msra.mxu0 %v862_v52 }
 0x38c   : > { %v917_v54 = vpop.permute.xlu0 %916 }
 0x38d   : > { %v928_v56 = vmul.f32 %v1729_v38, %v917_v54  ;;  %1044 = vmatpush.msra.mxu0 %v861_v53 }
 0x38e   : > { %v972_v57 = vpop.permute.xlu1 %971  ;;  %v1011_v36 = vpop.permute.xlu2 %1010 }
 0x38f   : > { %1070 = vmatpush.msra.mxu1 %v928_v56  ;;  %v981_v58 = vmul.f32 %v1731_v55, %v972_v57 }
 0x391   : > { %1101 = vmatpush.msra.mxu2 %v981_v58 }
 0x394   : > { %v915_v59 = vpop.permute.xlu0 %914 }
 0x395   : > { %v927_v60 = vmul.f32 %v1729_v38, %v915_v59 }
 0x396   : > { %v970_v61 = vpop.permute.xlu1 %969 }
 0x397   : > { %v980_v62 = vmul.f32 %v1731_v55, %v970_v61  ;;  %1071 = vmatpush.msra.mxu1 %v927_v60 }
 0x399   : > { %1072 = vmatpush.msra.mxu1 %v2046_v34  ;;  %1102 = vmatpush.msra.mxu2 %v980_v62  ;;  %v984_v34 = vld [vmem:[%s1864_s26 + $0x10] sm:$0xff]  ;;  %v1782_v62 = vmov 683565275  }
 0x39b   : > { %1073 = vmatpush.msra.mxu1 %v2053_v44 }
 0x39c   : > { %v968_v0 = vpop.permute.xlu0 %967 }
 0x39d   : > { %v979_v1 = vmul.f32 %v1731_v55, %v968_v0  ;;  %1074 = vmatpush.msra.mxu1 %v2055_v12  ;;  %v1783_v0 = vmov 2475754826  }
 0x39e   : > { %v850_v3 = vpop.permute.xlu1 %849 }
 0x39f   : > { %v860_v5 = vmul.f32 %v1730_v46, %v850_v3  ;;  %1075 = vmatpush.msra.mxu1 %v2062_v15  ;;  %1103 = vmatpush.msra.mxu2 %v979_v1  ;;  %v987_v15 = vld [vmem:[%s1864_s26 + $0x28] sm:$0xff] }
 0x3a0   : > { %1076 = vmatmul.f32.vlgmr.msra.gmra.mxu1 %v983_v2 }
 0x3a1   : > { %1045 = vmatpush.msra.mxu0 %v860_v5  ;;  %1104 = vmatpush.msra.mxu2 %v978_v4  ;;  %v1784_v4 = vmov 2131351028  }
 0x3a2   : > { %1618 = vmatmul.msk.f32.vlgmr.msra.gmra.mxu2 %vm1018_vm9, %v984_v34 }
 0x3a4   : > { %v848_v44 = vpop.permute.xlu0 %847 }
 0x3a5   : > { %v859_v12 = vmul.f32 %v1730_v46, %v848_v44  ;;  %v1785_v44 = vmov 2102212464  }
 0x3a6   : > { %v1016_v19 = vpop.permute.xlu1 %1015 }
 0x3a7   : > { %1046 = vmatpush.msra.mxu0 %v859_v12 }
 0x3a8   : > { %1047 = vmatmul.f32.vlgmr.msra.gmra.mxu0 %v982_v6  ;;  %1079 = vmatmul.f32.gmra.mxu1 %v986_v7  ;;  %v1786_v7 = vmov 920167782  }
 0x3aa   : > { %1619 = vmatmul.msk.f32.gmra.mxu2 %vm1018_vm9, %v987_v15 }
 0x3ac   : > { %v1006_v28 = vpop.permute.xlu0 %1005 }
 0x3ae   : > { %v1001_v21 = vpop.permute.xlu1 %1000 }
 0x3b0   : > { %1050 = vmatmul.f32.gmra.mxu0 %v985_v8  ;;  %1082 = vmatmul.f32.gmra.mxu1 %v989_v9  ;;  %v1787_v9 = vmov 1326507024  }
 0x3b2   : > { %1620 = vmatmul.msk.f32.gmra.mxu2 %vm1018_vm9, %v990_v10 }
 0x3b8   : > { %1053 = vmatmul.f32.gmra.mxu0 %v988_v13  ;;  %1085 = vmatmul.f32.gmra.mxu1 %v992_v14 }
 0x3ba   : > { %1621 = vmatmul.msk.f32.gmra.mxu2 %vm1018_vm9, %v993_v16 }
 0x3c0   : > { %1056 = vmatmul.f32.gmra.mxu0 %v991_v18 }
 0x41d   : > { %v1077_v20 = vpop.f32.mrf.mxu1 }
 0x425   : > { %v1048_v22 = vpop.f32.mrf.mxu0  ;;  %v1106_v23 = vpop.f32.mrf.mxu2 }
 0x426   : > { %v1049_v24 = vadd.f32 %v1048_v22, %v1001_v21  ;;  %v1080_v26 = vpop.f32.mrf.mxu1 }
 0x428   : > { %v1078_v25 = vadd.f32 %v1077_v20, %v1049_v24 }
 0x42a   : > { %v2149_v27 = vadd.f32 %v1106_v23, %v1078_v25 }
 0x42d   : > { %v1051_v29 = vpop.f32.mrf.mxu0  ;;  %v1109_v30 = vpop.f32.mrf.mxu2 }
 0x42e   : > { %v1052_v31 = vadd.f32 %v1051_v29, %v1006_v28  ;;  %v1083_v35 = vpop.f32.mrf.mxu1 }
 0x430   : > { %v1081_v32 = vadd.f32 %v1080_v26, %v1052_v31 }
 0x432   : > { %v2151_v33 = vadd.f32 %v1109_v30, %v1081_v32 }
 0x435   : > { %v1054_v37 = vpop.f32.mrf.mxu0  ;;  %v1112_v38 = vpop.f32.mrf.mxu2 }
 0x436   : > { %v1055_v11 = vadd.f32 %v1054_v37, %v1011_v36  ;;  %v1086_v43 = vpop.f32.mrf.mxu1 }
 0x438   : > { %v1084_v39 = vadd.f32 %v1083_v35, %v1055_v11 }
 0x43a   : > { %v2153_v40 = vadd.f32 %v1112_v38, %v1084_v39 }
 0x43c   : > { %v1121_v41 = vand.u32 2139095040, %v2153_v40  ;;  %v1118_v48 = vand.u32 2147483647, %v2153_v40 }
 0x43d   : > { %v1057_v42 = vpop.f32.mrf.mxu0  ;;  %v1115_v47 = vpop.f32.mrf.mxu2 }
 0x43e   : > { %v1122_v45 = vshrl.u32 %v1121_v41, 23  ;;  %v1058_v46 = vadd.f32 %v1057_v42, %v1016_v19  ;;  %v1125_v53 = vand.u32 8388607, %v1118_v48 }
 0x440   : > { %v1622_v50 = vadd.s32 4294967169, %v1122_v45  ;;  %v1087_v17 = vadd.f32 %v1086_v43, %v1058_v46  ;;  %v1126_v58 = vor.u32 8388608, %v1125_v53 }
 0x442   : > { %v1128_v51 = vadd.s32 1, %v1622_v50  ;;  %v2157_v52 = vadd.f32 %v1115_v47, %v1087_v17  ;;  %v2177_v21 = vshll.u32 %v1126_v58, 8 }
 0x444   : > { %vm1129_vm10 = vcmp.gt.s32.totalorder %v1128_v51, 0  ;;  %v1276_v54 = vand.u32 2139095040, %v2157_v52  ;;  %v1273_v56 = vand.u32 2147483647, %v2157_v52  ;;  %v1167_v35 = vand.u32 65535, %v2177_v21 }
 0x445   : > { %v1130_v55 = vsel %vm1129_vm10, %v1128_v51, 0  ;;  %v1168_v43 = vshrl.u32 %v2177_v21, 16 }
 0x446   : > { %v1132_v57 = vand.u32 31, %v1130_v55  ;;  %v1277_v60 = vshrl.u32 %v1276_v54, 23  ;;  %v2163_v61 = vshrl.u32 %v1130_v55, 5  ;;  %v1280_v2 = vand.u32 8388607, %v1273_v56 }
 0x448   : > { %v1133_v59 = vsub.s32 32, %v1132_v57  ;;  %v1135_v63 = vshll.u32 %v1782_v62, %v1132_v57  ;;  %v1138_v1 = vshll.u32 %v1783_v0, %v1132_v57  ;;  %v1141_v34 = vshll.u32 %v1784_v4, %v1132_v57 }
 0x449   : > { %v1144_v6 = vshll.u32 %v1785_v44, %v1132_v57  ;;  %v1147_v8 = vshll.u32 %v1786_v7, %v1132_v57  ;;  %v1625_v18 = vadd.s32 4294967169, %v1277_v60  ;;  %vm1150_vm11 = vcmp.lt.s32.totalorder %v2163_v61, 1 }
 0x44a   : > { %v1136_v3 = vshrl.u32 %v1783_v0, %v1133_v59  ;;  %v1139_v5 = vshrl.u32 %v1784_v4, %v1133_v59  ;;  %v1142_v12 = vshrl.u32 %v1785_v44, %v1133_v59  ;;  %v1145_v15 = vshrl.u32 %v1786_v7, %v1133_v59 }
 0x44b   : > { %v1148_v10 = vshrl.u32 %v1787_v9, %v1133_v59  ;;  %vm1153_vm12 = vcmp.lt.s32.totalorder %v2163_v61, 4  ;;  %v1281_v24 = vor.u32 8388608, %v1280_v2  ;;  %vm1152_vm13 = vcmp.lt.s32.totalorder %v2163_v61, 3 }
 0x44c   : > { %v2170_v13 = vor.u32 %v1136_v3, %v1135_v63  ;;  %v2172_v14 = vor.u32 %v1139_v5, %v1138_v1  ;;  %v2174_v16 = vor.u32 %v1142_v12, %v1141_v34  ;;  %v1146_v19 = vor.u32 %v1145_v15, %v1144_v6 }
 0x44d   : > { %v1149_v20 = vor.u32 %v1148_v10, %v1147_v8  ;;  %v1283_v28 = vadd.s32 1, %v1625_v18  ;;  %vm1151_vm14 = vcmp.lt.s32.totalorder %v2163_v61, 2  ;;  %v2204_v38 = vshll.u32 %v1281_v24, 8 }
 0x44e   : > { %v1158_v22 = vsel %vm1150_vm11, %v2170_v13, %v2172_v14  ;;  %v1162_v23 = vsel %vm1150_vm11, %v2172_v14, %v2174_v16  ;;  %v1159_v25 = vsel %vm1153_vm12, %v1146_v19, 920167782  ;;  %v2209_v42 = vshrl.u32 %v1782_v62, %v1133_v59 }
 0x44f   : > { %v1163_v26 = vsel %vm1153_vm12, %v1149_v20, 1326507024  ;;  %v1160_v29 = vsel %vm1152_vm13, %v2174_v16, %v1159_v25  ;;  %vm1284_vm15 = vcmp.gt.s32.totalorder %v1283_v28, 0  ;;  %v1322_v50 = vand.u32 65535, %v2204_v38 }
 0x450   : > { %v1164_v30 = vsel %vm1152_vm13, %v1146_v19, %v1163_v26  ;;  %v1161_v31 = vsel %vm1151_vm14, %v1158_v22, %v1160_v29  ;;  %v1285_v39 = vsel %vm1284_vm15, %v1283_v28, 0  ;;  %v1323_v17 = vshrl.u32 %v2204_v38, 16 }
 0x451   : > { %v1165_v32 = vsel %vm1151_vm14, %v1162_v23, %v1164_v30  ;;  %v1192_v11 = vshrl.u32 %v1161_v31, 16  ;;  %v1287_v45 = vand.u32 31, %v1285_v39  ;;  %v1191_v47 = vand.u32 65535, %v1161_v31 }
 0x452   : > { %v1169_v36 = vand.u32 65535, %v1165_v32  ;;  %v1170_v37 = vshrl.u32 %v1165_v32, 16  ;;  %v2219_v58 = vshrl.u32 %v1285_v39, 5 }
 0x453   : > { %v2214_v53 = vmul.u32 %v1192_v11, %v1167_v35  ;;  %v2216_v54 = vmul.u32 %v1192_v11, %v1168_v43  ;;  %v1288_v55 = vsub.s32 32, %v1287_v45  ;;  %v1299_v59 = vshll.u32 %v1785_v44, %v1287_v45 }
 0x454   : > { %v2206_v41 = vmul.u32 %v1170_v37, %v1167_v35  ;;  %v1171_v46 = vmul.u32 %v1169_v36, %v1167_v35  ;;  %v1174_v51 = vmul.u32 %v1170_v37, %v1168_v43  ;;  %v1302_v60 = vshll.u32 %v1786_v7, %v1287_v45 }
 0x455   : > { %v1300_v63 = vshrl.u32 %v1786_v7, %v1288_v55  ;;  %v1303_v1 = vshrl.u32 %v1787_v9, %v1288_v55  ;;  %v1290_v2 = vshll.u32 %v1782_v62, %v1287_v45  ;;  %v1291_v3 = vshrl.u32 %v1783_v0, %v1288_v55 }
 0x456   : > { %v1175_v57 = vshll.u32 %v2206_v41, 16  ;;  %v1293_v5 = vshll.u32 %v1783_v0, %v1287_v45  ;;  %v1294_v34 = vshrl.u32 %v1784_v4, %v1288_v55  ;;  %v1296_v12 = vshll.u32 %v1784_v4, %v1287_v45 }
 0x457   : > { %v1297_v6 = vshrl.u32 %v1785_v44, %v1288_v55  ;;  %v1301_v15 = vor.u32 %v1300_v63, %v1299_v59  ;;  %v1304_v8 = vor.u32 %v1303_v1, %v1302_v60  ;;  %v1292_v10 = vor.u32 %v1291_v3, %v1290_v2 }
 0x458   : > { %v2224_v18 = vmul.u32 %v1169_v36, %v1168_v43  ;;  %vm2226_vm0 = vc.u32 %v1171_v46, %v1175_v57  ;;  %vm1308_vm1 = vcmp.lt.s32.totalorder %v2219_v58, 4  ;;  %v1295_v7 = vor.u32 %v1294_v34, %v1293_v5 }
 0x459   : > { %v1298_v9 = vor.u32 %v1297_v6, %v1296_v12  ;;  %v1314_v20 = vsel %vm1308_vm1, %v1301_v15, 920167782  ;;  %v1318_v0 = vsel %vm1308_vm1, %v1304_v8, 1326507024  ;;  %vm1305_vm2 = vcmp.lt.s32.totalorder %v2219_v58, 1 }
 0x45a   : > { %vm1307_vm3 = vcmp.lt.s32.totalorder %v2219_v58, 3  ;;  %vm1306_vm4 = vcmp.lt.s32.totalorder %v2219_v58, 2  ;;  %v1313_v4 = vsel %vm1305_vm2, %v1292_v10, %v1295_v7  ;;  %v1176_v25 = vshrl.u32 %v2206_v41, 16 }
 0x45b   : > { %v1315_v44 = vsel %vm1307_vm3, %v1298_v9, %v1314_v20  ;;  %v1317_v22 = vsel %vm1305_vm2, %v1295_v7, %v1298_v9  ;;  %v1319_v24 = vsel %vm1307_vm3, %v1301_v15, %v1318_v0  ;;  %v1193_v26 = vmul.u32 %v1191_v47, %v1167_v35 }
 0x45c   : > { %v1316_v23 = vsel %vm1306_vm4, %v1313_v4, %v1315_v44  ;;  %v1320_v28 = vsel %vm1306_vm4, %v1317_v22, %v1319_v24  ;;  %v1180_v31 = vsel %vm2226_vm0, 1, %v1773_v49  ;;  %v1181_v32 = vadd.s32 %v1175_v57, %v1171_v46 }
 0x45d   : > { %v1346_v29 = vand.u32 65535, %v1316_v23  ;;  %v1347_v30 = vshrl.u32 %v1316_v23, 16  ;;  %v1324_v36 = vand.u32 65535, %v1320_v28  ;;  %v1325_v37 = vshrl.u32 %v1320_v28, 16 }
 0x45e   : > { %v2254_v11 = vmul.u32 %v1191_v47, %v1168_v43  ;;  %v1289_v39 = vshrl.u32 %v1782_v62, %v1288_v55  ;;  %v1177_v35 = vshll.u32 %v2224_v18, 16  ;;  %v1310_v41 = vsel %vm1308_vm1, %v1298_v9, 2102212464 }
 0x45f   : > { %v1349_v45 = vmul.u32 %v1347_v30, %v1322_v50  ;;  %v1350_v59 = vmul.u32 %v1346_v29, %v1323_v17  ;;  %v1327_v60 = vmul.u32 %v1325_v37, %v1322_v50  ;;  %v1328_v63 = vmul.u32 %v1324_v36, %v1323_v17 }
 0x460   : > { %v1182_v1 = vadd.s32 %v1180_v31, %v1174_v51  ;;  %v1326_v2 = vmul.u32 %v1324_v36, %v1322_v50  ;;  %v1348_v3 = vmul.u32 %v1346_v29, %v1322_v50  ;;  %v1351_v5 = vmul.u32 %v1347_v30, %v1323_v17 }
 0x461   : > { %v1352_v46 = vshll.u32 %v1349_v45, 16  ;;  %v1329_v57 = vmul.u32 %v1325_v37, %v1323_v17  ;;  %v1330_v34 = vshll.u32 %v1327_v60, 16  ;;  %v1332_v43 = vshll.u32 %v1328_v63, 16 }
 0x462   : > { %v1354_v47 = vshll.u32 %v1350_v59, 16  ;;  %vm1183_vm6 = vc.u32 %v1181_v32, %v1177_v35  ;;  %v1197_v55 = vshll.u32 %v2214_v53, 16  ;;  %v1309_v50 = vsel %vm1305_vm2, %v1289_v39, %v1292_v10 }
 0x463   : > { %vm1356_vm5 = vc.u32 %v1348_v3, %v1352_v46  ;;  %v1358_v62 = vadd.s32 %v1352_v46, %v1348_v3  ;;  %vm1334_vm7 = vc.u32 %v1326_v2, %v1330_v34  ;;  %v1336_v12 = vadd.s32 %v1330_v34, %v1326_v2 }
 0x464   : > { %v1357_v6 = vsel %vm1356_vm5, 1, %v1773_v49  ;;  %v1184_v15 = vsel %vm1183_vm6, 1, %v1773_v49  ;;  %v1335_v51 = vsel %vm1334_vm7, 1, %v1773_v49  ;;  %v1311_v20 = vsel %vm1307_vm3, %v1295_v7, %v1310_v41 }
 0x465   : > { %v1359_v17 = vadd.s32 %v1357_v6, %v1351_v5  ;;  %vm1360_vm8 = vc.u32 %v1358_v62, %v1354_v47  ;;  %v1337_v8 = vadd.s32 %v1335_v51, %v1329_v57  ;;  %vm1338_vm9 = vc.u32 %v1336_v12, %v1332_v43 }
 0x466   : > { %v1361_v19 = vsel %vm1360_vm8, 1, %v1773_v49  ;;  %v1186_v9 = vadd.s32 %v1184_v15, %v1182_v1  ;;  %v1339_v0 = vsel %vm1338_vm9, 1, %v1773_v49  ;;  %v1353_v4 = vshrl.u32 %v1349_v45, 16 }
 0x467   : > { %v1363_v44 = vadd.s32 %v1361_v19, %v1359_v17  ;;  %v1331_v22 = vshrl.u32 %v1327_v60, 16  ;;  %v1341_v23 = vadd.s32 %v1339_v0, %v1337_v8  ;;  %v1355_v24 = vshrl.u32 %v1350_v59, 16 }
 0x468   : > { %vm1201_vm10 = vc.u32 %v1193_v26, %v1197_v55  ;;  %v1199_v28 = vshll.u32 %v2254_v11, 16  ;;  %v1203_v30 = vadd.s32 %v1197_v55, %v1193_v26  ;;  %v1333_v31 = vshrl.u32 %v1328_v63, 16 }
 0x469   : > { %v1364_v10 = vadd.s32 %v1363_v44, %v1353_v4  ;;  %v1202_v29 = vsel %vm1201_vm10, 1, %v1773_v49  ;;  %v1342_v32 = vadd.s32 %v1341_v23, %v1331_v22  ;;  %v1187_v36 = vadd.s32 %v1186_v9, %v1176_v25 }
 0x46a   : > { %v1204_v37 = vadd.s32 %v1202_v29, %v2216_v54  ;;  %v1155_v7 = vsel %vm1153_vm12, %v2174_v16, 2102212464  ;;  %v1312_v39 = vsel %vm1306_vm4, %v1309_v50, %v1311_v20  ;;  %vm1205_vm15 = vc.u32 %v1203_v30, %v1199_v28 }
 0x46b   : > { %v1365_v45 = vadd.s32 %v1364_v10, %v1355_v24  ;;  %v1343_v59 = vadd.s32 %v1342_v32, %v1333_v31  ;;  %v1362_v35 = vadd.s32 %v1358_v62, %v1354_v47  ;;  %v1178_v41 = vshrl.u32 %v2224_v18, 16 }
 0x46c   : > { %v1206_v26 = vsel %vm1205_vm15, 1, %v1773_v49  ;;  %v1154_v54 = vsel %vm1150_vm11, %v2209_v42, %v2170_v13  ;;  %v1198_v60 = vshrl.u32 %v2214_v53, 16  ;;  %v1156_v58 = vsel %vm1152_vm13, %v2172_v14, %v1155_v7 }
 0x46d   : > { %v1369_v25 = vadd.s32 1, %v1365_v45  ;;  %v1208_v16 = vadd.s32 %v1206_v26, %v1204_v37  ;;  %v1366_v63 = vmul.u32 %v2204_v38, %v1312_v39  ;;  %vm1368_vm12 = vc.u32 %v1343_v59, %v1362_v35 }
 0x46e   : > { %v1188_v1 = vadd.s32 %v1187_v36, %v1178_v41  ;;  %v1200_v49 = vshrl.u32 %v2254_v11, 16  ;;  %v1207_v5 = vadd.s32 %v1203_v30, %v1199_v28  ;;  %v1157_v13 = vsel %vm1151_vm14, %v1154_v54, %v1156_v58 }
 0x46f   : > { %v1370_v18 = vsel %vm1368_vm12, %v1369_v25, %v1365_v45  ;;  %v1209_v2 = vadd.s32 %v1208_v16, %v1198_v60  ;;  %v1211_v57 = vmul.u32 %v2177_v21, %v1157_v13  ;;  %v1367_v8 = vadd.s32 %v1362_v35, %v1343_v59 }
 0x470   : > { %v1371_v3 = vadd.s32 %v1370_v18, %v1366_v63  ;;  %vm1213_vm11 = vc.u32 %v1188_v1, %v1207_v5  ;;  %v1212_v29 = vadd.s32 %v1207_v5, %v1188_v1  ;;  %vm1275_vm2 = vcmp.lt.s32.totalorder %v2157_v52, 0 }
 0x471   : > { %v1210_v42 = vadd.s32 %v1209_v2, %v1200_v49  ;;  %vm2299_vm3 = vcmp.le.f32.partialorder %v1273_v56, 0.7853982  ;;  %vm1120_vm4 = vcmp.lt.s32.totalorder %v2153_v40, 0  ;;  %vm2311_vm5 = vcmp.le.f32.partialorder %v1118_v48, 0.7853982 }
 0x472   : > { %v1372_v53 = vadd.s32 536870912, %v1371_v3  ;;  %vm1416_vm9 = vweird.f32 %v2157_v52 }
 0x473   : > { %v1214_v46 = vadd.s32 1, %v1210_v42 }
 0x474   : > { %v1373_v14 = vshrl.u32 %v1372_v53, 30  ;;  %v1750_v53 = vld [vmem:[%s2371_s10 + $0x10] sm:$0xff] }
 0x475   : > { %v1215_v34 = vsel %vm1213_vm11, %v1214_v46, %v1210_v42  ;;  %vm1261_vm11 = vweird.f32 %v2153_v40 }
 0x476   : > { %v1374_v38 = vshll.u32 %v1373_v14, 30  ;;  %v1216_v43 = vadd.s32 %v1215_v34, %v1211_v57  ;;  %v1397_v60 = vsub.s32 4, %v1373_v14 }
 0x478   : > { %v1375_v47 = vsub.s32 %v1371_v3, %v1374_v38  ;;  %v1217_v62 = vadd.s32 536870912, %v1216_v43  ;;  %v1398_v49 = vsel %vm1275_vm2, %v1397_v60, %v1373_v14  ;;  %v1432_v60 = vld [vmem:[%s1869_s29 + $0x10] sm:$0xff] }
 0x479   : > { %v1400_v42 = vsel %vm2299_vm3, 0, %v1398_v49 }
 0x47a   : > { %vm1376_vm13 = vcmp.lt.s32.totalorder %v1375_v47, 0  ;;  %v1377_v11 = vsub.s32 0, %v1375_v47  ;;  %v2293_v55 = vshrl.u32 %v1217_v62, 30 }
 0x47c   : > { %v1378_v12 = vsel %vm1376_vm13, %v1377_v11, %v1375_v47  ;;  %v1219_v61 = vshll.u32 %v2293_v55, 30  ;;  %v1242_v34 = vsub.s32 4, %v2293_v55  ;;  %v1417_v11 = vadd.s32 3, %v1400_v42 }
 0x47d   : > { %v1379_v6 = vclz %v1378_v12  ;;  %vm1458_vm13 = vcmask 130048  }
 0x47e   : > { %v1220_v15 = vsub.s32 %v1216_v43, %v1219_v61 }
 0x47f   : > { %v1626_v50 = vadd.s32 4294967294, %v1379_v6 }
 0x480   : > { %vm1221_vm14 = vcmp.lt.s32.totalorder %v1220_v15, 0  ;;  %v1222_v51 = vsub.s32 0, %v1220_v15 }
 0x481   : > { %vm1627_vm0 = vcmp.lt.s32.totalorder %v1626_v50, 0 }
 0x482   : > { %v1382_v21 = vsel %vm1627_vm0, 0, %v1626_v50  ;;  %v1223_v17 = vsel %vm1221_vm14, %v1222_v51, %v1220_v15 }
 0x483   : > { %v1383_v19 = vsub.s32 32, %v1382_v21  ;;  %v1387_v9 = vsub.s32 4294967266, %v1382_v21  ;;  %v1224_v20 = vclz %v1223_v17  ;;  %v1384_v0 = vshll.u32 %v1375_v47, %v1382_v21 }
 0x485   : > { %v1385_v4 = vshrl.u32 %v1367_v8, %v1383_v19  ;;  %v1388_v44 = vadd.s32 127, %v1387_v9  ;;  %v1623_v22 = vadd.s32 4294967294, %v1224_v20  ;;  %v1418_v8 = vand.u32 3, %v1417_v11 }
 0x487   : > { %v1386_v23 = vor.u32 %v1385_v4, %v1384_v0  ;;  %v1389_v24 = vshll.u32 %v1388_v44, 23  ;;  %vm1624_vm1 = vcmp.lt.s32.totalorder %v1623_v22, 0  ;;  %vm1420_vm6 = vcmp.eq.s32.totalorder %v1418_v8, 0 }
 0x488   : > { %v1227_v10 = vsel %vm1624_vm1, 0, %v1623_v22  ;;  %vm1423_vm7 = vcmp.eq.s32.totalorder %v1418_v8, 2  ;;  %vm1419_vm8 = vcmp.lt.s32.totalorder %v1418_v8, 2 }
 0x489   : > { %v1390_v28 = vor.u32 4788187, %v1389_v24  ;;  %v1228_v30 = vsub.s32 32, %v1227_v10  ;;  %v1232_v31 = vsub.s32 4294967266, %v1227_v10  ;;  %v1393_v36 = vcvt.s32.f32 %v1386_v23 }
 0x48a   : > { %v1229_v7 = vshll.u32 %v1220_v15, %v1227_v10  ;;  %v1243_v15 = vsel %vm1120_vm4, %v1242_v34, %v2293_v55 }
 0x48b   : > { %v1391_v32 = vand.u32 2147483647, %v1390_v28  ;;  %v1230_v37 = vshrl.u32 %v1212_v29, %v1228_v30  ;;  %v1233_v39 = vadd.s32 127, %v1232_v31  ;;  %v1245_v19 = vsel %vm2311_vm5, 0, %v1243_v15 }
 0x48c   : > { %v1262_v24 = vadd.s32 3, %v1245_v19 }
 0x48d   : > { %v1394_v45 = vmul.f32 %v1393_v36, %v1391_v32  ;;  %v1231_v59 = vor.u32 %v1230_v37, %v1229_v7  ;;  %v1234_v35 = vshll.u32 %v1233_v39, 23 }
 0x48e   : > { %v1263_v37 = vand.u32 3, %v1262_v24 }
 0x48f   : > { %v1395_v41 = vxor.u32 2147483648, %v1394_v45  ;;  %v1235_v26 = vor.u32 4788187, %v1234_v35  ;;  %v1238_v63 = vcvt.s32.f32 %v1231_v59 }
 0x490   : > { %vm1265_vm10 = vcmp.eq.s32.totalorder %v1263_v37, 0  ;;  %vm1268_vm15 = vcmp.eq.s32.totalorder %v1263_v37, 2  ;;  %vm1264_vm12 = vcmp.lt.s32.totalorder %v1263_v37, 2 }
 0x491   : > { %v1396_v25 = vsel %vm1275_vm2, %v1395_v41, %v1394_v45  ;;  %v1236_v58 = vand.u32 2147483647, %v1235_v26 }
 0x492   : > { %v1399_v16 = vsel %vm2299_vm3, %v2157_v52, %v1396_v25  ;;  %v1430_v25 = vld [vmem:[%s1869_s29] sm:$0xff] }
 0x493   : > { %v1401_v1 = vmul.f32 %v1399_v16, %v1399_v16  ;;  %v1239_v18 = vmul.f32 %v1238_v63, %v1236_v58  ;;  %v1441_v58 = vpop.permute.xlu2 %1440 }
 0x495   : > { %v1402_v2 = vmul.f32 -0.001358992, %v1401_v1  ;;  %v1409_v3 = vmul.f32 -0.00019511016, %v1401_v1  ;;  %v1240_v5 = vxor.u32 2147483648, %v1239_v18 }
 0x497   : > { %v1403_v56 = vadd.f32 0.041655596, %v1402_v2  ;;  %v1410_v13 = vadd.f32 0.008332121, %v1409_v3  ;;  %v1241_v46 = vsel %vm1120_vm4, %v1240_v5, %v1239_v18  ;;  %v1749_v3 = vld [vmem:[%s2371_s10 + $0x8] sm:$0xff] }
 0x498   : > { %v1244_v38 = vsel %vm2311_vm5, %v2153_v40, %v1241_v46  ;;  %v1748_v40 = vld [vmem:[%s2371_s10] sm:$0xff] }
 0x499   : > { %v1404_v57 = vmul.f32 %v1403_v56, %v1401_v1  ;;  %v1411_v14 = vmul.f32 %v1410_v13, %v1401_v1  ;;  %v1246_v43 = vmul.f32 %v1244_v38, %v1244_v38  ;;  %v1451_v56 = vpop.permute.xlu1 %1450 }
 0x49b   : > { %v1405_v47 = vadd.f32 -0.4999988, %v1404_v57  ;;  %v1412_v62 = vadd.f32 -0.16666654, %v1411_v14  ;;  %v1247_v12 = vmul.f32 -0.001358992, %v1246_v43  ;;  %v1456_v57 = vpop.permute.xlu2 %1455 }
 0x49c   : > { %v1254_v48 = vmul.f32 -0.00019511016, %v1246_v43 }
 0x49d   : > { %v1406_v61 = vmul.f32 %v1405_v47, %v1401_v1  ;;  %v1413_v6 = vmul.f32 %v1412_v62, %v1401_v1  ;;  %v1248_v50 = vadd.f32 0.041655596, %v1247_v12 }
 0x49e   : > { %v1255_v51 = vadd.f32 0.008332121, %v1254_v48 }
 0x49f   : > { %v1407_v21 = vadd.f32 1.0, %v1406_v61  ;;  %v1414_v17 = vadd.f32 1.0, %v1413_v6  ;;  %v1249_v9 = vmul.f32 %v1248_v50, %v1246_v43 }
 0x4a0   : > { %v1256_v20 = vmul.f32 %v1255_v51, %v1246_v43 }
 0x4a1   : > { %v1415_v0 = vmul.f32 %v1414_v17, %v1399_v16  ;;  %v1424_v4 = vxor.u32 2147483648, %v1407_v21  ;;  %v1250_v44 = vadd.f32 -0.4999988, %v1249_v9  ;;  %v1433_v16 = vld [vmem:[%s1869_s29 + $0x18] sm:$0xff] }
 0x4a2   : > { %v1257_v22 = vadd.f32 -0.16666654, %v1256_v20 }
 0x4a3   : > { %v1421_v23 = vxor.u32 2147483648, %v1415_v0  ;;  %v1251_v10 = vmul.f32 %v1250_v44, %v1246_v43  ;;  %v1425_v29 = vsel %vm1423_vm7, %v1424_v4, %v1415_v0 }
 0x4a4   : > { %v1258_v55 = vmul.f32 %v1257_v22, %v1246_v43 }
 0x4a5   : > { %v1422_v28 = vsel %vm1420_vm6, %v1407_v21, %v1421_v23  ;;  %v1252_v31 = vadd.f32 1.0, %v1251_v10 }
 0x4a6   : > { %v1426_v30 = vsel %vm1419_vm8, %v1422_v28, %v1425_v29  ;;  %v1259_v32 = vadd.f32 1.0, %v1258_v55 }
 0x4a7   : > { %v1427_v36 = vsel %vm1416_vm9, nan, %v1426_v30  ;;  %v1269_v45 = vxor.u32 2147483648, %v1252_v31 }
 0x4a8   : > { %v1429_v7 = vmul.f32 %v1427_v36, %v2151_v33  ;;  %v1260_v39 = vmul.f32 %v1259_v32, %v1244_v38  ;;  %v1431_v33 = vld [vmem:[%s1869_s29 + $0x8] sm:$0xff]  ;;  %v1751_v38 = vld [vmem:[%s2371_s10 + $0x18] sm:$0xff] }
 0x4aa   : > { %1485 = vmatpush.msra.mxu3 %v1429_v7  ;;  %v1266_v59 = vxor.u32 2147483648, %v1260_v39  ;;  %v1270_v52 = vsel %vm1268_vm15, %v1269_v45, %v1260_v39 }
 0x4ac   : > { %v1267_v35 = vsel %vm1265_vm10, %v1252_v31, %v1266_v59 }
 0x4ad   : > { %v1271_v41 = vsel %vm1264_vm12, %v1267_v35, %v1270_v52 }
 0x4ae   : > { %v1272_v26 = vsel %vm1261_vm11, nan, %v1271_v41 }
 0x4af   : > { %v1428_v54 = vmul.f32 %v1272_v26, %v2149_v27  ;;  %v1446_v27 = vpop.permute.xlu0 %1445 }
 0x4b1   : > { %1486 = vmatpush.msra.mxu3 %v1428_v54 }
 0x4b2   : > { %1628 = vmatmul.msk.f32.vlgmr.msra.gmra.mxu3 %vm1458_vm13, %v1430_v25 }
 0x4ba   : > { %1629 = vmatmul.msk.f32.gmra.mxu3 %vm1458_vm13, %v1431_v33 }
 0x4c2   : > { %1630 = vmatmul.msk.f32.gmra.mxu3 %vm1458_vm13, %v1432_v60 }
 0x4ca   : > { %1631 = vmatmul.msk.f32.gmra.mxu3 %vm1458_vm13, %v1433_v16 }
 0x535   : > { %v1488_v63 = vpop.f32.mrf.mxu3 }
 0x536   : > { %v1489_v1 = vadd.f32 %v1488_v63, %v1441_v58 }
 0x538   : > { %v1500_v18 = vadd.f32 %v1748_v40, %v1489_v1 }
 0x53a   : > { %1504 = vst [vmem:[%s2371_s10] sm:$0xff] %v1500_v18 }
 0x53d   : > { %v1491_v49 = vpop.f32.mrf.mxu3 }
 0x53e   : > { %v1492_v2 = vadd.f32 %v1491_v49, %v1446_v27 }
 0x540   : > { %v1501_v5 = vadd.f32 %v1749_v3, %v1492_v2 }
 0x542   : > { %1505 = vst [vmem:[%s2371_s10 + $0x8] sm:$0xff] %v1501_v5 }
 0x545   : > { %v1494_v13 = vpop.f32.mrf.mxu3 }
 0x546   : > { %v1495_v42 = vadd.f32 %v1494_v13, %v1451_v56 }
 0x548   : > { %v1502_v46 = vadd.f32 %v1750_v53, %v1495_v42 }
 0x54a   : > { %1506 = vst [vmem:[%s2371_s10 + $0x10] sm:$0xff] %v1502_v46 }
 0x54d   : > { %v1497_v14 = vpop.f32.mrf.mxu3 }
 0x54e   : > { %v1498_v34 = vadd.f32 %v1497_v14, %v1456_v57 }
 0x550   : > { %v1503_v43 = vadd.f32 %v1751_v38, %v1498_v34 }
 0x552   : > { %1507 = vst [vmem:[%s2371_s10 + $0x18] sm:$0xff] %v1503_v43 }
 0x553 PF: > { %s20_s13 = sadd.s32 1, %s1758_s13  }
 0x554   : > { %p17_p5 = scmp.ge.s32.totalorder %s20_s13, 4  }
 0x556   :  { %19 = sbr.rel (!%p17_p5) target bundleno = 1 (0x1), region = 118 }

</bundles_post_ra>
